<compile_context>
chip_gen: v7x
topology: tpu7x:2x2x1
jax: 0.10.0
libtpu: 0.0.40
codegen_flags: <defaults>
</compile_context>

<pallas_src>
import functools

import jax
import jax.numpy as jnp
from jax import lax
from jax.experimental import pallas as pl
from jax.experimental.pallas import tpu as pltpu


def _round_up(x, m):
    return ((x + m - 1) // m) * m


# -----------------------------------------------------------------------------
# Fused kernel: one (batch, row-tile) step
#   concat + ZeroPad2d + conv-pad  ->  conv3x3 + BN + ReLU (x2)  -> bf16 tile
# -----------------------------------------------------------------------------
def _decoder_block_kernel(*refs, tile_rows, part_channels, H, Hp, W, Wp, Wpad,
                          C1, Coutp, left, top):
    n_parts = len(part_channels)
    x_refs = refs[:n_parts]
    w1_ref, sc1_ref, sh1_ref, w2_ref, sc2_ref, sh2_ref = refs[n_parts:n_parts + 6]
    o_ref = refs[n_parts + 6]
    pad_ref, mid_ref = refs[n_parts + 7:n_parts + 9]

    TR = tile_rows
    o0 = pl.program_id(1) * TR                      # first output row of tile

    # ---- Stage 0: kj-unfolded, zero-padded input window in VMEM (bf16). ----
    # pad_ref[i, j, t*C1 + c] = Pz[o0 - 1 + i, j + t, c], where Pz is the
    # channel-concat after ZeroPad2d plus the conv's 1-wide zero ring;
    # out-of-range positions are zero.

    # 0a. zero only the thin column margins (ZeroPad2d / ring columns); the
    #     interior is fully overwritten below every step.
    for t in range(3):
        d0 = max(0, left + 1 - t)
        d1 = min(Wp, left + 1 - t + W)
        if d0 > 0:
            pad_ref[:, 0:d0, t * C1:(t + 1) * C1] = jnp.zeros(
                (TR + 4, d0, C1), pad_ref.dtype)
        if d1 < Wpad:
            pad_ref[:, d1:Wpad, t * C1:(t + 1) * C1] = jnp.zeros(
                (TR + 4, Wpad - d1, C1), pad_ref.dtype)

    # 0b. interior: write each input part's row directly into its 3 tap slots
    #     (no f32 concat value, no extra dtype casts).
    for i in range(TR + 4):
        src = o0 + (i - 2 - top)                    # source row in concat space
        valid = jnp.logical_and(src >= 0, src < H)
        srcc = jnp.clip(src, 0, H - 1)
        gate = valid.astype(jnp.bfloat16)
        coff = 0
        for p in range(n_parts):
            Cp = part_channels[p]
            row = x_refs[p][0, srcc] * gate         # (W, Cp) bf16, zeroed if OOB
            for t in range(3):
                d0 = max(0, left + 1 - t)
                d1 = min(Wp, left + 1 - t + W)
                if d1 > d0:
                    s0 = d0 - (left + 1 - t)
                    pad_ref[i, d0:d1, t * C1 + coff:t * C1 + coff + Cp] = (
                        row[s0:s0 + (d1 - d0), :])
            coff += Cp

    # ---- Stage 1: conv1 = 3 MXU matmuls (K = 3*C1) + BN + ReLU -------------
    M1 = (TR + 2) * Wpad
    acc1 = None
    for ki in range(3):
        a = pad_ref[ki:ki + TR + 2, :, :].reshape(M1, 3 * C1)
        d = jnp.dot(a, w1_ref[ki], preferred_element_type=jnp.float32)
        acc1 = d if acc1 is None else acc1 + d
    h1 = jnp.maximum(acc1 * sc1_ref[...] + sh1_ref[...], 0.0)
    h1 = h1.reshape(TR + 2, Wpad, Coutp)
    # zero the h1 rows that fall outside [0, Hp) (conv2's vertical zero ring)
    rows = lax.broadcasted_iota(jnp.int32, (TR + 2, 1, 1), 0) + (o0 - 1)
    h1 = jnp.where(jnp.logical_and(rows >= 0, rows < Hp), h1, 0.0)
    h1 = h1.astype(mid_ref.dtype)

    # ---- Stage 1b: kj-unfold h1 into the conv2 staging buffer (bf16) -------
    for t in range(3):
        d0 = max(0, 1 - t)
        d1 = min(Wp, Wp + 1 - t)
        if d0 > 0:
            mid_ref[:, 0:d0, t * Coutp:(t + 1) * Coutp] = jnp.zeros(
                (TR + 2, d0, Coutp), mid_ref.dtype)
        if d1 < Wpad:
            mid_ref[:, d1:Wpad, t * Coutp:(t + 1) * Coutp] = jnp.zeros(
                (TR + 2, Wpad - d1, Coutp), mid_ref.dtype)
        s0 = d0 + t - 1
        mid_ref[:, d0:d1, t * Coutp:(t + 1) * Coutp] = h1[:, s0:s0 + (d1 - d0), :]

    # ---- Stage 2: conv2 = 3 MXU matmuls (K = 3*Coutp) + BN + ReLU ----------
    M2 = TR * Wpad
    acc2 = None
    for ki in range(3):
        a = mid_ref[ki:ki + TR, :, :].reshape(M2, 3 * Coutp)
        d = jnp.dot(a, w2_ref[ki], preferred_element_type=jnp.float32)
        acc2 = d if acc2 is None else acc2 + d
    out = jnp.maximum(acc2 * sc2_ref[...] + sh2_ref[...], 0.0)
    o_ref[0] = out.reshape(TR, Wpad, Coutp).astype(o_ref.dtype)


# -----------------------------------------------------------------------------
# Row-tile selection from a VMEM budget
# -----------------------------------------------------------------------------
def _pick_tile_rows(Hp, Wpad, C1, Coutp, fixed_bytes, budget):
    for tr in (64, 32, 16, 8, 4, 2, 1):
        if tr != 1 and tr > max(1, Hp // 2):
            continue
        pad_b = (tr + 4) * Wpad * 3 * C1 * 2
        mid_b = (tr + 2) * Wpad * 3 * Coutp * 2
        acc_b = 2 * (tr + 2) * Wpad * Coutp * 4      # value accumulators / spill
        out_b = 2 * tr * Wpad * Coutp * 2            # double-buffered out tile
        if fixed_bytes + pad_b + mid_b + acc_b + out_b <= budget:
            return tr
    return 1


# -----------------------------------------------------------------------------
# pallas_call wrapper
# -----------------------------------------------------------------------------
def _fused_decoder_block(parts, params, pad, out_dtype=jnp.bfloat16):
    """parts: NHWC tensors (same N,H,W) concatenated along channels in-kernel."""
    left, right, top, bottom = pad
    N = int(parts[0].shape[0])
    H = int(parts[0].shape[1])
    W = int(parts[0].shape[2])
    part_channels = tuple(int(p.shape[3]) for p in parts)
    C1 = sum(part_channels)
    Cout = int(params["w1"].shape[-1])

    Hp, Wp = H + top + bottom, W + left + right
    Wpad = _round_up(Wp, 8)            # sublane-aligned staging / output width
    Coutp = _round_up(Cout, 128)       # lane-dense output channels

    # MXU operands in bf16, BN/ReLU epilogue in f32.
    parts = [p.astype(jnp.bfloat16) for p in parts]
    co_pad = Coutp - Cout
    w1 = params["w1"].astype(jnp.bfloat16)                      # (3,3,C1,Cout)
    w2 = params["w2"].astype(jnp.bfloat16)                      # (3,3,Cout,Cout)
    # fold the kj taps into the contraction dim; pad Cout lanes with zeros
    w1u = jnp.pad(w1, ((0, 0), (0, 0), (0, 0), (0, co_pad))
                  ).reshape(3, 3 * C1, Coutp)
    w2u = jnp.pad(w2, ((0, 0), (0, 0), (0, co_pad), (0, co_pad))
                  ).reshape(3, 3 * Coutp, Coutp)
    sc1 = jnp.pad(params["scale1"].astype(jnp.float32), (0, co_pad)).reshape(1, Coutp)
    sh1 = jnp.pad(params["shift1"].astype(jnp.float32), (0, co_pad)).reshape(1, Coutp)
    sc2 = jnp.pad(params["scale2"].astype(jnp.float32), (0, co_pad)).reshape(1, Coutp)
    sh2 = jnp.pad(params["shift2"].astype(jnp.float32), (0, co_pad)).reshape(1, Coutp)

    # resident bytes per step (double-buffered inputs + weights)
    in_resident = 2 * sum(H * W * c * 2 for c in part_channels)
    w_bytes = 2 * 2 * (int(w1u.size) + int(w2u.size)) + 2 * 4 * 4 * Coutp
    budget = 40 * 2 ** 20
    TR = _pick_tile_rows(Hp, Wpad, C1, Coutp, in_resident + w_bytes, budget)
    RT = -(-Hp // TR)

    kernel = functools.partial(
        _decoder_block_kernel, tile_rows=TR, part_channels=part_channels,
        H=H, Hp=Hp, W=W, Wp=Wp, Wpad=Wpad, C1=C1, Coutp=Coutp,
        left=left, top=top)

    # full-image input blocks; constant index along the row axis -> resident
    part_specs = [pl.BlockSpec((1, H, W, c), lambda n, r: (n, 0, 0, 0))
                  for c in part_channels]
    param_specs = [
        pl.BlockSpec((3, 3 * C1, Coutp), lambda n, r: (0, 0, 0)),
        pl.BlockSpec((1, Coutp), lambda n, r: (0, 0)),
        pl.BlockSpec((1, Coutp), lambda n, r: (0, 0)),
        pl.BlockSpec((3, 3 * Coutp, Coutp), lambda n, r: (0, 0, 0)),
        pl.BlockSpec((1, Coutp), lambda n, r: (0, 0)),
        pl.BlockSpec((1, Coutp), lambda n, r: (0, 0)),
    ]
    scratch_shapes = [
        pltpu.VMEM((TR + 4, Wpad, 3 * C1), jnp.bfloat16),    # unfolded input
        pltpu.VMEM((TR + 2, Wpad, 3 * Coutp), jnp.bfloat16), # unfolded h1
    ]

    out_itemsize = jnp.dtype(out_dtype).itemsize
    flops = 2 * 9 * N * Hp * Wpad * Coutp * (C1 + Coutp)
    in_bytes = sum(N * H * W * c * 2 for c in part_channels)
    out_bytes = N * RT * TR * Wpad * Coutp * out_itemsize
    cost = pl.CostEstimate(flops=int(flops), transcendentals=0,
                           bytes_accessed=int(in_bytes + w_bytes // 2 + out_bytes))

    scratch_b = ((TR + 4) * Wpad * 3 * C1 + (TR + 2) * Wpad * 3 * Coutp) * 2
    acc_b = 2 * (TR + 2) * Wpad * Coutp * 4
    out_blk = 2 * TR * Wpad * Coutp * out_itemsize
    need = in_resident + w_bytes + scratch_b + acc_b + out_blk + (2 << 20)
    # clamp so the scoped limit also fits v7x's 64 MiB physical VMEM
    vmem_limit = int(min(max(need, 8 * 2 ** 20), 48 * 2 ** 20))

    out = pl.pallas_call(
        kernel,
        out_shape=jax.ShapeDtypeStruct((N, RT * TR, Wpad, Coutp), out_dtype),
        grid=(N, RT),
        in_specs=part_specs + param_specs,
        out_specs=pl.BlockSpec((1, TR, Wpad, Coutp), lambda n, r: (n, r, 0, 0)),
        scratch_shapes=scratch_shapes,
        compiler_params=pltpu.CompilerParams(
            dimension_semantics=("parallel", "parallel"),
            vmem_limit_bytes=vmem_limit),
        cost_estimate=cost,
    )(*parts, w1u, sc1, sh1, w2u, sc2, sh2)

    # drop the row / width / channel padding outside the kernel (lane-dense
    # stores inside, tiny slice outside).
    return out[:, :Hp, :Wp, :Cout]


# -----------------------------------------------------------------------------
# Glue: nearest interpolation (plain JAX) + public forwards
# -----------------------------------------------------------------------------
def _nearest_resize_nhwc(x, out_h, out_w):
    # PyTorch F.interpolate(mode='nearest'): src_idx = floor(dst_idx * in / out)
    _, H, W, _ = x.shape
    hi = (jnp.arange(out_h) * H) // out_h
    wi = (jnp.arange(out_w) * W) // out_w
    return x[:, hi][:, :, wi]


def decoder_block_forward_nhwc(params, x_nhwc, skip_nhwc=None, pad=(0, 0, 0, 0),
                               out_dtype=jnp.bfloat16):
    """NHWC DecoderBlock forward (use this in an NHWC decoder stack)."""
    x = x_nhwc.astype(jnp.bfloat16)
    if skip_nhwc is not None:
        skip = skip_nhwc.astype(jnp.bfloat16)
        out_h, out_w = skip.shape[1], skip.shape[2]
        x_up = _nearest_resize_nhwc(x, out_h, out_w)
        parts = [x_up, skip]
    else:
        x_up = _nearest_resize_nhwc(x, 2 * x.shape[1], 2 * x.shape[2])
        parts = [x_up]
    # attention1 / attention2 are Identity for attention_type=None.
    return _fused_decoder_block(parts, params, pad, out_dtype=out_dtype)


def decoder_block_forward(params, x_nchw, skip_nchw=None, pad=(0, 0, 0, 0),
                          out_dtype=jnp.bfloat16):
    """DecoderBlock forward. Inputs/outputs NCHW (PyTorch convention)."""
    x = jnp.transpose(x_nchw, (0, 2, 3, 1))
    skip = None if skip_nchw is None else jnp.transpose(skip_nchw, (0, 2, 3, 1))
    out = decoder_block_forward_nhwc(params, x, skip, pad, out_dtype=out_dtype)
    return jnp.transpose(out, (0, 3, 1, 2))


# -----------------------------------------------------------------------------
# Deterministic parameter construction (BN folded into scale/shift, inference)
# -----------------------------------------------------------------------------
def make_params(key, in_channels, skip_channels, out_channels, eps=1e-5):
    c1_in = in_channels + skip_channels
    k = jax.random.split(key, 10)
    # conv weights kept directly in HWIO layout (PyTorch stores OIHW).
    w1 = jax.random.normal(k[0], (3, 3, c1_in, out_channels), jnp.float32) * 0.1
    w2 = jax.random.normal(k[1], (3, 3, out_channels, out_channels),
                           jnp.float32) * 0.1
    g1 = 1.0 + 0.1 * jax.random.normal(k[2], (out_channels,), jnp.float32)
    b1 = 0.1 * jax.random.normal(k[3], (out_channels,), jnp.float32)
    m1 = 0.1 * jax.random.normal(k[4], (out_channels,), jnp.float32)
    v1 = jnp.abs(jax.random.normal(k[5], (out_channels,), jnp.float32)) + 0.5
    g2 = 1.0 + 0.1 * jax.random.normal(k[6], (out_channels,), jnp.float32)
    b2 = 0.1 * jax.random.normal(k[7], (out_channels,), jnp.float32)
    m2 = 0.1 * jax.random.normal(k[8], (out_channels,), jnp.float32)
    v2 = jnp.abs(jax.random.normal(k[9], (out_channels,), jnp.float32)) + 0.5

    s1 = g1 / jnp.sqrt(v1 + eps)
    s2 = g2 / jnp.sqrt(v2 + eps)
    return {
        "w1": w1, "scale1": s1, "shift1": b1 - m1 * s1,
        "w2": w2, "scale2": s2, "shift2": b2 - m2 * s2,
    }


# -----------------------------------------------------------------------------
# Pure-JAX reference mirroring the kernel numerics (bf16 operands, f32 acc)
# -----------------------------------------------------------------------------
def _ref_conv3x3_bn_relu(x_nhwc, w_hwio, scale, shift):
    y = lax.conv_general_dilated(
        x_nhwc.astype(jnp.bfloat16), w_hwio.astype(jnp.bfloat16),
        window_strides=(1, 1), padding="SAME",
        dimension_numbers=("NHWC", "HWIO", "NHWC"),
        preferred_element_type=jnp.float32)
    return jnp.maximum(y * scale + shift, 0.0)


def _ref_forward(params, x_nchw, skip_nchw, pad):
    x = jnp.transpose(x_nchw, (0, 2, 3, 1)).astype(jnp.float32)
    skip = jnp.transpose(skip_nchw, (0, 2, 3, 1)).astype(jnp.float32)
    x = _nearest_resize_nhwc(x, skip.shape[1], skip.shape[2])
    x = jnp.concatenate([x, skip], axis=-1)
    left, right, top, bottom = pad
    x = jnp.pad(x, ((0, 0), (top, bottom), (left, right), (0, 0)))
    x = _ref_conv3x3_bn_relu(x, params["w1"], params["scale1"], params["shift1"])
    x = _ref_conv3x3_bn_relu(x, params["w2"], params["scale2"], params["shift2"])
    return jnp.transpose(x, (0, 3, 1, 2))


# -----------------------------------------------------------------------------
if __name__ == "__main__":
    key = jax.random.PRNGKey(0)
    k_x, k_skip, k_p, k_x2, k_s2, k_p2 = jax.random.split(key, 6)

    # --- Test 1: common case (zero ZeroPad2d, power-of-two shapes) -----------
    in_channels, skip_channels, out_channels = 4, 4, 8
    N, H_low, W_low, H_skip, W_skip = 2, 8, 8, 16, 16
    x = jax.random.normal(k_x, (N, in_channels, H_low, W_low), jnp.float32)
    skip = jax.random.normal(k_skip, (N, skip_channels, H_skip, W_skip),
                             jnp.float32)
    params = make_params(k_p, in_channels, skip_channels, out_channels)

    fwd = jax.jit(functools.partial(decoder_block_forward, pad=(0, 0, 0, 0)))
    out = jax.block_until_ready(fwd(params, x, skip))
    assert out.shape == (N, out_channels, H_skip, W_skip), out.shape

    ref = jax.block_until_ready(_ref_forward(params, x, skip, (0, 0, 0, 0)))
    err = float(jnp.max(jnp.abs(out.astype(jnp.float32) - ref)))
    assert jnp.allclose(out.astype(jnp.float32), ref, rtol=3e-2, atol=3e-2), err

    # --- Test 2: nonzero ZeroPad2d, odd width, partial last row tile ---------
    in2, sk2, oc2 = 3, 5, 6
    x2 = jax.random.normal(k_x2, (1, in2, 4, 4), jnp.float32)
    skip2 = jax.random.normal(k_s2, (1, sk2, 9, 8), jnp.float32)
    params2 = make_params(k_p2, in2, sk2, oc2)
    pad2 = (1, 0, 2, 2)

    fwd2 = jax.jit(functools.partial(decoder_block_forward, pad=pad2))
    out2 = jax.block_until_ready(fwd2(params2, x2, skip2))
    assert out2.shape == (1, oc2, 9 + 2 + 2, 8 + 1 + 0), out2.shape

    ref2 = jax.block_until_ready(_ref_forward(params2, x2, skip2, pad2))
    err2 = float(jnp.max(jnp.abs(out2.astype(jnp.float32) - ref2)))
    assert jnp.allclose(out2.astype(jnp.float32), ref2, rtol=3e-2, atol=3e-2), err2

    print("KERNEL_OK")
</pallas_src>

<mosaic_0001>
module attributes {stable_mosaic.version = 11 : i64} {
  func.func @_decoder_block_kernel(%arg0: i32, %arg1: i32, %arg2: memref<1x16x16x4xbf16, #tpu.memory_space<vmem>>, %arg3: memref<1x16x16x4xbf16, #tpu.memory_space<vmem>>, %arg4: memref<3x24x128xbf16, #tpu.memory_space<vmem>>, %arg5: memref<1x128xf32, #tpu.memory_space<vmem>>, %arg6: memref<1x128xf32, #tpu.memory_space<vmem>>, %arg7: memref<3x384x128xbf16, #tpu.memory_space<vmem>>, %arg8: memref<1x128xf32, #tpu.memory_space<vmem>>, %arg9: memref<1x128xf32, #tpu.memory_space<vmem>>, %arg10: memref<1x8x16x128xbf16, #tpu.memory_space<vmem>>, %arg11: memref<12x16x24xbf16, #tpu.memory_space<vmem>>, %arg12: memref<10x16x384xbf16, #tpu.memory_space<vmem>>) attributes {dimension_semantics = [#tpu.dimension_semantics<parallel>, #tpu.dimension_semantics<parallel>], iteration_bounds = array<i64: 2, 2>, scalar_prefetch = 0 : i64, scratch_operands = 2 : i64, tpu.core_type = #tpu.core_type<tc>, window_params = [{transform_indices = @transform_0, window_bounds = array<i64: 1, 16, 16, 4>}, {transform_indices = @transform_1, window_bounds = array<i64: 1, 16, 16, 4>}, {pipeline_mode = #tpu.pipeline_mode<synchronous>, transform_indices = @transform_2, window_bounds = array<i64: 3, 24, 128>}, {pipeline_mode = #tpu.pipeline_mode<synchronous>, transform_indices = @transform_3, window_bounds = array<i64: 1, 128>}, {pipeline_mode = #tpu.pipeline_mode<synchronous>, transform_indices = @transform_4, window_bounds = array<i64: 1, 128>}, {pipeline_mode = #tpu.pipeline_mode<synchronous>, transform_indices = @transform_5, window_bounds = array<i64: 3, 384, 128>}, {pipeline_mode = #tpu.pipeline_mode<synchronous>, transform_indices = @transform_6, window_bounds = array<i64: 1, 128>}, {pipeline_mode = #tpu.pipeline_mode<synchronous>, transform_indices = @transform_7, window_bounds = array<i64: 1, 128>}, {transform_indices = @transform_8, window_bounds = array<i64: 1, 8, 16, 128>}]} {
    %c8_i32 = arith.constant 8 : i32
    %0 = arith.muli %arg1, %c8_i32 : i32
    %cst = arith.constant 0.000000e+00 : bf16
    %1 = vector.broadcast %cst : bf16 to vector<12x1x8xbf16>
    %c0 = arith.constant 0 : index
    %c0_0 = arith.constant 0 : index
    %c0_1 = arith.constant 0 : index
    %2 = vector.load %arg11[%c0, %c0_0, %c0_1] : memref<12x16x24xbf16, #tpu.memory_space<vmem>>, vector<12x1x8xbf16>
    tpu.vector_store %arg11[%c0, %c0_0, %c0_1], %1 {strides = array<i32>} : memref<12x16x24xbf16, #tpu.memory_space<vmem>>, vector<12x1x8xbf16>,
    %cst_2 = arith.constant 0.000000e+00 : bf16
    %3 = vector.broadcast %cst_2 : bf16 to vector<12x1x8xbf16>
    %c0_3 = arith.constant 0 : index
    %c15 = arith.constant 15 : index
    %c16 = arith.constant 16 : index
    %4 = vector.load %arg11[%c0_3, %c15, %c16] : memref<12x16x24xbf16, #tpu.memory_space<vmem>>, vector<12x1x8xbf16>
    tpu.vector_store %arg11[%c0_3, %c15, %c16], %3 {strides = array<i32>} : memref<12x16x24xbf16, #tpu.memory_space<vmem>>, vector<12x1x8xbf16>,
    %c-2_i32 = arith.constant -2 : i32
    %5 = arith.addi %0, %c-2_i32 : i32
    %c0_i32 = arith.constant 0 : i32
    %6 = arith.cmpi sge, %5, %c0_i32 : i32
    %c16_i32 = arith.constant 16 : i32
    %7 = arith.cmpi slt, %5, %c16_i32 : i32
    %8 = arith.andi %6, %7 : i1
    %c0_i32_4 = arith.constant 0 : i32
    %c15_i32 = arith.constant 15 : i32
    %9 = arith.maxsi %c0_i32_4, %5 : i32
    %10 = arith.minsi %c15_i32, %9 : i32
    %11 = arith.extui %8 : i1 to i32
    %12 = arith.sitofp %11 : i32 to f32
    %13 = arith.truncf %12 : f32 to bf16
    %c0_5 = arith.constant 0 : index
    %14 = arith.index_cast %10 : i32 to index
    %c0_6 = arith.constant 0 : index
    %c0_7 = arith.constant 0 : index
    %15 = vector.load %arg2[%c0_5, %14, %c0_6, %c0_7] : memref<1x16x16x4xbf16, #tpu.memory_space<vmem>>, vector<1x1x16x4xbf16>
    %16 = vector.shape_cast %15 : vector<1x1x16x4xbf16> to vector<16x4xbf16>
    %17 = vector.broadcast %13 : bf16 to vector<16x4xbf16>
    %18 = arith.mulf %16, %17 : vector<16x4xbf16>
    %19 = vector.extract_strided_slice %18 {offsets = [0, 0], sizes = [15, 4], strides = [1, 1]} : vector<16x4xbf16> to vector<15x4xbf16>
    %c0_8 = arith.constant 0 : index
    %c1 = arith.constant 1 : index
    %c0_9 = arith.constant 0 : index
    %20 = vector.load %arg11[%c0_8, %c1, %c0_9] : memref<12x16x24xbf16, #tpu.memory_space<vmem>>, vector<1x15x4xbf16>
    %21 = vector.shape_cast %20 : vector<1x15x4xbf16> to vector<15x4xbf16>
    %22 = vector.shape_cast %19 : vector<15x4xbf16> to vector<1x15x4xbf16>
    tpu.vector_store %arg11[%c0_8, %c1, %c0_9], %22 {strides = array<i32>} : memref<12x16x24xbf16, #tpu.memory_space<vmem>>, vector<1x15x4xbf16>,
    %c0_10 = arith.constant 0 : index
    %c0_11 = arith.constant 0 : index
    %c8 = arith.constant 8 : index
    %23 = vector.load %arg11[%c0_10, %c0_11, %c8] : memref<12x16x24xbf16, #tpu.memory_space<vmem>>, vector<1x16x4xbf16>
    %24 = vector.shape_cast %23 : vector<1x16x4xbf16> to vector<16x4xbf16>
    %25 = vector.shape_cast %18 : vector<16x4xbf16> to vector<1x16x4xbf16>
    tpu.vector_store %arg11[%c0_10, %c0_11, %c8], %25 {strides = array<i32>} : memref<12x16x24xbf16, #tpu.memory_space<vmem>>, vector<1x16x4xbf16>,
    %26 = vector.extract_strided_slice %18 {offsets = [1, 0], sizes = [15, 4], strides = [1, 1]} : vector<16x4xbf16> to vector<15x4xbf16>
    %c0_12 = arith.constant 0 : index
    %c0_13 = arith.constant 0 : index
    %c16_14 = arith.constant 16 : index
    %27 = vector.load %arg11[%c0_12, %c0_13, %c16_14] : memref<12x16x24xbf16, #tpu.memory_space<vmem>>, vector<1x15x4xbf16>
    %28 = vector.shape_cast %27 : vector<1x15x4xbf16> to vector<15x4xbf16>
    %29 = vector.shape_cast %26 : vector<15x4xbf16> to vector<1x15x4xbf16>
    tpu.vector_store %arg11[%c0_12, %c0_13, %c16_14], %29 {strides = array<i32>} : memref<12x16x24xbf16, #tpu.memory_space<vmem>>, vector<1x15x4xbf16>,
    %c0_15 = arith.constant 0 : index
    %30 = arith.index_cast %10 : i32 to index
    %c0_16 = arith.constant 0 : index
    %c0_17 = arith.constant 0 : index
    %31 = vector.load %arg3[%c0_15, %30, %c0_16, %c0_17] : memref<1x16x16x4xbf16, #tpu.memory_space<vmem>>, vector<1x1x16x4xbf16>
    %32 = vector.shape_cast %31 : vector<1x1x16x4xbf16> to vector<16x4xbf16>
    %33 = vector.broadcast %13 : bf16 to vector<16x4xbf16>
    %34 = arith.mulf %32, %33 : vector<16x4xbf16>
    %35 = vector.extract_strided_slice %34 {offsets = [0, 0], sizes = [15, 4], strides = [1, 1]} : vector<16x4xbf16> to vector<15x4xbf16>
    %c0_18 = arith.constant 0 : index
    %c1_19 = arith.constant 1 : index
    %c4 = arith.constant 4 : index
    %36 = vector.load %arg11[%c0_18, %c1_19, %c4] : memref<12x16x24xbf16, #tpu.memory_space<vmem>>, vector<1x15x4xbf16>
    %37 = vector.shape_cast %36 : vector<1x15x4xbf16> to vector<15x4xbf16>
    %38 = vector.shape_cast %35 : vector<15x4xbf16> to vector<1x15x4xbf16>
    tpu.vector_store %arg11[%c0_18, %c1_19, %c4], %38 {strides = array<i32>} : memref<12x16x24xbf16, #tpu.memory_space<vmem>>, vector<1x15x4xbf16>,
    %c0_20 = arith.constant 0 : index
    %c0_21 = arith.constant 0 : index
    %c12 = arith.constant 12 : index
    %39 = vector.load %arg11[%c0_20, %c0_21, %c12] : memref<12x16x24xbf16, #tpu.memory_space<vmem>>, vector<1x16x4xbf16>
    %40 = vector.shape_cast %39 : vector<1x16x4xbf16> to vector<16x4xbf16>
    %41 = vector.shape_cast %34 : vector<16x4xbf16> to vector<1x16x4xbf16>
    tpu.vector_store %arg11[%c0_20, %c0_21, %c12], %41 {strides = array<i32>} : memref<12x16x24xbf16, #tpu.memory_space<vmem>>, vector<1x16x4xbf16>,
    %42 = vector.extract_strided_slice %34 {offsets = [1, 0], sizes = [15, 4], strides = [1, 1]} : vector<16x4xbf16> to vector<15x4xbf16>
    %c0_22 = arith.constant 0 : index
    %c0_23 = arith.constant 0 : index
    %c20 = arith.constant 20 : index
    %43 = vector.load %arg11[%c0_22, %c0_23, %c20] : memref<12x16x24xbf16, #tpu.memory_space<vmem>>, vector<1x15x4xbf16>
    %44 = vector.shape_cast %43 : vector<1x15x4xbf16> to vector<15x4xbf16>
    %45 = vector.shape_cast %42 : vector<15x4xbf16> to vector<1x15x4xbf16>
    tpu.vector_store %arg11[%c0_22, %c0_23, %c20], %45 {strides = array<i32>} : memref<12x16x24xbf16, #tpu.memory_space<vmem>>, vector<1x15x4xbf16>,
    %c-1_i32 = arith.constant -1 : i32
    %46 = arith.addi %0, %c-1_i32 : i32
    %c0_i32_24 = arith.constant 0 : i32
    %47 = arith.cmpi sge, %46, %c0_i32_24 : i32
    %c16_i32_25 = arith.constant 16 : i32
    %48 = arith.cmpi slt, %46, %c16_i32_25 : i32
    %49 = arith.andi %47, %48 : i1
    %c0_i32_26 = arith.constant 0 : i32
    %c15_i32_27 = arith.constant 15 : i32
    %50 = arith.maxsi %c0_i32_26, %46 : i32
    %51 = arith.minsi %c15_i32_27, %50 : i32
    %52 = arith.extui %49 : i1 to i32
    %53 = arith.sitofp %52 : i32 to f32
    %54 = arith.truncf %53 : f32 to bf16
    %c0_28 = arith.constant 0 : index
    %55 = arith.index_cast %51 : i32 to index
    %c0_29 = arith.constant 0 : index
    %c0_30 = arith.constant 0 : index
    %56 = vector.load %arg2[%c0_28, %55, %c0_29, %c0_30] : memref<1x16x16x4xbf16, #tpu.memory_space<vmem>>, vector<1x1x16x4xbf16>
    %57 = vector.shape_cast %56 : vector<1x1x16x4xbf16> to vector<16x4xbf16>
    %58 = vector.broadcast %54 : bf16 to vector<16x4xbf16>
    %59 = arith.mulf %57, %58 : vector<16x4xbf16>
    %60 = vector.extract_strided_slice %59 {offsets = [0, 0], sizes = [15, 4], strides = [1, 1]} : vector<16x4xbf16> to vector<15x4xbf16>
    %c1_31 = arith.constant 1 : index
    %c1_32 = arith.constant 1 : index
    %c0_33 = arith.constant 0 : index
    %61 = vector.load %arg11[%c1_31, %c1_32, %c0_33] : memref<12x16x24xbf16, #tpu.memory_space<vmem>>, vector<1x15x4xbf16>
    %62 = vector.shape_cast %61 : vector<1x15x4xbf16> to vector<15x4xbf16>
    %63 = vector.shape_cast %60 : vector<15x4xbf16> to vector<1x15x4xbf16>
    tpu.vector_store %arg11[%c1_31, %c1_32, %c0_33], %63 {strides = array<i32>} : memref<12x16x24xbf16, #tpu.memory_space<vmem>>, vector<1x15x4xbf16>,
    %c1_34 = arith.constant 1 : index
    %c0_35 = arith.constant 0 : index
    %c8_36 = arith.constant 8 : index
    %64 = vector.load %arg11[%c1_34, %c0_35, %c8_36] : memref<12x16x24xbf16, #tpu.memory_space<vmem>>, vector<1x16x4xbf16>
    %65 = vector.shape_cast %64 : vector<1x16x4xbf16> to vector<16x4xbf16>
    %66 = vector.shape_cast %59 : vector<16x4xbf16> to vector<1x16x4xbf16>
    tpu.vector_store %arg11[%c1_34, %c0_35, %c8_36], %66 {strides = array<i32>} : memref<12x16x24xbf16, #tpu.memory_space<vmem>>, vector<1x16x4xbf16>,
    %67 = vector.extract_strided_slice %59 {offsets = [1, 0], sizes = [15, 4], strides = [1, 1]} : vector<16x4xbf16> to vector<15x4xbf16>
    %c1_37 = arith.constant 1 : index
    %c0_38 = arith.constant 0 : index
    %c16_39 = arith.constant 16 : index
    %68 = vector.load %arg11[%c1_37, %c0_38, %c16_39] : memref<12x16x24xbf16, #tpu.memory_space<vmem>>, vector<1x15x4xbf16>
    %69 = vector.shape_cast %68 : vector<1x15x4xbf16> to vector<15x4xbf16>
    %70 = vector.shape_cast %67 : vector<15x4xbf16> to vector<1x15x4xbf16>
    tpu.vector_store %arg11[%c1_37, %c0_38, %c16_39], %70 {strides = array<i32>} : memref<12x16x24xbf16, #tpu.memory_space<vmem>>, vector<1x15x4xbf16>,
    %c0_40 = arith.constant 0 : index
    %71 = arith.index_cast %51 : i32 to index
    %c0_41 = arith.constant 0 : index
    %c0_42 = arith.constant 0 : index
    %72 = vector.load %arg3[%c0_40, %71, %c0_41, %c0_42] : memref<1x16x16x4xbf16, #tpu.memory_space<vmem>>, vector<1x1x16x4xbf16>
    %73 = vector.shape_cast %72 : vector<1x1x16x4xbf16> to vector<16x4xbf16>
    %74 = vector.broadcast %54 : bf16 to vector<16x4xbf16>
    %75 = arith.mulf %73, %74 : vector<16x4xbf16>
    %76 = vector.extract_strided_slice %75 {offsets = [0, 0], sizes = [15, 4], strides = [1, 1]} : vector<16x4xbf16> to vector<15x4xbf16>
    %c1_43 = arith.constant 1 : index
    %c1_44 = arith.constant 1 : index
    %c4_45 = arith.constant 4 : index
    %77 = vector.load %arg11[%c1_43, %c1_44, %c4_45] : memref<12x16x24xbf16, #tpu.memory_space<vmem>>, vector<1x15x4xbf16>
    %78 = vector.shape_cast %77 : vector<1x15x4xbf16> to vector<15x4xbf16>
    %79 = vector.shape_cast %76 : vector<15x4xbf16> to vector<1x15x4xbf16>
    tpu.vector_store %arg11[%c1_43, %c1_44, %c4_45], %79 {strides = array<i32>} : memref<12x16x24xbf16, #tpu.memory_space<vmem>>, vector<1x15x4xbf16>,
    %c1_46 = arith.constant 1 : index
    %c0_47 = arith.constant 0 : index
    %c12_48 = arith.constant 12 : index
    %80 = vector.load %arg11[%c1_46, %c0_47, %c12_48] : memref<12x16x24xbf16, #tpu.memory_space<vmem>>, vector<1x16x4xbf16>
    %81 = vector.shape_cast %80 : vector<1x16x4xbf16> to vector<16x4xbf16>
    %82 = vector.shape_cast %75 : vector<16x4xbf16> to vector<1x16x4xbf16>
    tpu.vector_store %arg11[%c1_46, %c0_47, %c12_48], %82 {strides = array<i32>} : memref<12x16x24xbf16, #tpu.memory_space<vmem>>, vector<1x16x4xbf16>,
    %83 = vector.extract_strided_slice %75 {offsets = [1, 0], sizes = [15, 4], strides = [1, 1]} : vector<16x4xbf16> to vector<15x4xbf16>
    %c1_49 = arith.constant 1 : index
    %c0_50 = arith.constant 0 : index
    %c20_51 = arith.constant 20 : index
    %84 = vector.load %arg11[%c1_49, %c0_50, %c20_51] : memref<12x16x24xbf16, #tpu.memory_space<vmem>>, vector<1x15x4xbf16>
    %85 = vector.shape_cast %84 : vector<1x15x4xbf16> to vector<15x4xbf16>
    %86 = vector.shape_cast %83 : vector<15x4xbf16> to vector<1x15x4xbf16>
    tpu.vector_store %arg11[%c1_49, %c0_50, %c20_51], %86 {strides = array<i32>} : memref<12x16x24xbf16, #tpu.memory_space<vmem>>, vector<1x15x4xbf16>,
    %c0_i32_52 = arith.constant 0 : i32
    %87 = arith.addi %0, %c0_i32_52 : i32
    %c0_i32_53 = arith.constant 0 : i32
    %88 = arith.cmpi sge, %87, %c0_i32_53 : i32
    %c16_i32_54 = arith.constant 16 : i32
    %89 = arith.cmpi slt, %87, %c16_i32_54 : i32
    %90 = arith.andi %88, %89 : i1
    %c0_i32_55 = arith.constant 0 : i32
    %c15_i32_56 = arith.constant 15 : i32
    %91 = arith.maxsi %c0_i32_55, %87 : i32
    %92 = arith.minsi %c15_i32_56, %91 : i32
    %93 = arith.extui %90 : i1 to i32
    %94 = arith.sitofp %93 : i32 to f32
    %95 = arith.truncf %94 : f32 to bf16
    %c0_57 = arith.constant 0 : index
    %96 = arith.index_cast %92 : i32 to index
    %c0_58 = arith.constant 0 : index
    %c0_59 = arith.constant 0 : index
    %97 = vector.load %arg2[%c0_57, %96, %c0_58, %c0_59] : memref<1x16x16x4xbf16, #tpu.memory_space<vmem>>, vector<1x1x16x4xbf16>
    %98 = vector.shape_cast %97 : vector<1x1x16x4xbf16> to vector<16x4xbf16>
    %99 = vector.broadcast %95 : bf16 to vector<16x4xbf16>
    %100 = arith.mulf %98, %99 : vector<16x4xbf16>
    %101 = vector.extract_strided_slice %100 {offsets = [0, 0], sizes = [15, 4], strides = [1, 1]} : vector<16x4xbf16> to vector<15x4xbf16>
    %c2 = arith.constant 2 : index
    %c1_60 = arith.constant 1 : index
    %c0_61 = arith.constant 0 : index
    %102 = vector.load %arg11[%c2, %c1_60, %c0_61] : memref<12x16x24xbf16, #tpu.memory_space<vmem>>, vector<1x15x4xbf16>
    %103 = vector.shape_cast %102 : vector<1x15x4xbf16> to vector<15x4xbf16>
    %104 = vector.shape_cast %101 : vector<15x4xbf16> to vector<1x15x4xbf16>
    tpu.vector_store %arg11[%c2, %c1_60, %c0_61], %104 {strides = array<i32>} : memref<12x16x24xbf16, #tpu.memory_space<vmem>>, vector<1x15x4xbf16>,
    %c2_62 = arith.constant 2 : index
    %c0_63 = arith.constant 0 : index
    %c8_64 = arith.constant 8 : index
    %105 = vector.load %arg11[%c2_62, %c0_63, %c8_64] : memref<12x16x24xbf16, #tpu.memory_space<vmem>>, vector<1x16x4xbf16>
    %106 = vector.shape_cast %105 : vector<1x16x4xbf16> to vector<16x4xbf16>
    %107 = vector.shape_cast %100 : vector<16x4xbf16> to vector<1x16x4xbf16>
    tpu.vector_store %arg11[%c2_62, %c0_63, %c8_64], %107 {strides = array<i32>} : memref<12x16x24xbf16, #tpu.memory_space<vmem>>, vector<1x16x4xbf16>,
    %108 = vector.extract_strided_slice %100 {offsets = [1, 0], sizes = [15, 4], strides = [1, 1]} : vector<16x4xbf16> to vector<15x4xbf16>
    %c2_65 = arith.constant 2 : index
    %c0_66 = arith.constant 0 : index
    %c16_67 = arith.constant 16 : index
    %109 = vector.load %arg11[%c2_65, %c0_66, %c16_67] : memref<12x16x24xbf16, #tpu.memory_space<vmem>>, vector<1x15x4xbf16>
    %110 = vector.shape_cast %109 : vector<1x15x4xbf16> to vector<15x4xbf16>
    %111 = vector.shape_cast %108 : vector<15x4xbf16> to vector<1x15x4xbf16>
    tpu.vector_store %arg11[%c2_65, %c0_66, %c16_67], %111 {strides = array<i32>} : memref<12x16x24xbf16, #tpu.memory_space<vmem>>, vector<1x15x4xbf16>,
    %c0_68 = arith.constant 0 : index
    %112 = arith.index_cast %92 : i32 to index
    %c0_69 = arith.constant 0 : index
    %c0_70 = arith.constant 0 : index
    %113 = vector.load %arg3[%c0_68, %112, %c0_69, %c0_70] : memref<1x16x16x4xbf16, #tpu.memory_space<vmem>>, vector<1x1x16x4xbf16>
    %114 = vector.shape_cast %113 : vector<1x1x16x4xbf16> to vector<16x4xbf16>
    %115 = vector.broadcast %95 : bf16 to vector<16x4xbf16>
    %116 = arith.mulf %114, %115 : vector<16x4xbf16>
    %117 = vector.extract_strided_slice %116 {offsets = [0, 0], sizes = [15, 4], strides = [1, 1]} : vector<16x4xbf16> to vector<15x4xbf16>
    %c2_71 = arith.constant 2 : index
    %c1_72 = arith.constant 1 : index
    %c4_73 = arith.constant 4 : index
    %118 = vector.load %arg11[%c2_71, %c1_72, %c4_73] : memref<12x16x24xbf16, #tpu.memory_space<vmem>>, vector<1x15x4xbf16>
    %119 = vector.shape_cast %118 : vector<1x15x4xbf16> to vector<15x4xbf16>
    %120 = vector.shape_cast %117 : vector<15x4xbf16> to vector<1x15x4xbf16>
    tpu.vector_store %arg11[%c2_71, %c1_72, %c4_73], %120 {strides = array<i32>} : memref<12x16x24xbf16, #tpu.memory_space<vmem>>, vector<1x15x4xbf16>,
    %c2_74 = arith.constant 2 : index
    %c0_75 = arith.constant 0 : index
    %c12_76 = arith.constant 12 : index
    %121 = vector.load %arg11[%c2_74, %c0_75, %c12_76] : memref<12x16x24xbf16, #tpu.memory_space<vmem>>, vector<1x16x4xbf16>
    %122 = vector.shape_cast %121 : vector<1x16x4xbf16> to vector<16x4xbf16>
    %123 = vector.shape_cast %116 : vector<16x4xbf16> to vector<1x16x4xbf16>
    tpu.vector_store %arg11[%c2_74, %c0_75, %c12_76], %123 {strides = array<i32>} : memref<12x16x24xbf16, #tpu.memory_space<vmem>>, vector<1x16x4xbf16>,
    %124 = vector.extract_strided_slice %116 {offsets = [1, 0], sizes = [15, 4], strides = [1, 1]} : vector<16x4xbf16> to vector<15x4xbf16>
    %c2_77 = arith.constant 2 : index
    %c0_78 = arith.constant 0 : index
    %c20_79 = arith.constant 20 : index
    %125 = vector.load %arg11[%c2_77, %c0_78, %c20_79] : memref<12x16x24xbf16, #tpu.memory_space<vmem>>, vector<1x15x4xbf16>
    %126 = vector.shape_cast %125 : vector<1x15x4xbf16> to vector<15x4xbf16>
    %127 = vector.shape_cast %124 : vector<15x4xbf16> to vector<1x15x4xbf16>
    tpu.vector_store %arg11[%c2_77, %c0_78, %c20_79], %127 {strides = array<i32>} : memref<12x16x24xbf16, #tpu.memory_space<vmem>>, vector<1x15x4xbf16>,
    %c1_i32 = arith.constant 1 : i32
    %128 = arith.addi %0, %c1_i32 : i32
    %c0_i32_80 = arith.constant 0 : i32
    %129 = arith.cmpi sge, %128, %c0_i32_80 : i32
    %c16_i32_81 = arith.constant 16 : i32
    %130 = arith.cmpi slt, %128, %c16_i32_81 : i32
    %131 = arith.andi %129, %130 : i1
    %c0_i32_82 = arith.constant 0 : i32
    %c15_i32_83 = arith.constant 15 : i32
    %132 = arith.maxsi %c0_i32_82, %128 : i32
    %133 = arith.minsi %c15_i32_83, %132 : i32
    %134 = arith.extui %131 : i1 to i32
    %135 = arith.sitofp %134 : i32 to f32
    %136 = arith.truncf %135 : f32 to bf16
    %c0_84 = arith.constant 0 : index
    %137 = arith.index_cast %133 : i32 to index
    %c0_85 = arith.constant 0 : index
    %c0_86 = arith.constant 0 : index
    %138 = vector.load %arg2[%c0_84, %137, %c0_85, %c0_86] : memref<1x16x16x4xbf16, #tpu.memory_space<vmem>>, vector<1x1x16x4xbf16>
    %139 = vector.shape_cast %138 : vector<1x1x16x4xbf16> to vector<16x4xbf16>
    %140 = vector.broadcast %136 : bf16 to vector<16x4xbf16>
    %141 = arith.mulf %139, %140 : vector<16x4xbf16>
    %142 = vector.extract_strided_slice %141 {offsets = [0, 0], sizes = [15, 4], strides = [1, 1]} : vector<16x4xbf16> to vector<15x4xbf16>
    %c3 = arith.constant 3 : index
    %c1_87 = arith.constant 1 : index
    %c0_88 = arith.constant 0 : index
    %143 = vector.load %arg11[%c3, %c1_87, %c0_88] : memref<12x16x24xbf16, #tpu.memory_space<vmem>>, vector<1x15x4xbf16>
    %144 = vector.shape_cast %143 : vector<1x15x4xbf16> to vector<15x4xbf16>
    %145 = vector.shape_cast %142 : vector<15x4xbf16> to vector<1x15x4xbf16>
    tpu.vector_store %arg11[%c3, %c1_87, %c0_88], %145 {strides = array<i32>} : memref<12x16x24xbf16, #tpu.memory_space<vmem>>, vector<1x15x4xbf16>,
    %c3_89 = arith.constant 3 : index
    %c0_90 = arith.constant 0 : index
    %c8_91 = arith.constant 8 : index
    %146 = vector.load %arg11[%c3_89, %c0_90, %c8_91] : memref<12x16x24xbf16, #tpu.memory_space<vmem>>, vector<1x16x4xbf16>
    %147 = vector.shape_cast %146 : vector<1x16x4xbf16> to vector<16x4xbf16>
    %148 = vector.shape_cast %141 : vector<16x4xbf16> to vector<1x16x4xbf16>
    tpu.vector_store %arg11[%c3_89, %c0_90, %c8_91], %148 {strides = array<i32>} : memref<12x16x24xbf16, #tpu.memory_space<vmem>>, vector<1x16x4xbf16>,
    %149 = vector.extract_strided_slice %141 {offsets = [1, 0], sizes = [15, 4], strides = [1, 1]} : vector<16x4xbf16> to vector<15x4xbf16>
    %c3_92 = arith.constant 3 : index
    %c0_93 = arith.constant 0 : index
    %c16_94 = arith.constant 16 : index
    %150 = vector.load %arg11[%c3_92, %c0_93, %c16_94] : memref<12x16x24xbf16, #tpu.memory_space<vmem>>, vector<1x15x4xbf16>
    %151 = vector.shape_cast %150 : vector<1x15x4xbf16> to vector<15x4xbf16>
    %152 = vector.shape_cast %149 : vector<15x4xbf16> to vector<1x15x4xbf16>
    tpu.vector_store %arg11[%c3_92, %c0_93, %c16_94], %152 {strides = array<i32>} : memref<12x16x24xbf16, #tpu.memory_space<vmem>>, vector<1x15x4xbf16>,
    %c0_95 = arith.constant 0 : index
    %153 = arith.index_cast %133 : i32 to index
    %c0_96 = arith.constant 0 : index
    %c0_97 = arith.constant 0 : index
    %154 = vector.load %arg3[%c0_95, %153, %c0_96, %c0_97] : memref<1x16x16x4xbf16, #tpu.memory_space<vmem>>, vector<1x1x16x4xbf16>
    %155 = vector.shape_cast %154 : vector<1x1x16x4xbf16> to vector<16x4xbf16>
    %156 = vector.broadcast %136 : bf16 to vector<16x4xbf16>
    %157 = arith.mulf %155, %156 : vector<16x4xbf16>
    %158 = vector.extract_strided_slice %157 {offsets = [0, 0], sizes = [15, 4], strides = [1, 1]} : vector<16x4xbf16> to vector<15x4xbf16>
    %c3_98 = arith.constant 3 : index
    %c1_99 = arith.constant 1 : index
    %c4_100 = arith.constant 4 : index
    %159 = vector.load %arg11[%c3_98, %c1_99, %c4_100] : memref<12x16x24xbf16, #tpu.memory_space<vmem>>, vector<1x15x4xbf16>
    %160 = vector.shape_cast %159 : vector<1x15x4xbf16> to vector<15x4xbf16>
    %161 = vector.shape_cast %158 : vector<15x4xbf16> to vector<1x15x4xbf16>
    tpu.vector_store %arg11[%c3_98, %c1_99, %c4_100], %161 {strides = array<i32>} : memref<12x16x24xbf16, #tpu.memory_space<vmem>>, vector<1x15x4xbf16>,
    %c3_101 = arith.constant 3 : index
    %c0_102 = arith.constant 0 : index
    %c12_103 = arith.constant 12 : index
    %162 = vector.load %arg11[%c3_101, %c0_102, %c12_103] : memref<12x16x24xbf16, #tpu.memory_space<vmem>>, vector<1x16x4xbf16>
    %163 = vector.shape_cast %162 : vector<1x16x4xbf16> to vector<16x4xbf16>
    %164 = vector.shape_cast %157 : vector<16x4xbf16> to vector<1x16x4xbf16>
    tpu.vector_store %arg11[%c3_101, %c0_102, %c12_103], %164 {strides = array<i32>} : memref<12x16x24xbf16, #tpu.memory_space<vmem>>, vector<1x16x4xbf16>,
    %165 = vector.extract_strided_slice %157 {offsets = [1, 0], sizes = [15, 4], strides = [1, 1]} : vector<16x4xbf16> to vector<15x4xbf16>
    %c3_104 = arith.constant 3 : index
    %c0_105 = arith.constant 0 : index
    %c20_106 = arith.constant 20 : index
    %166 = vector.load %arg11[%c3_104, %c0_105, %c20_106] : memref<12x16x24xbf16, #tpu.memory_space<vmem>>, vector<1x15x4xbf16>
    %167 = vector.shape_cast %166 : vector<1x15x4xbf16> to vector<15x4xbf16>
    %168 = vector.shape_cast %165 : vector<15x4xbf16> to vector<1x15x4xbf16>
    tpu.vector_store %arg11[%c3_104, %c0_105, %c20_106], %168 {strides = array<i32>} : memref<12x16x24xbf16, #tpu.memory_space<vmem>>, vector<1x15x4xbf16>,
    %c2_i32 = arith.constant 2 : i32
    %169 = arith.addi %0, %c2_i32 : i32
    %c0_i32_107 = arith.constant 0 : i32
    %170 = arith.cmpi sge, %169, %c0_i32_107 : i32
    %c16_i32_108 = arith.constant 16 : i32
    %171 = arith.cmpi slt, %169, %c16_i32_108 : i32
    %172 = arith.andi %170, %171 : i1
    %c0_i32_109 = arith.constant 0 : i32
    %c15_i32_110 = arith.constant 15 : i32
    %173 = arith.maxsi %c0_i32_109, %169 : i32
    %174 = arith.minsi %c15_i32_110, %173 : i32
    %175 = arith.extui %172 : i1 to i32
    %176 = arith.sitofp %175 : i32 to f32
    %177 = arith.truncf %176 : f32 to bf16
    %c0_111 = arith.constant 0 : index
    %178 = arith.index_cast %174 : i32 to index
    %c0_112 = arith.constant 0 : index
    %c0_113 = arith.constant 0 : index
    %179 = vector.load %arg2[%c0_111, %178, %c0_112, %c0_113] : memref<1x16x16x4xbf16, #tpu.memory_space<vmem>>, vector<1x1x16x4xbf16>
    %180 = vector.shape_cast %179 : vector<1x1x16x4xbf16> to vector<16x4xbf16>
    %181 = vector.broadcast %177 : bf16 to vector<16x4xbf16>
    %182 = arith.mulf %180, %181 : vector<16x4xbf16>
    %183 = vector.extract_strided_slice %182 {offsets = [0, 0], sizes = [15, 4], strides = [1, 1]} : vector<16x4xbf16> to vector<15x4xbf16>
    %c4_114 = arith.constant 4 : index
    %c1_115 = arith.constant 1 : index
    %c0_116 = arith.constant 0 : index
    %184 = vector.load %arg11[%c4_114, %c1_115, %c0_116] : memref<12x16x24xbf16, #tpu.memory_space<vmem>>, vector<1x15x4xbf16>
    %185 = vector.shape_cast %184 : vector<1x15x4xbf16> to vector<15x4xbf16>
    %186 = vector.shape_cast %183 : vector<15x4xbf16> to vector<1x15x4xbf16>
    tpu.vector_store %arg11[%c4_114, %c1_115, %c0_116], %186 {strides = array<i32>} : memref<12x16x24xbf16, #tpu.memory_space<vmem>>, vector<1x15x4xbf16>,
    %c4_117 = arith.constant 4 : index
    %c0_118 = arith.constant 0 : index
    %c8_119 = arith.constant 8 : index
    %187 = vector.load %arg11[%c4_117, %c0_118, %c8_119] : memref<12x16x24xbf16, #tpu.memory_space<vmem>>, vector<1x16x4xbf16>
    %188 = vector.shape_cast %187 : vector<1x16x4xbf16> to vector<16x4xbf16>
    %189 = vector.shape_cast %182 : vector<16x4xbf16> to vector<1x16x4xbf16>
    tpu.vector_store %arg11[%c4_117, %c0_118, %c8_119], %189 {strides = array<i32>} : memref<12x16x24xbf16, #tpu.memory_space<vmem>>, vector<1x16x4xbf16>,
    %190 = vector.extract_strided_slice %182 {offsets = [1, 0], sizes = [15, 4], strides = [1, 1]} : vector<16x4xbf16> to vector<15x4xbf16>
    %c4_120 = arith.constant 4 : index
    %c0_121 = arith.constant 0 : index
    %c16_122 = arith.constant 16 : index
    %191 = vector.load %arg11[%c4_120, %c0_121, %c16_122] : memref<12x16x24xbf16, #tpu.memory_space<vmem>>, vector<1x15x4xbf16>
    %192 = vector.shape_cast %191 : vector<1x15x4xbf16> to vector<15x4xbf16>
    %193 = vector.shape_cast %190 : vector<15x4xbf16> to vector<1x15x4xbf16>
    tpu.vector_store %arg11[%c4_120, %c0_121, %c16_122], %193 {strides = array<i32>} : memref<12x16x24xbf16, #tpu.memory_space<vmem>>, vector<1x15x4xbf16>,
    %c0_123 = arith.constant 0 : index
    %194 = arith.index_cast %174 : i32 to index
    %c0_124 = arith.constant 0 : index
    %c0_125 = arith.constant 0 : index
    %195 = vector.load %arg3[%c0_123, %194, %c0_124, %c0_125] : memref<1x16x16x4xbf16, #tpu.memory_space<vmem>>, vector<1x1x16x4xbf16>
    %196 = vector.shape_cast %195 : vector<1x1x16x4xbf16> to vector<16x4xbf16>
    %197 = vector.broadcast %177 : bf16 to vector<16x4xbf16>
    %198 = arith.mulf %196, %197 : vector<16x4xbf16>
    %199 = vector.extract_strided_slice %198 {offsets = [0, 0], sizes = [15, 4], strides = [1, 1]} : vector<16x4xbf16> to vector<15x4xbf16>
    %c4_126 = arith.constant 4 : index
    %c1_127 = arith.constant 1 : index
    %c4_128 = arith.constant 4 : index
    %200 = vector.load %arg11[%c4_126, %c1_127, %c4_128] : memref<12x16x24xbf16, #tpu.memory_space<vmem>>, vector<1x15x4xbf16>
    %201 = vector.shape_cast %200 : vector<1x15x4xbf16> to vector<15x4xbf16>
    %202 = vector.shape_cast %199 : vector<15x4xbf16> to vector<1x15x4xbf16>
    tpu.vector_store %arg11[%c4_126, %c1_127, %c4_128], %202 {strides = array<i32>} : memref<12x16x24xbf16, #tpu.memory_space<vmem>>, vector<1x15x4xbf16>,
    %c4_129 = arith.constant 4 : index
    %c0_130 = arith.constant 0 : index
    %c12_131 = arith.constant 12 : index
    %203 = vector.load %arg11[%c4_129, %c0_130, %c12_131] : memref<12x16x24xbf16, #tpu.memory_space<vmem>>, vector<1x16x4xbf16>
    %204 = vector.shape_cast %203 : vector<1x16x4xbf16> to vector<16x4xbf16>
    %205 = vector.shape_cast %198 : vector<16x4xbf16> to vector<1x16x4xbf16>
    tpu.vector_store %arg11[%c4_129, %c0_130, %c12_131], %205 {strides = array<i32>} : memref<12x16x24xbf16, #tpu.memory_space<vmem>>, vector<1x16x4xbf16>,
    %206 = vector.extract_strided_slice %198 {offsets = [1, 0], sizes = [15, 4], strides = [1, 1]} : vector<16x4xbf16> to vector<15x4xbf16>
    %c4_132 = arith.constant 4 : index
    %c0_133 = arith.constant 0 : index
    %c20_134 = arith.constant 20 : index
    %207 = vector.load %arg11[%c4_132, %c0_133, %c20_134] : memref<12x16x24xbf16, #tpu.memory_space<vmem>>, vector<1x15x4xbf16>
    %208 = vector.shape_cast %207 : vector<1x15x4xbf16> to vector<15x4xbf16>
    %209 = vector.shape_cast %206 : vector<15x4xbf16> to vector<1x15x4xbf16>
    tpu.vector_store %arg11[%c4_132, %c0_133, %c20_134], %209 {strides = array<i32>} : memref<12x16x24xbf16, #tpu.memory_space<vmem>>, vector<1x15x4xbf16>,
    %c3_i32 = arith.constant 3 : i32
    %210 = arith.addi %0, %c3_i32 : i32
    %c0_i32_135 = arith.constant 0 : i32
    %211 = arith.cmpi sge, %210, %c0_i32_135 : i32
    %c16_i32_136 = arith.constant 16 : i32
    %212 = arith.cmpi slt, %210, %c16_i32_136 : i32
    %213 = arith.andi %211, %212 : i1
    %c0_i32_137 = arith.constant 0 : i32
    %c15_i32_138 = arith.constant 15 : i32
    %214 = arith.maxsi %c0_i32_137, %210 : i32
    %215 = arith.minsi %c15_i32_138, %214 : i32
    %216 = arith.extui %213 : i1 to i32
    %217 = arith.sitofp %216 : i32 to f32
    %218 = arith.truncf %217 : f32 to bf16
    %c0_139 = arith.constant 0 : index
    %219 = arith.index_cast %215 : i32 to index
    %c0_140 = arith.constant 0 : index
    %c0_141 = arith.constant 0 : index
    %220 = vector.load %arg2[%c0_139, %219, %c0_140, %c0_141] : memref<1x16x16x4xbf16, #tpu.memory_space<vmem>>, vector<1x1x16x4xbf16>
    %221 = vector.shape_cast %220 : vector<1x1x16x4xbf16> to vector<16x4xbf16>
    %222 = vector.broadcast %218 : bf16 to vector<16x4xbf16>
    %223 = arith.mulf %221, %222 : vector<16x4xbf16>
    %224 = vector.extract_strided_slice %223 {offsets = [0, 0], sizes = [15, 4], strides = [1, 1]} : vector<16x4xbf16> to vector<15x4xbf16>
    %c5 = arith.constant 5 : index
    %c1_142 = arith.constant 1 : index
    %c0_143 = arith.constant 0 : index
    %225 = vector.load %arg11[%c5, %c1_142, %c0_143] : memref<12x16x24xbf16, #tpu.memory_space<vmem>>, vector<1x15x4xbf16>
    %226 = vector.shape_cast %225 : vector<1x15x4xbf16> to vector<15x4xbf16>
    %227 = vector.shape_cast %224 : vector<15x4xbf16> to vector<1x15x4xbf16>
    tpu.vector_store %arg11[%c5, %c1_142, %c0_143], %227 {strides = array<i32>} : memref<12x16x24xbf16, #tpu.memory_space<vmem>>, vector<1x15x4xbf16>,
    %c5_144 = arith.constant 5 : index
    %c0_145 = arith.constant 0 : index
    %c8_146 = arith.constant 8 : index
    %228 = vector.load %arg11[%c5_144, %c0_145, %c8_146] : memref<12x16x24xbf16, #tpu.memory_space<vmem>>, vector<1x16x4xbf16>
    %229 = vector.shape_cast %228 : vector<1x16x4xbf16> to vector<16x4xbf16>
    %230 = vector.shape_cast %223 : vector<16x4xbf16> to vector<1x16x4xbf16>
    tpu.vector_store %arg11[%c5_144, %c0_145, %c8_146], %230 {strides = array<i32>} : memref<12x16x24xbf16, #tpu.memory_space<vmem>>, vector<1x16x4xbf16>,
    %231 = vector.extract_strided_slice %223 {offsets = [1, 0], sizes = [15, 4], strides = [1, 1]} : vector<16x4xbf16> to vector<15x4xbf16>
    %c5_147 = arith.constant 5 : index
    %c0_148 = arith.constant 0 : index
    %c16_149 = arith.constant 16 : index
    %232 = vector.load %arg11[%c5_147, %c0_148, %c16_149] : memref<12x16x24xbf16, #tpu.memory_space<vmem>>, vector<1x15x4xbf16>
    %233 = vector.shape_cast %232 : vector<1x15x4xbf16> to vector<15x4xbf16>
    %234 = vector.shape_cast %231 : vector<15x4xbf16> to vector<1x15x4xbf16>
    tpu.vector_store %arg11[%c5_147, %c0_148, %c16_149], %234 {strides = array<i32>} : memref<12x16x24xbf16, #tpu.memory_space<vmem>>, vector<1x15x4xbf16>,
    %c0_150 = arith.constant 0 : index
    %235 = arith.index_cast %215 : i32 to index
    %c0_151 = arith.constant 0 : index
    %c0_152 = arith.constant 0 : index
    %236 = vector.load %arg3[%c0_150, %235, %c0_151, %c0_152] : memref<1x16x16x4xbf16, #tpu.memory_space<vmem>>, vector<1x1x16x4xbf16>
    %237 = vector.shape_cast %236 : vector<1x1x16x4xbf16> to vector<16x4xbf16>
    %238 = vector.broadcast %218 : bf16 to vector<16x4xbf16>
    %239 = arith.mulf %237, %238 : vector<16x4xbf16>
    %240 = vector.extract_strided_slice %239 {offsets = [0, 0], sizes = [15, 4], strides = [1, 1]} : vector<16x4xbf16> to vector<15x4xbf16>
    %c5_153 = arith.constant 5 : index
    %c1_154 = arith.constant 1 : index
    %c4_155 = arith.constant 4 : index
    %241 = vector.load %arg11[%c5_153, %c1_154, %c4_155] : memref<12x16x24xbf16, #tpu.memory_space<vmem>>, vector<1x15x4xbf16>
    %242 = vector.shape_cast %241 : vector<1x15x4xbf16> to vector<15x4xbf16>
    %243 = vector.shape_cast %240 : vector<15x4xbf16> to vector<1x15x4xbf16>
    tpu.vector_store %arg11[%c5_153, %c1_154, %c4_155], %243 {strides = array<i32>} : memref<12x16x24xbf16, #tpu.memory_space<vmem>>, vector<1x15x4xbf16>,
    %c5_156 = arith.constant 5 : index
    %c0_157 = arith.constant 0 : index
    %c12_158 = arith.constant 12 : index
    %244 = vector.load %arg11[%c5_156, %c0_157, %c12_158] : memref<12x16x24xbf16, #tpu.memory_space<vmem>>, vector<1x16x4xbf16>
    %245 = vector.shape_cast %244 : vector<1x16x4xbf16> to vector<16x4xbf16>
    %246 = vector.shape_cast %239 : vector<16x4xbf16> to vector<1x16x4xbf16>
    tpu.vector_store %arg11[%c5_156, %c0_157, %c12_158], %246 {strides = array<i32>} : memref<12x16x24xbf16, #tpu.memory_space<vmem>>, vector<1x16x4xbf16>,
    %247 = vector.extract_strided_slice %239 {offsets = [1, 0], sizes = [15, 4], strides = [1, 1]} : vector<16x4xbf16> to vector<15x4xbf16>
    %c5_159 = arith.constant 5 : index
    %c0_160 = arith.constant 0 : index
    %c20_161 = arith.constant 20 : index
    %248 = vector.load %arg11[%c5_159, %c0_160, %c20_161] : memref<12x16x24xbf16, #tpu.memory_space<vmem>>, vector<1x15x4xbf16>
    %249 = vector.shape_cast %248 : vector<1x15x4xbf16> to vector<15x4xbf16>
    %250 = vector.shape_cast %247 : vector<15x4xbf16> to vector<1x15x4xbf16>
    tpu.vector_store %arg11[%c5_159, %c0_160, %c20_161], %250 {strides = array<i32>} : memref<12x16x24xbf16, #tpu.memory_space<vmem>>, vector<1x15x4xbf16>,
    %c4_i32 = arith.constant 4 : i32
    %251 = arith.addi %0, %c4_i32 : i32
    %c0_i32_162 = arith.constant 0 : i32
    %252 = arith.cmpi sge, %251, %c0_i32_162 : i32
    %c16_i32_163 = arith.constant 16 : i32
    %253 = arith.cmpi slt, %251, %c16_i32_163 : i32
    %254 = arith.andi %252, %253 : i1
    %c0_i32_164 = arith.constant 0 : i32
    %c15_i32_165 = arith.constant 15 : i32
    %255 = arith.maxsi %c0_i32_164, %251 : i32
    %256 = arith.minsi %c15_i32_165, %255 : i32
    %257 = arith.extui %254 : i1 to i32
    %258 = arith.sitofp %257 : i32 to f32
    %259 = arith.truncf %258 : f32 to bf16
    %c0_166 = arith.constant 0 : index
    %260 = arith.index_cast %256 : i32 to index
    %c0_167 = arith.constant 0 : index
    %c0_168 = arith.constant 0 : index
    %261 = vector.load %arg2[%c0_166, %260, %c0_167, %c0_168] : memref<1x16x16x4xbf16, #tpu.memory_space<vmem>>, vector<1x1x16x4xbf16>
    %262 = vector.shape_cast %261 : vector<1x1x16x4xbf16> to vector<16x4xbf16>
    %263 = vector.broadcast %259 : bf16 to vector<16x4xbf16>
    %264 = arith.mulf %262, %263 : vector<16x4xbf16>
    %265 = vector.extract_strided_slice %264 {offsets = [0, 0], sizes = [15, 4], strides = [1, 1]} : vector<16x4xbf16> to vector<15x4xbf16>
    %c6 = arith.constant 6 : index
    %c1_169 = arith.constant 1 : index
    %c0_170 = arith.constant 0 : index
    %266 = vector.load %arg11[%c6, %c1_169, %c0_170] : memref<12x16x24xbf16, #tpu.memory_space<vmem>>, vector<1x15x4xbf16>
    %267 = vector.shape_cast %266 : vector<1x15x4xbf16> to vector<15x4xbf16>
    %268 = vector.shape_cast %265 : vector<15x4xbf16> to vector<1x15x4xbf16>
    tpu.vector_store %arg11[%c6, %c1_169, %c0_170], %268 {strides = array<i32>} : memref<12x16x24xbf16, #tpu.memory_space<vmem>>, vector<1x15x4xbf16>,
    %c6_171 = arith.constant 6 : index
    %c0_172 = arith.constant 0 : index
    %c8_173 = arith.constant 8 : index
    %269 = vector.load %arg11[%c6_171, %c0_172, %c8_173] : memref<12x16x24xbf16, #tpu.memory_space<vmem>>, vector<1x16x4xbf16>
    %270 = vector.shape_cast %269 : vector<1x16x4xbf16> to vector<16x4xbf16>
    %271 = vector.shape_cast %264 : vector<16x4xbf16> to vector<1x16x4xbf16>
    tpu.vector_store %arg11[%c6_171, %c0_172, %c8_173], %271 {strides = array<i32>} : memref<12x16x24xbf16, #tpu.memory_space<vmem>>, vector<1x16x4xbf16>,
    %272 = vector.extract_strided_slice %264 {offsets = [1, 0], sizes = [15, 4], strides = [1, 1]} : vector<16x4xbf16> to vector<15x4xbf16>
    %c6_174 = arith.constant 6 : index
    %c0_175 = arith.constant 0 : index
    %c16_176 = arith.constant 16 : index
    %273 = vector.load %arg11[%c6_174, %c0_175, %c16_176] : memref<12x16x24xbf16, #tpu.memory_space<vmem>>, vector<1x15x4xbf16>
    %274 = vector.shape_cast %273 : vector<1x15x4xbf16> to vector<15x4xbf16>
    %275 = vector.shape_cast %272 : vector<15x4xbf16> to vector<1x15x4xbf16>
    tpu.vector_store %arg11[%c6_174, %c0_175, %c16_176], %275 {strides = array<i32>} : memref<12x16x24xbf16, #tpu.memory_space<vmem>>, vector<1x15x4xbf16>,
    %c0_177 = arith.constant 0 : index
    %276 = arith.index_cast %256 : i32 to index
    %c0_178 = arith.constant 0 : index
    %c0_179 = arith.constant 0 : index
    %277 = vector.load %arg3[%c0_177, %276, %c0_178, %c0_179] : memref<1x16x16x4xbf16, #tpu.memory_space<vmem>>, vector<1x1x16x4xbf16>
    %278 = vector.shape_cast %277 : vector<1x1x16x4xbf16> to vector<16x4xbf16>
    %279 = vector.broadcast %259 : bf16 to vector<16x4xbf16>
    %280 = arith.mulf %278, %279 : vector<16x4xbf16>
    %281 = vector.extract_strided_slice %280 {offsets = [0, 0], sizes = [15, 4], strides = [1, 1]} : vector<16x4xbf16> to vector<15x4xbf16>
    %c6_180 = arith.constant 6 : index
    %c1_181 = arith.constant 1 : index
    %c4_182 = arith.constant 4 : index
    %282 = vector.load %arg11[%c6_180, %c1_181, %c4_182] : memref<12x16x24xbf16, #tpu.memory_space<vmem>>, vector<1x15x4xbf16>
    %283 = vector.shape_cast %282 : vector<1x15x4xbf16> to vector<15x4xbf16>
    %284 = vector.shape_cast %281 : vector<15x4xbf16> to vector<1x15x4xbf16>
    tpu.vector_store %arg11[%c6_180, %c1_181, %c4_182], %284 {strides = array<i32>} : memref<12x16x24xbf16, #tpu.memory_space<vmem>>, vector<1x15x4xbf16>,
    %c6_183 = arith.constant 6 : index
    %c0_184 = arith.constant 0 : index
    %c12_185 = arith.constant 12 : index
    %285 = vector.load %arg11[%c6_183, %c0_184, %c12_185] : memref<12x16x24xbf16, #tpu.memory_space<vmem>>, vector<1x16x4xbf16>
    %286 = vector.shape_cast %285 : vector<1x16x4xbf16> to vector<16x4xbf16>
    %287 = vector.shape_cast %280 : vector<16x4xbf16> to vector<1x16x4xbf16>
    tpu.vector_store %arg11[%c6_183, %c0_184, %c12_185], %287 {strides = array<i32>} : memref<12x16x24xbf16, #tpu.memory_space<vmem>>, vector<1x16x4xbf16>,
    %288 = vector.extract_strided_slice %280 {offsets = [1, 0], sizes = [15, 4], strides = [1, 1]} : vector<16x4xbf16> to vector<15x4xbf16>
    %c6_186 = arith.constant 6 : index
    %c0_187 = arith.constant 0 : index
    %c20_188 = arith.constant 20 : index
    %289 = vector.load %arg11[%c6_186, %c0_187, %c20_188] : memref<12x16x24xbf16, #tpu.memory_space<vmem>>, vector<1x15x4xbf16>
    %290 = vector.shape_cast %289 : vector<1x15x4xbf16> to vector<15x4xbf16>
    %291 = vector.shape_cast %288 : vector<15x4xbf16> to vector<1x15x4xbf16>
    tpu.vector_store %arg11[%c6_186, %c0_187, %c20_188], %291 {strides = array<i32>} : memref<12x16x24xbf16, #tpu.memory_space<vmem>>, vector<1x15x4xbf16>,
    %c5_i32 = arith.constant 5 : i32
    %292 = arith.addi %0, %c5_i32 : i32
    %c0_i32_189 = arith.constant 0 : i32
    %293 = arith.cmpi sge, %292, %c0_i32_189 : i32
    %c16_i32_190 = arith.constant 16 : i32
    %294 = arith.cmpi slt, %292, %c16_i32_190 : i32
    %295 = arith.andi %293, %294 : i1
    %c0_i32_191 = arith.constant 0 : i32
    %c15_i32_192 = arith.constant 15 : i32
    %296 = arith.maxsi %c0_i32_191, %292 : i32
    %297 = arith.minsi %c15_i32_192, %296 : i32
    %298 = arith.extui %295 : i1 to i32
    %299 = arith.sitofp %298 : i32 to f32
    %300 = arith.truncf %299 : f32 to bf16
    %c0_193 = arith.constant 0 : index
    %301 = arith.index_cast %297 : i32 to index
    %c0_194 = arith.constant 0 : index
    %c0_195 = arith.constant 0 : index
    %302 = vector.load %arg2[%c0_193, %301, %c0_194, %c0_195] : memref<1x16x16x4xbf16, #tpu.memory_space<vmem>>, vector<1x1x16x4xbf16>
    %303 = vector.shape_cast %302 : vector<1x1x16x4xbf16> to vector<16x4xbf16>
    %304 = vector.broadcast %300 : bf16 to vector<16x4xbf16>
    %305 = arith.mulf %303, %304 : vector<16x4xbf16>
    %306 = vector.extract_strided_slice %305 {offsets = [0, 0], sizes = [15, 4], strides = [1, 1]} : vector<16x4xbf16> to vector<15x4xbf16>
    %c7 = arith.constant 7 : index
    %c1_196 = arith.constant 1 : index
    %c0_197 = arith.constant 0 : index
    %307 = vector.load %arg11[%c7, %c1_196, %c0_197] : memref<12x16x24xbf16, #tpu.memory_space<vmem>>, vector<1x15x4xbf16>
    %308 = vector.shape_cast %307 : vector<1x15x4xbf16> to vector<15x4xbf16>
    %309 = vector.shape_cast %306 : vector<15x4xbf16> to vector<1x15x4xbf16>
    tpu.vector_store %arg11[%c7, %c1_196, %c0_197], %309 {strides = array<i32>} : memref<12x16x24xbf16, #tpu.memory_space<vmem>>, vector<1x15x4xbf16>,
    %c7_198 = arith.constant 7 : index
    %c0_199 = arith.constant 0 : index
    %c8_200 = arith.constant 8 : index
    %310 = vector.load %arg11[%c7_198, %c0_199, %c8_200] : memref<12x16x24xbf16, #tpu.memory_space<vmem>>, vector<1x16x4xbf16>
    %311 = vector.shape_cast %310 : vector<1x16x4xbf16> to vector<16x4xbf16>
    %312 = vector.shape_cast %305 : vector<16x4xbf16> to vector<1x16x4xbf16>
    tpu.vector_store %arg11[%c7_198, %c0_199, %c8_200], %312 {strides = array<i32>} : memref<12x16x24xbf16, #tpu.memory_space<vmem>>, vector<1x16x4xbf16>,
    %313 = vector.extract_strided_slice %305 {offsets = [1, 0], sizes = [15, 4], strides = [1, 1]} : vector<16x4xbf16> to vector<15x4xbf16>
    %c7_201 = arith.constant 7 : index
    %c0_202 = arith.constant 0 : index
    %c16_203 = arith.constant 16 : index
    %314 = vector.load %arg11[%c7_201, %c0_202, %c16_203] : memref<12x16x24xbf16, #tpu.memory_space<vmem>>, vector<1x15x4xbf16>
    %315 = vector.shape_cast %314 : vector<1x15x4xbf16> to vector<15x4xbf16>
    %316 = vector.shape_cast %313 : vector<15x4xbf16> to vector<1x15x4xbf16>
    tpu.vector_store %arg11[%c7_201, %c0_202, %c16_203], %316 {strides = array<i32>} : memref<12x16x24xbf16, #tpu.memory_space<vmem>>, vector<1x15x4xbf16>,
    %c0_204 = arith.constant 0 : index
    %317 = arith.index_cast %297 : i32 to index
    %c0_205 = arith.constant 0 : index
    %c0_206 = arith.constant 0 : index
    %318 = vector.load %arg3[%c0_204, %317, %c0_205, %c0_206] : memref<1x16x16x4xbf16, #tpu.memory_space<vmem>>, vector<1x1x16x4xbf16>
    %319 = vector.shape_cast %318 : vector<1x1x16x4xbf16> to vector<16x4xbf16>
    %320 = vector.broadcast %300 : bf16 to vector<16x4xbf16>
    %321 = arith.mulf %319, %320 : vector<16x4xbf16>
    %322 = vector.extract_strided_slice %321 {offsets = [0, 0], sizes = [15, 4], strides = [1, 1]} : vector<16x4xbf16> to vector<15x4xbf16>
    %c7_207 = arith.constant 7 : index
    %c1_208 = arith.constant 1 : index
    %c4_209 = arith.constant 4 : index
    %323 = vector.load %arg11[%c7_207, %c1_208, %c4_209] : memref<12x16x24xbf16, #tpu.memory_space<vmem>>, vector<1x15x4xbf16>
    %324 = vector.shape_cast %323 : vector<1x15x4xbf16> to vector<15x4xbf16>
    %325 = vector.shape_cast %322 : vector<15x4xbf16> to vector<1x15x4xbf16>
    tpu.vector_store %arg11[%c7_207, %c1_208, %c4_209], %325 {strides = array<i32>} : memref<12x16x24xbf16, #tpu.memory_space<vmem>>, vector<1x15x4xbf16>,
    %c7_210 = arith.constant 7 : index
    %c0_211 = arith.constant 0 : index
    %c12_212 = arith.constant 12 : index
    %326 = vector.load %arg11[%c7_210, %c0_211, %c12_212] : memref<12x16x24xbf16, #tpu.memory_space<vmem>>, vector<1x16x4xbf16>
    %327 = vector.shape_cast %326 : vector<1x16x4xbf16> to vector<16x4xbf16>
    %328 = vector.shape_cast %321 : vector<16x4xbf16> to vector<1x16x4xbf16>
    tpu.vector_store %arg11[%c7_210, %c0_211, %c12_212], %328 {strides = array<i32>} : memref<12x16x24xbf16, #tpu.memory_space<vmem>>, vector<1x16x4xbf16>,
    %329 = vector.extract_strided_slice %321 {offsets = [1, 0], sizes = [15, 4], strides = [1, 1]} : vector<16x4xbf16> to vector<15x4xbf16>
    %c7_213 = arith.constant 7 : index
    %c0_214 = arith.constant 0 : index
    %c20_215 = arith.constant 20 : index
    %330 = vector.load %arg11[%c7_213, %c0_214, %c20_215] : memref<12x16x24xbf16, #tpu.memory_space<vmem>>, vector<1x15x4xbf16>
    %331 = vector.shape_cast %330 : vector<1x15x4xbf16> to vector<15x4xbf16>
    %332 = vector.shape_cast %329 : vector<15x4xbf16> to vector<1x15x4xbf16>
    tpu.vector_store %arg11[%c7_213, %c0_214, %c20_215], %332 {strides = array<i32>} : memref<12x16x24xbf16, #tpu.memory_space<vmem>>, vector<1x15x4xbf16>,
    %c6_i32 = arith.constant 6 : i32
    %333 = arith.addi %0, %c6_i32 : i32
    %c0_i32_216 = arith.constant 0 : i32
    %334 = arith.cmpi sge, %333, %c0_i32_216 : i32
    %c16_i32_217 = arith.constant 16 : i32
    %335 = arith.cmpi slt, %333, %c16_i32_217 : i32
    %336 = arith.andi %334, %335 : i1
    %c0_i32_218 = arith.constant 0 : i32
    %c15_i32_219 = arith.constant 15 : i32
    %337 = arith.maxsi %c0_i32_218, %333 : i32
    %338 = arith.minsi %c15_i32_219, %337 : i32
    %339 = arith.extui %336 : i1 to i32
    %340 = arith.sitofp %339 : i32 to f32
    %341 = arith.truncf %340 : f32 to bf16
    %c0_220 = arith.constant 0 : index
    %342 = arith.index_cast %338 : i32 to index
    %c0_221 = arith.constant 0 : index
    %c0_222 = arith.constant 0 : index
    %343 = vector.load %arg2[%c0_220, %342, %c0_221, %c0_222] : memref<1x16x16x4xbf16, #tpu.memory_space<vmem>>, vector<1x1x16x4xbf16>
    %344 = vector.shape_cast %343 : vector<1x1x16x4xbf16> to vector<16x4xbf16>
    %345 = vector.broadcast %341 : bf16 to vector<16x4xbf16>
    %346 = arith.mulf %344, %345 : vector<16x4xbf16>
    %347 = vector.extract_strided_slice %346 {offsets = [0, 0], sizes = [15, 4], strides = [1, 1]} : vector<16x4xbf16> to vector<15x4xbf16>
    %c8_223 = arith.constant 8 : index
    %c1_224 = arith.constant 1 : index
    %c0_225 = arith.constant 0 : index
    %348 = vector.load %arg11[%c8_223, %c1_224, %c0_225] : memref<12x16x24xbf16, #tpu.memory_space<vmem>>, vector<1x15x4xbf16>
    %349 = vector.shape_cast %348 : vector<1x15x4xbf16> to vector<15x4xbf16>
    %350 = vector.shape_cast %347 : vector<15x4xbf16> to vector<1x15x4xbf16>
    tpu.vector_store %arg11[%c8_223, %c1_224, %c0_225], %350 {strides = array<i32>} : memref<12x16x24xbf16, #tpu.memory_space<vmem>>, vector<1x15x4xbf16>,
    %c8_226 = arith.constant 8 : index
    %c0_227 = arith.constant 0 : index
    %c8_228 = arith.constant 8 : index
    %351 = vector.load %arg11[%c8_226, %c0_227, %c8_228] : memref<12x16x24xbf16, #tpu.memory_space<vmem>>, vector<1x16x4xbf16>
    %352 = vector.shape_cast %351 : vector<1x16x4xbf16> to vector<16x4xbf16>
    %353 = vector.shape_cast %346 : vector<16x4xbf16> to vector<1x16x4xbf16>
    tpu.vector_store %arg11[%c8_226, %c0_227, %c8_228], %353 {strides = array<i32>} : memref<12x16x24xbf16, #tpu.memory_space<vmem>>, vector<1x16x4xbf16>,
    %354 = vector.extract_strided_slice %346 {offsets = [1, 0], sizes = [15, 4], strides = [1, 1]} : vector<16x4xbf16> to vector<15x4xbf16>
    %c8_229 = arith.constant 8 : index
    %c0_230 = arith.constant 0 : index
    %c16_231 = arith.constant 16 : index
    %355 = vector.load %arg11[%c8_229, %c0_230, %c16_231] : memref<12x16x24xbf16, #tpu.memory_space<vmem>>, vector<1x15x4xbf16>
    %356 = vector.shape_cast %355 : vector<1x15x4xbf16> to vector<15x4xbf16>
    %357 = vector.shape_cast %354 : vector<15x4xbf16> to vector<1x15x4xbf16>
    tpu.vector_store %arg11[%c8_229, %c0_230, %c16_231], %357 {strides = array<i32>} : memref<12x16x24xbf16, #tpu.memory_space<vmem>>, vector<1x15x4xbf16>,
    %c0_232 = arith.constant 0 : index
    %358 = arith.index_cast %338 : i32 to index
    %c0_233 = arith.constant 0 : index
    %c0_234 = arith.constant 0 : index
    %359 = vector.load %arg3[%c0_232, %358, %c0_233, %c0_234] : memref<1x16x16x4xbf16, #tpu.memory_space<vmem>>, vector<1x1x16x4xbf16>
    %360 = vector.shape_cast %359 : vector<1x1x16x4xbf16> to vector<16x4xbf16>
    %361 = vector.broadcast %341 : bf16 to vector<16x4xbf16>
    %362 = arith.mulf %360, %361 : vector<16x4xbf16>
    %363 = vector.extract_strided_slice %362 {offsets = [0, 0], sizes = [15, 4], strides = [1, 1]} : vector<16x4xbf16> to vector<15x4xbf16>
    %c8_235 = arith.constant 8 : index
    %c1_236 = arith.constant 1 : index
    %c4_237 = arith.constant 4 : index
    %364 = vector.load %arg11[%c8_235, %c1_236, %c4_237] : memref<12x16x24xbf16, #tpu.memory_space<vmem>>, vector<1x15x4xbf16>
    %365 = vector.shape_cast %364 : vector<1x15x4xbf16> to vector<15x4xbf16>
    %366 = vector.shape_cast %363 : vector<15x4xbf16> to vector<1x15x4xbf16>
    tpu.vector_store %arg11[%c8_235, %c1_236, %c4_237], %366 {strides = array<i32>} : memref<12x16x24xbf16, #tpu.memory_space<vmem>>, vector<1x15x4xbf16>,
    %c8_238 = arith.constant 8 : index
    %c0_239 = arith.constant 0 : index
    %c12_240 = arith.constant 12 : index
    %367 = vector.load %arg11[%c8_238, %c0_239, %c12_240] : memref<12x16x24xbf16, #tpu.memory_space<vmem>>, vector<1x16x4xbf16>
    %368 = vector.shape_cast %367 : vector<1x16x4xbf16> to vector<16x4xbf16>
    %369 = vector.shape_cast %362 : vector<16x4xbf16> to vector<1x16x4xbf16>
    tpu.vector_store %arg11[%c8_238, %c0_239, %c12_240], %369 {strides = array<i32>} : memref<12x16x24xbf16, #tpu.memory_space<vmem>>, vector<1x16x4xbf16>,
    %370 = vector.extract_strided_slice %362 {offsets = [1, 0], sizes = [15, 4], strides = [1, 1]} : vector<16x4xbf16> to vector<15x4xbf16>
    %c8_241 = arith.constant 8 : index
    %c0_242 = arith.constant 0 : index
    %c20_243 = arith.constant 20 : index
    %371 = vector.load %arg11[%c8_241, %c0_242, %c20_243] : memref<12x16x24xbf16, #tpu.memory_space<vmem>>, vector<1x15x4xbf16>
    %372 = vector.shape_cast %371 : vector<1x15x4xbf16> to vector<15x4xbf16>
    %373 = vector.shape_cast %370 : vector<15x4xbf16> to vector<1x15x4xbf16>
    tpu.vector_store %arg11[%c8_241, %c0_242, %c20_243], %373 {strides = array<i32>} : memref<12x16x24xbf16, #tpu.memory_space<vmem>>, vector<1x15x4xbf16>,
    %c7_i32 = arith.constant 7 : i32
    %374 = arith.addi %0, %c7_i32 : i32
    %c0_i32_244 = arith.constant 0 : i32
    %375 = arith.cmpi sge, %374, %c0_i32_244 : i32
    %c16_i32_245 = arith.constant 16 : i32
    %376 = arith.cmpi slt, %374, %c16_i32_245 : i32
    %377 = arith.andi %375, %376 : i1
    %c0_i32_246 = arith.constant 0 : i32
    %c15_i32_247 = arith.constant 15 : i32
    %378 = arith.maxsi %c0_i32_246, %374 : i32
    %379 = arith.minsi %c15_i32_247, %378 : i32
    %380 = arith.extui %377 : i1 to i32
    %381 = arith.sitofp %380 : i32 to f32
    %382 = arith.truncf %381 : f32 to bf16
    %c0_248 = arith.constant 0 : index
    %383 = arith.index_cast %379 : i32 to index
    %c0_249 = arith.constant 0 : index
    %c0_250 = arith.constant 0 : index
    %384 = vector.load %arg2[%c0_248, %383, %c0_249, %c0_250] : memref<1x16x16x4xbf16, #tpu.memory_space<vmem>>, vector<1x1x16x4xbf16>
    %385 = vector.shape_cast %384 : vector<1x1x16x4xbf16> to vector<16x4xbf16>
    %386 = vector.broadcast %382 : bf16 to vector<16x4xbf16>
    %387 = arith.mulf %385, %386 : vector<16x4xbf16>
    %388 = vector.extract_strided_slice %387 {offsets = [0, 0], sizes = [15, 4], strides = [1, 1]} : vector<16x4xbf16> to vector<15x4xbf16>
    %c9 = arith.constant 9 : index
    %c1_251 = arith.constant 1 : index
    %c0_252 = arith.constant 0 : index
    %389 = vector.load %arg11[%c9, %c1_251, %c0_252] : memref<12x16x24xbf16, #tpu.memory_space<vmem>>, vector<1x15x4xbf16>
    %390 = vector.shape_cast %389 : vector<1x15x4xbf16> to vector<15x4xbf16>
    %391 = vector.shape_cast %388 : vector<15x4xbf16> to vector<1x15x4xbf16>
    tpu.vector_store %arg11[%c9, %c1_251, %c0_252], %391 {strides = array<i32>} : memref<12x16x24xbf16, #tpu.memory_space<vmem>>, vector<1x15x4xbf16>,
    %c9_253 = arith.constant 9 : index
    %c0_254 = arith.constant 0 : index
    %c8_255 = arith.constant 8 : index
    %392 = vector.load %arg11[%c9_253, %c0_254, %c8_255] : memref<12x16x24xbf16, #tpu.memory_space<vmem>>, vector<1x16x4xbf16>
    %393 = vector.shape_cast %392 : vector<1x16x4xbf16> to vector<16x4xbf16>
    %394 = vector.shape_cast %387 : vector<16x4xbf16> to vector<1x16x4xbf16>
    tpu.vector_store %arg11[%c9_253, %c0_254, %c8_255], %394 {strides = array<i32>} : memref<12x16x24xbf16, #tpu.memory_space<vmem>>, vector<1x16x4xbf16>,
    %395 = vector.extract_strided_slice %387 {offsets = [1, 0], sizes = [15, 4], strides = [1, 1]} : vector<16x4xbf16> to vector<15x4xbf16>
    %c9_256 = arith.constant 9 : index
    %c0_257 = arith.constant 0 : index
    %c16_258 = arith.constant 16 : index
    %396 = vector.load %arg11[%c9_256, %c0_257, %c16_258] : memref<12x16x24xbf16, #tpu.memory_space<vmem>>, vector<1x15x4xbf16>
    %397 = vector.shape_cast %396 : vector<1x15x4xbf16> to vector<15x4xbf16>
    %398 = vector.shape_cast %395 : vector<15x4xbf16> to vector<1x15x4xbf16>
    tpu.vector_store %arg11[%c9_256, %c0_257, %c16_258], %398 {strides = array<i32>} : memref<12x16x24xbf16, #tpu.memory_space<vmem>>, vector<1x15x4xbf16>,
    %c0_259 = arith.constant 0 : index
    %399 = arith.index_cast %379 : i32 to index
    %c0_260 = arith.constant 0 : index
    %c0_261 = arith.constant 0 : index
    %400 = vector.load %arg3[%c0_259, %399, %c0_260, %c0_261] : memref<1x16x16x4xbf16, #tpu.memory_space<vmem>>, vector<1x1x16x4xbf16>
    %401 = vector.shape_cast %400 : vector<1x1x16x4xbf16> to vector<16x4xbf16>
    %402 = vector.broadcast %382 : bf16 to vector<16x4xbf16>
    %403 = arith.mulf %401, %402 : vector<16x4xbf16>
    %404 = vector.extract_strided_slice %403 {offsets = [0, 0], sizes = [15, 4], strides = [1, 1]} : vector<16x4xbf16> to vector<15x4xbf16>
    %c9_262 = arith.constant 9 : index
    %c1_263 = arith.constant 1 : index
    %c4_264 = arith.constant 4 : index
    %405 = vector.load %arg11[%c9_262, %c1_263, %c4_264] : memref<12x16x24xbf16, #tpu.memory_space<vmem>>, vector<1x15x4xbf16>
    %406 = vector.shape_cast %405 : vector<1x15x4xbf16> to vector<15x4xbf16>
    %407 = vector.shape_cast %404 : vector<15x4xbf16> to vector<1x15x4xbf16>
    tpu.vector_store %arg11[%c9_262, %c1_263, %c4_264], %407 {strides = array<i32>} : memref<12x16x24xbf16, #tpu.memory_space<vmem>>, vector<1x15x4xbf16>,
    %c9_265 = arith.constant 9 : index
    %c0_266 = arith.constant 0 : index
    %c12_267 = arith.constant 12 : index
    %408 = vector.load %arg11[%c9_265, %c0_266, %c12_267] : memref<12x16x24xbf16, #tpu.memory_space<vmem>>, vector<1x16x4xbf16>
    %409 = vector.shape_cast %408 : vector<1x16x4xbf16> to vector<16x4xbf16>
    %410 = vector.shape_cast %403 : vector<16x4xbf16> to vector<1x16x4xbf16>
    tpu.vector_store %arg11[%c9_265, %c0_266, %c12_267], %410 {strides = array<i32>} : memref<12x16x24xbf16, #tpu.memory_space<vmem>>, vector<1x16x4xbf16>,
    %411 = vector.extract_strided_slice %403 {offsets = [1, 0], sizes = [15, 4], strides = [1, 1]} : vector<16x4xbf16> to vector<15x4xbf16>
    %c9_268 = arith.constant 9 : index
    %c0_269 = arith.constant 0 : index
    %c20_270 = arith.constant 20 : index
    %412 = vector.load %arg11[%c9_268, %c0_269, %c20_270] : memref<12x16x24xbf16, #tpu.memory_space<vmem>>, vector<1x15x4xbf16>
    %413 = vector.shape_cast %412 : vector<1x15x4xbf16> to vector<15x4xbf16>
    %414 = vector.shape_cast %411 : vector<15x4xbf16> to vector<1x15x4xbf16>
    tpu.vector_store %arg11[%c9_268, %c0_269, %c20_270], %414 {strides = array<i32>} : memref<12x16x24xbf16, #tpu.memory_space<vmem>>, vector<1x15x4xbf16>,
    %c8_i32_271 = arith.constant 8 : i32
    %415 = arith.addi %0, %c8_i32_271 : i32
    %c0_i32_272 = arith.constant 0 : i32
    %416 = arith.cmpi sge, %415, %c0_i32_272 : i32
    %c16_i32_273 = arith.constant 16 : i32
    %417 = arith.cmpi slt, %415, %c16_i32_273 : i32
    %418 = arith.andi %416, %417 : i1
    %c0_i32_274 = arith.constant 0 : i32
    %c15_i32_275 = arith.constant 15 : i32
    %419 = arith.maxsi %c0_i32_274, %415 : i32
    %420 = arith.minsi %c15_i32_275, %419 : i32
    %421 = arith.extui %418 : i1 to i32
    %422 = arith.sitofp %421 : i32 to f32
    %423 = arith.truncf %422 : f32 to bf16
    %c0_276 = arith.constant 0 : index
    %424 = arith.index_cast %420 : i32 to index
    %c0_277 = arith.constant 0 : index
    %c0_278 = arith.constant 0 : index
    %425 = vector.load %arg2[%c0_276, %424, %c0_277, %c0_278] : memref<1x16x16x4xbf16, #tpu.memory_space<vmem>>, vector<1x1x16x4xbf16>
    %426 = vector.shape_cast %425 : vector<1x1x16x4xbf16> to vector<16x4xbf16>
    %427 = vector.broadcast %423 : bf16 to vector<16x4xbf16>
    %428 = arith.mulf %426, %427 : vector<16x4xbf16>
    %429 = vector.extract_strided_slice %428 {offsets = [0, 0], sizes = [15, 4], strides = [1, 1]} : vector<16x4xbf16> to vector<15x4xbf16>
    %c10 = arith.constant 10 : index
    %c1_279 = arith.constant 1 : index
    %c0_280 = arith.constant 0 : index
    %430 = vector.load %arg11[%c10, %c1_279, %c0_280] : memref<12x16x24xbf16, #tpu.memory_space<vmem>>, vector<1x15x4xbf16>
    %431 = vector.shape_cast %430 : vector<1x15x4xbf16> to vector<15x4xbf16>
    %432 = vector.shape_cast %429 : vector<15x4xbf16> to vector<1x15x4xbf16>
    tpu.vector_store %arg11[%c10, %c1_279, %c0_280], %432 {strides = array<i32>} : memref<12x16x24xbf16, #tpu.memory_space<vmem>>, vector<1x15x4xbf16>,
    %c10_281 = arith.constant 10 : index
    %c0_282 = arith.constant 0 : index
    %c8_283 = arith.constant 8 : index
    %433 = vector.load %arg11[%c10_281, %c0_282, %c8_283] : memref<12x16x24xbf16, #tpu.memory_space<vmem>>, vector<1x16x4xbf16>
    %434 = vector.shape_cast %433 : vector<1x16x4xbf16> to vector<16x4xbf16>
    %435 = vector.shape_cast %428 : vector<16x4xbf16> to vector<1x16x4xbf16>
    tpu.vector_store %arg11[%c10_281, %c0_282, %c8_283], %435 {strides = array<i32>} : memref<12x16x24xbf16, #tpu.memory_space<vmem>>, vector<1x16x4xbf16>,
    %436 = vector.extract_strided_slice %428 {offsets = [1, 0], sizes = [15, 4], strides = [1, 1]} : vector<16x4xbf16> to vector<15x4xbf16>
    %c10_284 = arith.constant 10 : index
    %c0_285 = arith.constant 0 : index
    %c16_286 = arith.constant 16 : index
    %437 = vector.load %arg11[%c10_284, %c0_285, %c16_286] : memref<12x16x24xbf16, #tpu.memory_space<vmem>>, vector<1x15x4xbf16>
    %438 = vector.shape_cast %437 : vector<1x15x4xbf16> to vector<15x4xbf16>
    %439 = vector.shape_cast %436 : vector<15x4xbf16> to vector<1x15x4xbf16>
    tpu.vector_store %arg11[%c10_284, %c0_285, %c16_286], %439 {strides = array<i32>} : memref<12x16x24xbf16, #tpu.memory_space<vmem>>, vector<1x15x4xbf16>,
    %c0_287 = arith.constant 0 : index
    %440 = arith.index_cast %420 : i32 to index
    %c0_288 = arith.constant 0 : index
    %c0_289 = arith.constant 0 : index
    %441 = vector.load %arg3[%c0_287, %440, %c0_288, %c0_289] : memref<1x16x16x4xbf16, #tpu.memory_space<vmem>>, vector<1x1x16x4xbf16>
    %442 = vector.shape_cast %441 : vector<1x1x16x4xbf16> to vector<16x4xbf16>
    %443 = vector.broadcast %423 : bf16 to vector<16x4xbf16>
    %444 = arith.mulf %442, %443 : vector<16x4xbf16>
    %445 = vector.extract_strided_slice %444 {offsets = [0, 0], sizes = [15, 4], strides = [1, 1]} : vector<16x4xbf16> to vector<15x4xbf16>
    %c10_290 = arith.constant 10 : index
    %c1_291 = arith.constant 1 : index
    %c4_292 = arith.constant 4 : index
    %446 = vector.load %arg11[%c10_290, %c1_291, %c4_292] : memref<12x16x24xbf16, #tpu.memory_space<vmem>>, vector<1x15x4xbf16>
    %447 = vector.shape_cast %446 : vector<1x15x4xbf16> to vector<15x4xbf16>
    %448 = vector.shape_cast %445 : vector<15x4xbf16> to vector<1x15x4xbf16>
    tpu.vector_store %arg11[%c10_290, %c1_291, %c4_292], %448 {strides = array<i32>} : memref<12x16x24xbf16, #tpu.memory_space<vmem>>, vector<1x15x4xbf16>,
    %c10_293 = arith.constant 10 : index
    %c0_294 = arith.constant 0 : index
    %c12_295 = arith.constant 12 : index
    %449 = vector.load %arg11[%c10_293, %c0_294, %c12_295] : memref<12x16x24xbf16, #tpu.memory_space<vmem>>, vector<1x16x4xbf16>
    %450 = vector.shape_cast %449 : vector<1x16x4xbf16> to vector<16x4xbf16>
    %451 = vector.shape_cast %444 : vector<16x4xbf16> to vector<1x16x4xbf16>
    tpu.vector_store %arg11[%c10_293, %c0_294, %c12_295], %451 {strides = array<i32>} : memref<12x16x24xbf16, #tpu.memory_space<vmem>>, vector<1x16x4xbf16>,
    %452 = vector.extract_strided_slice %444 {offsets = [1, 0], sizes = [15, 4], strides = [1, 1]} : vector<16x4xbf16> to vector<15x4xbf16>
    %c10_296 = arith.constant 10 : index
    %c0_297 = arith.constant 0 : index
    %c20_298 = arith.constant 20 : index
    %453 = vector.load %arg11[%c10_296, %c0_297, %c20_298] : memref<12x16x24xbf16, #tpu.memory_space<vmem>>, vector<1x15x4xbf16>
    %454 = vector.shape_cast %453 : vector<1x15x4xbf16> to vector<15x4xbf16>
    %455 = vector.shape_cast %452 : vector<15x4xbf16> to vector<1x15x4xbf16>
    tpu.vector_store %arg11[%c10_296, %c0_297, %c20_298], %455 {strides = array<i32>} : memref<12x16x24xbf16, #tpu.memory_space<vmem>>, vector<1x15x4xbf16>,
    %c9_i32 = arith.constant 9 : i32
    %456 = arith.addi %0, %c9_i32 : i32
    %c0_i32_299 = arith.constant 0 : i32
    %457 = arith.cmpi sge, %456, %c0_i32_299 : i32
    %c16_i32_300 = arith.constant 16 : i32
    %458 = arith.cmpi slt, %456, %c16_i32_300 : i32
    %459 = arith.andi %457, %458 : i1
    %c0_i32_301 = arith.constant 0 : i32
    %c15_i32_302 = arith.constant 15 : i32
    %460 = arith.maxsi %c0_i32_301, %456 : i32
    %461 = arith.minsi %c15_i32_302, %460 : i32
    %462 = arith.extui %459 : i1 to i32
    %463 = arith.sitofp %462 : i32 to f32
    %464 = arith.truncf %463 : f32 to bf16
    %c0_303 = arith.constant 0 : index
    %465 = arith.index_cast %461 : i32 to index
    %c0_304 = arith.constant 0 : index
    %c0_305 = arith.constant 0 : index
    %466 = vector.load %arg2[%c0_303, %465, %c0_304, %c0_305] : memref<1x16x16x4xbf16, #tpu.memory_space<vmem>>, vector<1x1x16x4xbf16>
    %467 = vector.shape_cast %466 : vector<1x1x16x4xbf16> to vector<16x4xbf16>
    %468 = vector.broadcast %464 : bf16 to vector<16x4xbf16>
    %469 = arith.mulf %467, %468 : vector<16x4xbf16>
    %470 = vector.extract_strided_slice %469 {offsets = [0, 0], sizes = [15, 4], strides = [1, 1]} : vector<16x4xbf16> to vector<15x4xbf16>
    %c11 = arith.constant 11 : index
    %c1_306 = arith.constant 1 : index
    %c0_307 = arith.constant 0 : index
    %471 = vector.load %arg11[%c11, %c1_306, %c0_307] : memref<12x16x24xbf16, #tpu.memory_space<vmem>>, vector<1x15x4xbf16>
    %472 = vector.shape_cast %471 : vector<1x15x4xbf16> to vector<15x4xbf16>
    %473 = vector.shape_cast %470 : vector<15x4xbf16> to vector<1x15x4xbf16>
    tpu.vector_store %arg11[%c11, %c1_306, %c0_307], %473 {strides = array<i32>} : memref<12x16x24xbf16, #tpu.memory_space<vmem>>, vector<1x15x4xbf16>,
    %c11_308 = arith.constant 11 : index
    %c0_309 = arith.constant 0 : index
    %c8_310 = arith.constant 8 : index
    %474 = vector.load %arg11[%c11_308, %c0_309, %c8_310] : memref<12x16x24xbf16, #tpu.memory_space<vmem>>, vector<1x16x4xbf16>
    %475 = vector.shape_cast %474 : vector<1x16x4xbf16> to vector<16x4xbf16>
    %476 = vector.shape_cast %469 : vector<16x4xbf16> to vector<1x16x4xbf16>
    tpu.vector_store %arg11[%c11_308, %c0_309, %c8_310], %476 {strides = array<i32>} : memref<12x16x24xbf16, #tpu.memory_space<vmem>>, vector<1x16x4xbf16>,
    %477 = vector.extract_strided_slice %469 {offsets = [1, 0], sizes = [15, 4], strides = [1, 1]} : vector<16x4xbf16> to vector<15x4xbf16>
    %c11_311 = arith.constant 11 : index
    %c0_312 = arith.constant 0 : index
    %c16_313 = arith.constant 16 : index
    %478 = vector.load %arg11[%c11_311, %c0_312, %c16_313] : memref<12x16x24xbf16, #tpu.memory_space<vmem>>, vector<1x15x4xbf16>
    %479 = vector.shape_cast %478 : vector<1x15x4xbf16> to vector<15x4xbf16>
    %480 = vector.shape_cast %477 : vector<15x4xbf16> to vector<1x15x4xbf16>
    tpu.vector_store %arg11[%c11_311, %c0_312, %c16_313], %480 {strides = array<i32>} : memref<12x16x24xbf16, #tpu.memory_space<vmem>>, vector<1x15x4xbf16>,
    %c0_314 = arith.constant 0 : index
    %481 = arith.index_cast %461 : i32 to index
    %c0_315 = arith.constant 0 : index
    %c0_316 = arith.constant 0 : index
    %482 = vector.load %arg3[%c0_314, %481, %c0_315, %c0_316] : memref<1x16x16x4xbf16, #tpu.memory_space<vmem>>, vector<1x1x16x4xbf16>
    %483 = vector.shape_cast %482 : vector<1x1x16x4xbf16> to vector<16x4xbf16>
    %484 = vector.broadcast %464 : bf16 to vector<16x4xbf16>
    %485 = arith.mulf %483, %484 : vector<16x4xbf16>
    %486 = vector.extract_strided_slice %485 {offsets = [0, 0], sizes = [15, 4], strides = [1, 1]} : vector<16x4xbf16> to vector<15x4xbf16>
    %c11_317 = arith.constant 11 : index
    %c1_318 = arith.constant 1 : index
    %c4_319 = arith.constant 4 : index
    %487 = vector.load %arg11[%c11_317, %c1_318, %c4_319] : memref<12x16x24xbf16, #tpu.memory_space<vmem>>, vector<1x15x4xbf16>
    %488 = vector.shape_cast %487 : vector<1x15x4xbf16> to vector<15x4xbf16>
    %489 = vector.shape_cast %486 : vector<15x4xbf16> to vector<1x15x4xbf16>
    tpu.vector_store %arg11[%c11_317, %c1_318, %c4_319], %489 {strides = array<i32>} : memref<12x16x24xbf16, #tpu.memory_space<vmem>>, vector<1x15x4xbf16>,
    %c11_320 = arith.constant 11 : index
    %c0_321 = arith.constant 0 : index
    %c12_322 = arith.constant 12 : index
    %490 = vector.load %arg11[%c11_320, %c0_321, %c12_322] : memref<12x16x24xbf16, #tpu.memory_space<vmem>>, vector<1x16x4xbf16>
    %491 = vector.shape_cast %490 : vector<1x16x4xbf16> to vector<16x4xbf16>
    %492 = vector.shape_cast %485 : vector<16x4xbf16> to vector<1x16x4xbf16>
    tpu.vector_store %arg11[%c11_320, %c0_321, %c12_322], %492 {strides = array<i32>} : memref<12x16x24xbf16, #tpu.memory_space<vmem>>, vector<1x16x4xbf16>,
    %493 = vector.extract_strided_slice %485 {offsets = [1, 0], sizes = [15, 4], strides = [1, 1]} : vector<16x4xbf16> to vector<15x4xbf16>
    %c11_323 = arith.constant 11 : index
    %c0_324 = arith.constant 0 : index
    %c20_325 = arith.constant 20 : index
    %494 = vector.load %arg11[%c11_323, %c0_324, %c20_325] : memref<12x16x24xbf16, #tpu.memory_space<vmem>>, vector<1x15x4xbf16>
    %495 = vector.shape_cast %494 : vector<1x15x4xbf16> to vector<15x4xbf16>
    %496 = vector.shape_cast %493 : vector<15x4xbf16> to vector<1x15x4xbf16>
    tpu.vector_store %arg11[%c11_323, %c0_324, %c20_325], %496 {strides = array<i32>} : memref<12x16x24xbf16, #tpu.memory_space<vmem>>, vector<1x15x4xbf16>,
    %c0_326 = arith.constant 0 : index
    %c0_327 = arith.constant 0 : index
    %c0_328 = arith.constant 0 : index
    %497 = vector.load %arg11[%c0_326, %c0_327, %c0_328] : memref<12x16x24xbf16, #tpu.memory_space<vmem>>, vector<10x16x24xbf16>
    %498 = vector.shape_cast %497 : vector<10x16x24xbf16> to vector<160x24xbf16>
    %c0_329 = arith.constant 0 : index
    %c0_330 = arith.constant 0 : index
    %c0_331 = arith.constant 0 : index
    %499 = vector.load %arg4[%c0_329, %c0_330, %c0_331] : memref<3x24x128xbf16, #tpu.memory_space<vmem>>, vector<1x24x128xbf16>
    %500 = vector.shape_cast %499 : vector<1x24x128xbf16> to vector<24x128xbf16>
    %cst_332 = arith.constant dense<0.000000e+00> : vector<160x128xf32>
    %501 = tpu.matmul %498, %500, %cst_332 {dimension_numbers = #tpu.dot_dimension_numbers<[1], [0], [0], [1], [0, 0, 1, 1], [], []>} : vector<160x24xbf16>, vector<24x128xbf16>, vector<160x128xf32> -> vector<160x128xf32>
    %c1_333 = arith.constant 1 : index
    %c0_334 = arith.constant 0 : index
    %c0_335 = arith.constant 0 : index
    %502 = vector.load %arg11[%c1_333, %c0_334, %c0_335] : memref<12x16x24xbf16, #tpu.memory_space<vmem>>, vector<10x16x24xbf16>
    %503 = vector.shape_cast %502 : vector<10x16x24xbf16> to vector<160x24xbf16>
    %c1_336 = arith.constant 1 : index
    %c0_337 = arith.constant 0 : index
    %c0_338 = arith.constant 0 : index
    %504 = vector.load %arg4[%c1_336, %c0_337, %c0_338] : memref<3x24x128xbf16, #tpu.memory_space<vmem>>, vector<1x24x128xbf16>
    %505 = vector.shape_cast %504 : vector<1x24x128xbf16> to vector<24x128xbf16>
    %cst_339 = arith.constant dense<0.000000e+00> : vector<160x128xf32>
    %506 = tpu.matmul %503, %505, %cst_339 {dimension_numbers = #tpu.dot_dimension_numbers<[1], [0], [0], [1], [0, 0, 1, 1], [], []>} : vector<160x24xbf16>, vector<24x128xbf16>, vector<160x128xf32> -> vector<160x128xf32>
    %507 = arith.addf %501, %506 : vector<160x128xf32>
    %c2_340 = arith.constant 2 : index
    %c0_341 = arith.constant 0 : index
    %c0_342 = arith.constant 0 : index
    %508 = vector.load %arg11[%c2_340, %c0_341, %c0_342] : memref<12x16x24xbf16, #tpu.memory_space<vmem>>, vector<10x16x24xbf16>
    %509 = vector.shape_cast %508 : vector<10x16x24xbf16> to vector<160x24xbf16>
    %c2_343 = arith.constant 2 : index
    %c0_344 = arith.constant 0 : index
    %c0_345 = arith.constant 0 : index
    %510 = vector.load %arg4[%c2_343, %c0_344, %c0_345] : memref<3x24x128xbf16, #tpu.memory_space<vmem>>, vector<1x24x128xbf16>
    %511 = vector.shape_cast %510 : vector<1x24x128xbf16> to vector<24x128xbf16>
    %cst_346 = arith.constant dense<0.000000e+00> : vector<160x128xf32>
    %512 = tpu.matmul %509, %511, %cst_346 {dimension_numbers = #tpu.dot_dimension_numbers<[1], [0], [0], [1], [0, 0, 1, 1], [], []>} : vector<160x24xbf16>, vector<24x128xbf16>, vector<160x128xf32> -> vector<160x128xf32>
    %513 = arith.addf %507, %512 : vector<160x128xf32>
    %c0_347 = arith.constant 0 : index
    %c0_348 = arith.constant 0 : index
    %514 = vector.load %arg5[%c0_347, %c0_348] : memref<1x128xf32, #tpu.memory_space<vmem>>, vector<1x128xf32>
    %515 = vector.broadcast %514 : vector<1x128xf32> to vector<160x128xf32>
    %516 = arith.mulf %513, %515 : vector<160x128xf32>
    %c0_349 = arith.constant 0 : index
    %c0_350 = arith.constant 0 : index
    %517 = vector.load %arg6[%c0_349, %c0_350] : memref<1x128xf32, #tpu.memory_space<vmem>>, vector<1x128xf32>
    %518 = vector.broadcast %517 : vector<1x128xf32> to vector<160x128xf32>
    %519 = arith.addf %516, %518 : vector<160x128xf32>
    %cst_351 = arith.constant 0.000000e+00 : f32
    %520 = vector.broadcast %cst_351 : f32 to vector<160x128xf32>
    %521 = arith.maximumf %519, %520 : vector<160x128xf32>
    %522 = vector.shape_cast %521 : vector<160x128xf32> to vector<10x16x128xf32>
    %523 = tpu.iota {dimensions = array<i32: 0>} : vector<10x1x1xi32>
    %c1_i32_352 = arith.constant 1 : i32
    %524 = arith.subi %0, %c1_i32_352 : i32
    %525 = vector.broadcast %524 : i32 to vector<10x1x1xi32>
    %526 = arith.addi %523, %525 : vector<10x1x1xi32>
    %c0_i32_353 = arith.constant 0 : i32
    %527 = vector.broadcast %c0_i32_353 : i32 to vector<10x1x1xi32>
    %528 = arith.cmpi sge, %526, %527 : vector<10x1x1xi32>
    %c16_i32_354 = arith.constant 16 : i32
    %529 = vector.broadcast %c16_i32_354 : i32 to vector<10x1x1xi32>
    %530 = arith.cmpi slt, %526, %529 : vector<10x1x1xi32>
    %531 = arith.andi %528, %530 : vector<10x1x1xi1>
    %cst_355 = arith.constant 0.000000e+00 : f32
    %532 = vector.shape_cast %531 : vector<10x1x1xi1> to vector<10x1x1xi1>
    %533 = vector.broadcast %532 : vector<10x1x1xi1> to vector<10x16x128xi1>
    %534 = vector.broadcast %cst_355 : f32 to vector<10x16x128xf32>
    %535 = arith.select %533, %522, %534 : vector<10x16x128xi1>, vector<10x16x128xf32>
    %536 = arith.truncf %535 : vector<10x16x128xf32> to vector<10x16x128xbf16>
    %cst_356 = arith.constant 0.000000e+00 : bf16
    %537 = vector.broadcast %cst_356 : bf16 to vector<10x1x128xbf16>
    %c0_357 = arith.constant 0 : index
    %c0_358 = arith.constant 0 : index
    %c0_359 = arith.constant 0 : index
    %538 = vector.load %arg12[%c0_357, %c0_358, %c0_359] : memref<10x16x384xbf16, #tpu.memory_space<vmem>>, vector<10x1x128xbf16>
    tpu.vector_store %arg12[%c0_357, %c0_358, %c0_359], %537 {strides = array<i32>} : memref<10x16x384xbf16, #tpu.memory_space<vmem>>, vector<10x1x128xbf16>,
    %539 = vector.extract_strided_slice %536 {offsets = [0, 0, 0], sizes = [10, 15, 128], strides = [1, 1, 1]} : vector<10x16x128xbf16> to vector<10x15x128xbf16>
    %c0_360 = arith.constant 0 : index
    %c1_361 = arith.constant 1 : index
    %c0_362 = arith.constant 0 : index
    %540 = vector.load %arg12[%c0_360, %c1_361, %c0_362] : memref<10x16x384xbf16, #tpu.memory_space<vmem>>, vector<10x15x128xbf16>
    tpu.vector_store %arg12[%c0_360, %c1_361, %c0_362], %539 {strides = array<i32>} : memref<10x16x384xbf16, #tpu.memory_space<vmem>>, vector<10x15x128xbf16>,
    %c0_363 = arith.constant 0 : index
    %c0_364 = arith.constant 0 : index
    %c128 = arith.constant 128 : index
    %541 = vector.load %arg12[%c0_363, %c0_364, %c128] : memref<10x16x384xbf16, #tpu.memory_space<vmem>>, vector<10x16x128xbf16>
    tpu.vector_store %arg12[%c0_363, %c0_364, %c128], %536 {strides = array<i32>} : memref<10x16x384xbf16, #tpu.memory_space<vmem>>, vector<10x16x128xbf16>,
    %cst_365 = arith.constant 0.000000e+00 : bf16
    %542 = vector.broadcast %cst_365 : bf16 to vector<10x1x128xbf16>
    %c0_366 = arith.constant 0 : index
    %c15_367 = arith.constant 15 : index
    %c256 = arith.constant 256 : index
    %543 = vector.load %arg12[%c0_366, %c15_367, %c256] : memref<10x16x384xbf16, #tpu.memory_space<vmem>>, vector<10x1x128xbf16>
    tpu.vector_store %arg12[%c0_366, %c15_367, %c256], %542 {strides = array<i32>} : memref<10x16x384xbf16, #tpu.memory_space<vmem>>, vector<10x1x128xbf16>,
    %544 = vector.extract_strided_slice %536 {offsets = [0, 1, 0], sizes = [10, 15, 128], strides = [1, 1, 1]} : vector<10x16x128xbf16> to vector<10x15x128xbf16>
    %c0_368 = arith.constant 0 : index
    %c0_369 = arith.constant 0 : index
    %c256_370 = arith.constant 256 : index
    %545 = vector.load %arg12[%c0_368, %c0_369, %c256_370] : memref<10x16x384xbf16, #tpu.memory_space<vmem>>, vector<10x15x128xbf16>
    tpu.vector_store %arg12[%c0_368, %c0_369, %c256_370], %544 {strides = array<i32>} : memref<10x16x384xbf16, #tpu.memory_space<vmem>>, vector<10x15x128xbf16>,
    %c0_371 = arith.constant 0 : index
    %c0_372 = arith.constant 0 : index
    %c0_373 = arith.constant 0 : index
    %546 = vector.load %arg12[%c0_371, %c0_372, %c0_373] : memref<10x16x384xbf16, #tpu.memory_space<vmem>>, vector<8x16x384xbf16>
    %547 = vector.shape_cast %546 : vector<8x16x384xbf16> to vector<128x384xbf16>
    %c0_374 = arith.constant 0 : index
    %c0_375 = arith.constant 0 : index
    %c0_376 = arith.constant 0 : index
    %548 = vector.load %arg7[%c0_374, %c0_375, %c0_376] : memref<3x384x128xbf16, #tpu.memory_space<vmem>>, vector<1x384x128xbf16>
    %549 = vector.shape_cast %548 : vector<1x384x128xbf16> to vector<384x128xbf16>
    %cst_377 = arith.constant dense<0.000000e+00> : vector<128x128xf32>
    %550 = tpu.matmul %547, %549, %cst_377 {dimension_numbers = #tpu.dot_dimension_numbers<[1], [0], [0], [1], [0, 0, 1, 1], [], []>} : vector<128x384xbf16>, vector<384x128xbf16>, vector<128x128xf32> -> vector<128x128xf32>
    %c1_378 = arith.constant 1 : index
    %c0_379 = arith.constant 0 : index
    %c0_380 = arith.constant 0 : index
    %551 = vector.load %arg12[%c1_378, %c0_379, %c0_380] : memref<10x16x384xbf16, #tpu.memory_space<vmem>>, vector<8x16x384xbf16>
    %552 = vector.shape_cast %551 : vector<8x16x384xbf16> to vector<128x384xbf16>
    %c1_381 = arith.constant 1 : index
    %c0_382 = arith.constant 0 : index
    %c0_383 = arith.constant 0 : index
    %553 = vector.load %arg7[%c1_381, %c0_382, %c0_383] : memref<3x384x128xbf16, #tpu.memory_space<vmem>>, vector<1x384x128xbf16>
    %554 = vector.shape_cast %553 : vector<1x384x128xbf16> to vector<384x128xbf16>
    %cst_384 = arith.constant dense<0.000000e+00> : vector<128x128xf32>
    %555 = tpu.matmul %552, %554, %cst_384 {dimension_numbers = #tpu.dot_dimension_numbers<[1], [0], [0], [1], [0, 0, 1, 1], [], []>} : vector<128x384xbf16>, vector<384x128xbf16>, vector<128x128xf32> -> vector<128x128xf32>
    %556 = arith.addf %550, %555 : vector<128x128xf32>
    %c2_385 = arith.constant 2 : index
    %c0_386 = arith.constant 0 : index
    %c0_387 = arith.constant 0 : index
    %557 = vector.load %arg12[%c2_385, %c0_386, %c0_387] : memref<10x16x384xbf16, #tpu.memory_space<vmem>>, vector<8x16x384xbf16>
    %558 = vector.shape_cast %557 : vector<8x16x384xbf16> to vector<128x384xbf16>
    %c2_388 = arith.constant 2 : index
    %c0_389 = arith.constant 0 : index
    %c0_390 = arith.constant 0 : index
    %559 = vector.load %arg7[%c2_388, %c0_389, %c0_390] : memref<3x384x128xbf16, #tpu.memory_space<vmem>>, vector<1x384x128xbf16>
    %560 = vector.shape_cast %559 : vector<1x384x128xbf16> to vector<384x128xbf16>
    %cst_391 = arith.constant dense<0.000000e+00> : vector<128x128xf32>
    %561 = tpu.matmul %558, %560, %cst_391 {dimension_numbers = #tpu.dot_dimension_numbers<[1], [0], [0], [1], [0, 0, 1, 1], [], []>} : vector<128x384xbf16>, vector<384x128xbf16>, vector<128x128xf32> -> vector<128x128xf32>
    %562 = arith.addf %556, %561 : vector<128x128xf32>
    %c0_392 = arith.constant 0 : index
    %c0_393 = arith.constant 0 : index
    %563 = vector.load %arg8[%c0_392, %c0_393] : memref<1x128xf32, #tpu.memory_space<vmem>>, vector<1x128xf32>
    %564 = vector.broadcast %563 : vector<1x128xf32> to vector<128x128xf32>
    %565 = arith.mulf %562, %564 : vector<128x128xf32>
    %c0_394 = arith.constant 0 : index
    %c0_395 = arith.constant 0 : index
    %566 = vector.load %arg9[%c0_394, %c0_395] : memref<1x128xf32, #tpu.memory_space<vmem>>, vector<1x128xf32>
    %567 = vector.broadcast %566 : vector<1x128xf32> to vector<128x128xf32>
    %568 = arith.addf %565, %567 : vector<128x128xf32>
    %cst_396 = arith.constant 0.000000e+00 : f32
    %569 = vector.broadcast %cst_396 : f32 to vector<128x128xf32>
    %570 = arith.maximumf %568, %569 : vector<128x128xf32>
    %571 = vector.shape_cast %570 : vector<128x128xf32> to vector<8x16x128xf32>
    %572 = arith.truncf %571 : vector<8x16x128xf32> to vector<8x16x128xbf16>
    %c0_397 = arith.constant 0 : index
    %c0_398 = arith.constant 0 : index
    %c0_399 = arith.constant 0 : index
    %c0_400 = arith.constant 0 : index
    %573 = vector.load %arg10[%c0_397, %c0_398, %c0_399, %c0_400] : memref<1x8x16x128xbf16, #tpu.memory_space<vmem>>, vector<1x8x16x128xbf16>
    %574 = vector.shape_cast %573 : vector<1x8x16x128xbf16> to vector<8x16x128xbf16>
    %575 = vector.shape_cast %572 : vector<8x16x128xbf16> to vector<1x8x16x128xbf16>
    tpu.vector_store %arg10[%c0_397, %c0_398, %c0_399, %c0_400], %575 {strides = array<i32>} : memref<1x8x16x128xbf16, #tpu.memory_space<vmem>>, vector<1x8x16x128xbf16>,
    return
  }
  func.func @transform_0(%arg0: i32, %arg1: i32) -> (i32, i32, i32, i32) {
    %c0_i32 = arith.constant 0 : i32
    %c0_i32_0 = arith.constant 0 : i32
    %c0_i32_1 = arith.constant 0 : i32
    %c0_i32_2 = arith.constant 0 : i32
    return %arg0, %c0_i32, %c0_i32_0, %c0_i32_1 : i32, i32, i32, i32
  }
  func.func @transform_1(%arg0: i32, %arg1: i32) -> (i32, i32, i32, i32) {
    %c0_i32 = arith.constant 0 : i32
    %c0_i32_0 = arith.constant 0 : i32
    %c0_i32_1 = arith.constant 0 : i32
    %c0_i32_2 = arith.constant 0 : i32
    return %arg0, %c0_i32, %c0_i32_0, %c0_i32_1 : i32, i32, i32, i32
  }
  func.func @transform_2(%arg0: i32, %arg1: i32) -> (i32, i32, i32) {
    %c0_i32 = arith.constant 0 : i32
    %c0_i32_0 = arith.constant 0 : i32
    %c0_i32_1 = arith.constant 0 : i32
    %c0_i32_2 = arith.constant 0 : i32
    return %c0_i32, %c0_i32_0, %c0_i32_1 : i32, i32, i32
  }
  func.func @transform_3(%arg0: i32, %arg1: i32) -> (i32, i32) {
    %c0_i32 = arith.constant 0 : i32
    %c0_i32_0 = arith.constant 0 : i32
    %c0_i32_1 = arith.constant 0 : i32
    return %c0_i32, %c0_i32_0 : i32, i32
  }
  func.func @transform_4(%arg0: i32, %arg1: i32) -> (i32, i32) {
    %c0_i32 = arith.constant 0 : i32
    %c0_i32_0 = arith.constant 0 : i32
    %c0_i32_1 = arith.constant 0 : i32
    return %c0_i32, %c0_i32_0 : i32, i32
  }
  func.func @transform_5(%arg0: i32, %arg1: i32) -> (i32, i32, i32) {
    %c0_i32 = arith.constant 0 : i32
    %c0_i32_0 = arith.constant 0 : i32
    %c0_i32_1 = arith.constant 0 : i32
    %c0_i32_2 = arith.constant 0 : i32
    return %c0_i32, %c0_i32_0, %c0_i32_1 : i32, i32, i32
  }
  func.func @transform_6(%arg0: i32, %arg1: i32) -> (i32, i32) {
    %c0_i32 = arith.constant 0 : i32
    %c0_i32_0 = arith.constant 0 : i32
    %c0_i32_1 = arith.constant 0 : i32
    return %c0_i32, %c0_i32_0 : i32, i32
  }
  func.func @transform_7(%arg0: i32, %arg1: i32) -> (i32, i32) {
    %c0_i32 = arith.constant 0 : i32
    %c0_i32_0 = arith.constant 0 : i32
    %c0_i32_1 = arith.constant 0 : i32
    return %c0_i32, %c0_i32_0 : i32, i32
  }
  func.func @transform_8(%arg0: i32, %arg1: i32) -> (i32, i32, i32, i32) {
    %c0_i32 = arith.constant 0 : i32
    %c0_i32_0 = arith.constant 0 : i32
    %c0_i32_1 = arith.constant 0 : i32
    return %arg0, %arg1, %c0_i32, %c0_i32_0 : i32, i32, i32, i32
  }
}

</mosaic_0001>

<bundles_post_ra>
// kernel: decoder_block_forward.1
= control target key start
LH: loop header
LB: loop body
LE: loop exit
PB: predicated region body
PF: predicated region fallthrough
CT: control target
= control target key end

     0   :  { %s5438_s27 = smov 0   ;;  %s5440_s28 = smov 0   ;;  %s7525_s0 = inlined_call_operand.vmem [shape: bf16[2,16,16,4], index: 0, kind: input, shape index: {}]   ;;  %s7526_s1 = inlined_call_operand.vmem [shape: bf16[2,16,16,4], index: 1, kind: input, shape index: {}]   ;;  %s7527_s2 = inlined_call_operand.vmem [shape: bf16[3,24,128], index: 2, kind: input, shape index: {}]   ;;  %s7528_s3 = inlined_call_operand.vmem [shape: f32[1,128], index: 3, kind: input, shape index: {}]   ;;  %s7529_s4 = inlined_call_operand.vmem [shape: f32[1,128], index: 4, kind: input, shape index: {}]   ;;  %s7530_s5 = inlined_call_operand.vmem [shape: bf16[3,384,128], index: 5, kind: input, shape index: {}]   ;;  %s7531_s6 = inlined_call_operand.vmem [shape: f32[1,128], index: 6, kind: input, shape index: {}]   ;;  %s7532_s7 = inlined_call_operand.vmem [shape: f32[1,128], index: 7, kind: input, shape index: {}]   ;;  %s7533_s8 = inlined_call_operand.vmem [shape: bf16[2,16,16,128], index: 8, kind: output, shape index: {}]  }
   0x1   :  { %7562 = sst [smem:[#allocation9_spill]] %s7525_s0  ;;  %s5442_s29 = smov 0  }
   0x2   :  { %7563 = sst [smem:[#allocation10_spill]] %s7526_s1  ;;  %s5444_s30 = smov 0  }
   0x3   :  { %s5446_s9 = smov 0  }
   0x4 LB: > { %7564 = sst [smem:[#allocation4_spill]] %s5378_s29  ;;  %s27_s10 = sadd.s32 1, %s5378_s29  ;;  %s5386_s9 = sphi %s5446_s9, %s18_s9   ;;  %s5382_s30 = sphi %s5444_s30, %s7654_s30   ;;  %s5378_s29 = sphi %s5442_s29, %s7653_s29   ;;  %s5374_s28 = sphi %s5440_s28, %s7652_s28   ;;  %s5370_s27 = sphi %s5438_s27, %s7651_s27  }
   0x5   : > { %7565 = sst [smem:[#allocation5_spill]] %s5382_s30  ;;  %s30_s11 = sadd.s32 1, %s5382_s30 }
   0x6   : > { %7566 = sst [smem:[#allocation6_spill]] %s5386_s9  ;;  %p28_p0 = scmp.ge.s32.totalorder %s27_s10, 2 }
   0x7   : > { %p4091_p1 = scmp.ge.s32.totalorder %s5386_s9, 1  ;;  %p286_p2 = scmp.lt.s32.totalorder %s5386_s9, 5 }
   0x8   : > { %s7656_s10 = smov (%p28_p0, %s27_s10), 0  ;;  %s7658_s11 = smov (!%p28_p0, %s30_s11), %s5382_s30 }
   0x9   : > { %7567 = sst [smem:[#allocation7_spill]] %s7656_s10  ;;  %p287_p3 = pnand %p4091_p1, %p286_p2 }
   0xa   : > { %p32_p4 = scmp.ge.s32.totalorder %s7658_s11, 2  ;;  %p330_p5 = scmp.lt.s32.totalorder (!%p287_p3), %s5374_s28, 1  ;;  %vm353_vm0 = vcmask (!%p287_p3), 57344   ;;  %vm354_vm1 = vsmask.f32 (!%p287_p3), 256  ;;  %vm392_vm2 = vcmask (!%p287_p3), 195719  }
   0xb   : > { %290 = sbr.rel (%p287_p3) target bundleno = 1042 (0x412), region = 52  ;;  %s5468_s12 = sshll.u32 (!%p287_p3), %s5370_s27, 3  ;;  %vm5472_vm3 = vmand (!%p287_p3), %vm353_vm0, %vm354_vm1  ;;  %v362_v1 = vld [vmem:[#allocation2 + $0x10] sm:$0x1] (!%p287_p3)  ;;  %vm393_vm4 = vsmask.f32 (!%p287_p3), 7966 }
   0xc   : > { %s7660_s11 = smov (%p32_p4, %s7658_s11), 0  ;;  %p343_p6 = scmp.lt.s32.totalorder (!%p287_p3), %s5468_s12, 15  ;;  %v363_v2 = vsel (!%p287_p3), %vm5472_vm3, 0, %v362_v1  ;;  %vm5481_vm5 = vmand (!%p287_p3), %vm392_vm2, %vm393_vm4  ;;  %v401_v4 = vld [vmem:[#allocation2 + $0x10] sm:$0x80] (!%p287_p3)  ;;  %vm476_vm6 = vcmask (!%p287_p3), 31744  }
   0xd   : > { %7568 = sst [smem:[#allocation8_spill]] %s7660_s11  ;;  %364 = vst [vmem:[#allocation2 + $0x10] sm:$0x1] (!%p287_p3), %v363_v2  ;;  %v402_v5 = vsel (!%p287_p3), %vm5481_vm5, 0, %v401_v4  ;;  %v365_v6 = vld [vmem:[#allocation2 + $0x18] sm:$0x1] (!%p287_p3) }
   0xe   : > { %403 = vst [vmem:[#allocation2 + $0x10] sm:$0x80] (!%p287_p3), %v402_v5  ;;  %v366_v7 = vsel (!%p287_p3), %vm5472_vm3, 0, %v365_v6  ;;  %v404_v8 = vld [vmem:[#allocation2 + $0x18] sm:$0x80] (!%p287_p3)  ;;  %p636_p7 = scmp.ge.s32.totalorder (!%p287_p3), %s5468_s12, 0 }
   0xf   : > { %367 = vst [vmem:[#allocation2 + $0x18] sm:$0x1] (!%p287_p3), %v366_v7  ;;  %v405_v9 = vsel (!%p287_p3), %vm5481_vm5, 0, %v404_v8  ;;  %v359_v10 = vld [vmem:[#allocation2 + $0x8] sm:$0x1] (!%p287_p3)  ;;  %p637_p8 = scmp.lt.s32.totalorder (!%p287_p3), %s5468_s12, 16 }
  0x10   : > { %v398_v11 = vld [vmem:[#allocation2 + $0x8] sm:$0x80] (!%p287_p3)  ;;  %406 = vst [vmem:[#allocation2 + $0x18] sm:$0x80] (!%p287_p3), %v405_v9  ;;  %v360_v12 = vsel (!%p287_p3), %vm5472_vm3, 0, %v359_v10  ;;  %p640_p9 = scmp.gt.s32.totalorder (!%p287_p3), %s5468_s12, 0 }
  0x11   : > { %v399_v13 = vsel (!%p287_p3), %vm5481_vm5, 0, %v398_v11  ;;  %v371_v14 = vld [vmem:[#allocation2 + $0x28] sm:$0x1] (!%p287_p3)  ;;  %361 = vst [vmem:[#allocation2 + $0x8] sm:$0x1] (!%p287_p3), %v360_v12  ;;  %s7573_s1 = sld [smem:[#allocation10_spill]] (!%p287_p3)  ;;  %p5518_p10 = pnand (!%p287_p3), %p637_p8, %p636_p7 }
  0x12   : > { %s7662_s28 = smov (!%p330_p5, %s5374_s28), 1  ;;  %400 = vst [vmem:[#allocation2 + $0x8] sm:$0x80] %v399_v13  ;;  %v372_v15 = vsel %vm5472_vm3, 0, %v371_v14  ;;  %v410_v16 = vld [vmem:[#allocation2 + $0x28] sm:$0x80] }
  0x13   : > { %s344_s13 = scalar_select %p343_p6, %s5468_s12, 15  ;;  %373 = vst [vmem:[#allocation2 + $0x28] sm:$0x1] %v372_v15  ;;  %v411_v17 = vsel %vm5481_vm5, 0, %v410_v16  ;;  %v368_v18 = vld [vmem:[#allocation2 + $0x20] sm:$0x1] }
  0x14   : > { %s4466_s14 = sshll.u32 %s7662_s28, 7  ;;  %s4098_s15 = sshll.u32 %s7662_s28, 5  ;;  %v407_v19 = vld [vmem:[#allocation2 + $0x20] sm:$0x80]  ;;  %412 = vst [vmem:[#allocation2 + $0x28] sm:$0x80] %v411_v17 }
  0x15   : > { %s4097_s16 = sshll.u32 %s344_s13, 1  ;;  %v369_v20 = vsel %vm5472_vm3, 0, %v368_v18  ;;  %v408_v21 = vsel %vm5481_vm5, 0, %v407_v19  ;;  %v374_v22 = vld [vmem:[#allocation2 + $0x30] sm:$0x1]  ;;  %s7575_s0 = sld [smem:[#allocation9_spill]] }
  0x16   : > { %s5496_s17 = sadd.s32 %s4098_s15, %s4097_s16  ;;  %v413_v23 = vld [vmem:[#allocation2 + $0x30] sm:$0x80]  ;;  %370 = vst [vmem:[#allocation2 + $0x20] sm:$0x1] %v369_v20  ;;  %409 = vst [vmem:[#allocation2 + $0x20] sm:$0x80] %v408_v21 }
  0x17   : > { %s5514_s20 = scalar_lea.vmem %s7573_s1, %s4466_s14  ;;  %v375_v24 = vsel %vm5472_vm3, 0, %v374_v22  ;;  %v414_v25 = vsel %vm5481_vm5, 0, %v413_v23  ;;  %s5543_s15 = sadd.s32 1, %s5468_s12  ;;  %v377_v26 = vld [vmem:[#allocation2 + $0x38] sm:$0x1]  ;;  %v681_v49 = vld [vmem:[#allocation2 + $0x10] sm:$0xff] }
  0x18   : > { %s641_s22 = scalar_select %p640_p9, %s5468_s12, 0  ;;  %376 = vst [vmem:[#allocation2 + $0x30] sm:$0x1] %v375_v24  ;;  %415 = vst [vmem:[#allocation2 + $0x30] sm:$0x80] %v414_v25  ;;  %v378_v32 = vsel %vm5472_vm3, 0, %v377_v26 }
  0x19   : > { %s4128_s23 = scalar_select %p5518_p10, 0, 1  ;;  %v416_v27 = vld [vmem:[#allocation2 + $0x38] sm:$0x80]  ;;  %379 = vst [vmem:[#allocation2 + $0x38] sm:$0x1] %v378_v32 }
  0x1a   : > { %s7664_s22 = smov (!%p343_p6, %s641_s22), 15  ;;  %p733_p12 = scmp.ge.s32.totalorder %s5543_s15, 0  ;;  %v417_v33 = vsel %vm5481_vm5, 0, %v416_v27  ;;  %v380_v34 = vld [vmem:[#allocation2 + $0x40] sm:$0x1]  ;;  %v778_v6 = vld [vmem:[#allocation2 + $0x18] sm:$0xff] }
  0x1b   : > { %s645_s24 = scvt.s32.f32 %s4128_s23  ;;  %s5540_s27 = scalar_lea.vmem %s7575_s0, %s4466_s14  ;;  %418 = vst [vmem:[#allocation2 + $0x38] sm:$0x80] %v417_v33  ;;  %v419_v35 = vld [vmem:[#allocation2 + $0x40] sm:$0x80]  ;;  %v381_v37 = vsel %vm5472_vm3, 0, %v380_v34  ;;  %v585_v24 = vld [vmem:[#allocation2 + $0x8] sm:$0xff] }
  0x1c   : > { %s4478_s13 = sshll.u32 %s7664_s22, 3  ;;  %p734_p13 = scmp.lt.s32.totalorder %s5543_s15, 16  ;;  %v420_v38 = vsel %vm5481_vm5, 0, %v419_v35  ;;  %382 = vst [vmem:[#allocation2 + $0x40] sm:$0x1] %v381_v37  ;;  %vm1672_vm9 = vcmask 1043456  }
  0x1d   : > { %p647_p11 = scmp.ne.f32.partialorder %s645_s24, %s645_s24  ;;  %s648_s16 = sshrl.u32 %s645_s24, 16  ;;  %421 = vst [vmem:[#allocation2 + $0x40] sm:$0x80] %v420_v38  ;;  %vm477_vm7 = vsmask.f32 7938  ;;  %vm485_vm10 = vcmask 97344  }
  0x1e   : > { %s649_s18 = sand.u32 1, %s648_s16  ;;  %s697_s19 = scalar_lea.vmem %s5514_s20, %s4478_s13  ;;  %vm5593_vm8 = vmand %vm476_vm6, %vm477_vm7  ;;  %v383_v1 = vld [vmem:[#allocation2 + $0x48] sm:$0x1]  ;;  %v422_v2 = vld [vmem:[#allocation2 + $0x48] sm:$0x80]  ;;  %vm492_vm11 = vcmask 162944  }
  0x1f   : > { %s650_s21 = sadd.s32 32767, %s649_s18  ;;  %s658_s1 = scalar_lea.vmem %s5540_s27, %s4478_s13  ;;  %v698_v28 = vld [vmem:[%s697_s19] sm:$0xf]  ;;  %v699_v29 = vld [vmem:[%s697_s19 + $0x4] sm:$0xf]  ;;  %v384_v7 = vsel %vm5472_vm3, 0, %v383_v1 }
  0x20   : > { %s651_s28 = sadd.s32 %s650_s21, %s645_s24  ;;  %v659_v30 = vld [vmem:[%s658_s1] sm:$0xf]  ;;  %v660_v31 = vld [vmem:[%s658_s1 + $0x4] sm:$0xf]  ;;  %p737_p0 = scmp.gt.s32.totalorder %s5543_s15, 0  ;;  %v423_v8 = vsel %vm5481_vm5, 0, %v422_v2 }
  0x21   : > { %s652_s23 = sand.u32 4294901760, %s651_s28  ;;  %p5556_p1 = pnand %p734_p13, %p733_p12  ;;  %385 = vst [vmem:[#allocation2 + $0x48] sm:$0x1] %v384_v7  ;;  %424 = vst [vmem:[#allocation2 + $0x48] sm:$0x80] %v423_v8  ;;  %vm519_vm13 = vcmask 64544  }
  0x22   : > { %s7666_s23 = smov (%p647_p11, %s652_s23), 2143289344  ;;  %p4134_p2 = scmp.lt.s32.totalorder %s5543_s15, 15  ;;  %v386_v13 = vld [vmem:[#allocation2 + $0x50] sm:$0x1]  ;;  %v425_v14 = vld [vmem:[#allocation2 + $0x50] sm:$0x80]  ;;  %vm6310_vm15 = vmand %vm519_vm13, %vm477_vm7 }
  0x23   : > { %s655_s14 = sshrl.u32 %s7666_s23, 16  ;;  %s5562_s25 = sadd.s32 4294967295, %s5468_s12  ;;  %v387_v15 = vsel %vm5472_vm3, 0, %v386_v13  ;;  %v426_v16 = vsel %vm5481_vm5, 0, %v425_v14  ;;  %vm493_vm12 = vsmask.f32 7424 }
  0x24   : > { %s661_s24 = sshll.u32 %s655_s14, 16  ;;  %p540_p3 = scmp.ge.s32.totalorder %s5562_s25, 0  ;;  %388 = vst [vmem:[#allocation2 + $0x50] sm:$0x1] %v387_v15  ;;  %427 = vst [vmem:[#allocation2 + $0x50] sm:$0x80] %v426_v16 }
  0x25   : > { %s662_s1 = sor.u32 %s661_s24, %s655_s14  ;;  %p541_p4 = scmp.lt.s32.totalorder %s5562_s25, 16  ;;  %vm6305_vm14 = vmand %vm492_vm11, %vm493_vm12  ;;  %vm527_vm0 = vcmask 130144   ;;  %vm534_vm2 = vcmask 195744   ;;  %vm2298_vm6 = vcmask 1040384  }
  0x26   : > { %v663_v36 = vstv %s662_s1  ;;  %s738_s26 = scalar_select %p737_p0, %s5543_s15, 0 }
  0x27   : > { %v700_v39 = vmul.bf16 %v698_v28, %v663_v36  ;;  %v701_v40 = vmul.bf16 %v699_v29, %v663_v36  ;;  %v665_v41 = vmul.bf16 %v663_v36, %v659_v30  ;;  %v666_v42 = vmul.bf16 %v663_v36, %v660_v31  ;;  %s4139_s13 = scalar_select %p5556_p1, 0, 1  ;;  %v356_v29 = vld [vmem:[#allocation2] sm:$0x1]  ;;  %v395_v30 = vld [vmem:[#allocation2] sm:$0x80] }
  0x28   : > { %s7668_s26 = smov (!%p4134_p2, %s738_s26), 15  ;;  %s7534_s19 = smov 12   ;;  %v357_v31 = vsel %vm5472_vm3, 0, %v356_v29  ;;  %v396_v32 = vsel %vm5481_vm5, 0, %v395_v30 }
  0x29   : > { %v5575_v43 = vcombine.low %v700_v39, %v701_v40  ;;  %v5577_v44 = vcombine.low %v665_v41, %v666_v42  ;;  %s742_s16 = scvt.s32.f32 %s4139_s13  ;;  %s4482_s18 = sshll.u32 %s7668_s26, 3  ;;  %358 = vst [vmem:[#allocation2] sm:$0x1] %v357_v31  ;;  %397 = vst [vmem:[#allocation2] sm:$0x80] %v396_v32  ;;  %v875_v40 = vld [vmem:[#allocation2 + $0x20] sm:$0xff] }
  0x2a   : > { %s7544_s21 = smov 8   ;;  %p544_p5 = scmp.gt.s32.totalorder %s5562_s25, 0 }
  0x2b   : > { %720 = vrot.lane.b32.xlu1 %v5575_v43, %s7534_s19  ;;  %684 = vrot.lane.b32.xlu0 %v5577_v44, %s7544_s21  ;;  %s745_s15 = sshrl.u32 %s742_s16, 16  ;;  %v673_v45 = vshrl.u32 %v5577_v44, 16  ;;  %p744_p6 = scmp.ne.f32.partialorder %s742_s16, %s742_s16  ;;  %v676_v47 = vshll.u32 %v5577_v44, 16 }
  0x2c   : > { %s746_s28 = sand.u32 1, %s745_s15  ;;  %s755_s14 = scalar_lea.vmem %s5540_s27, %s4482_s18 }
  0x2d   : > { %s747_s23 = sadd.s32 32767, %s746_s28  ;;  %v675_v46 = vrot.slane %v673_v45, 7  ;;  %s794_s24 = scalar_lea.vmem %s5514_s20, %s4482_s18  ;;  %v756_v51 = vld [vmem:[%s755_s14] sm:$0xf]  ;;  %v757_v52 = vld [vmem:[%s755_s14 + $0x4] sm:$0xf] }
  0x2e   : > { %s748_s22 = sadd.s32 %s747_s23, %s742_s16  ;;  %p4112_p7 = scmp.lt.s32.totalorder %s5562_s25, 15  ;;  %v795_v53 = vld [vmem:[%s794_s24] sm:$0xf]  ;;  %v796_v54 = vld [vmem:[%s794_s24 + $0x4] sm:$0xf] }
  0x2f   : > { %s749_s1 = sand.u32 4294901760, %s748_s22  ;;  %v678_v50 = vor.u32 %v676_v47, %v675_v46  ;;  %p542_p8 = pnand %p541_p4, %p540_p3 }
  0x30   : > { %s7670_s1 = smov (%p744_p6, %s749_s1), 2143289344  ;;  %s5610_s15 = sadd.s32 2, %s5468_s12 }
  0x31   : > { %s545_s26 = scalar_select %p544_p5, %s5562_s25, 0  ;;  %v682_v55 = vsel %vm5593_vm8, %v678_v50, %v681_v49 }
  0x32   : > { %s752_s13 = sshrl.u32 %s7670_s1, 16  ;;  %683 = vst [vmem:[#allocation2 + $0x10] sm:$0xff] %v682_v55  ;;  %p830_p9 = scmp.ge.s32.totalorder %s5610_s15, 0 }
  0x33   : > { %s758_s16 = sshll.u32 %s752_s13, 16  ;;  %s7672_s26 = smov (!%p4112_p7, %s545_s26), 15 }
  0x34   : > { %s759_s18 = sor.u32 %s758_s16, %s752_s13  ;;  %p831_p10 = scmp.lt.s32.totalorder %s5610_s15, 16 }
  0x35   : > { %v760_v56 = vstv %s759_s18  ;;  %s4117_s28 = scalar_select %p542_p8, 0, 1 }
  0x36   : > { %v762_v57 = vmul.bf16 %v760_v56, %v756_v51  ;;  %v763_v58 = vmul.bf16 %v760_v56, %v757_v52  ;;  %v797_v59 = vmul.bf16 %v795_v53, %v760_v56  ;;  %v798_v60 = vmul.bf16 %v796_v54, %v760_v56  ;;  %s4474_s22 = sshll.u32 %s7672_s26, 3  ;;  %p834_p12 = scmp.gt.s32.totalorder %s5610_s15, 0 }
  0x37   : > { %s549_s23 = scvt.s32.f32 %s4117_s28  ;;  %s562_s16 = scalar_lea.vmem %s5540_s27, %s4474_s22 }
  0x38   : > { %v5616_v61 = vcombine.low %v762_v57, %v763_v58  ;;  %v5618_v62 = vcombine.low %v797_v59, %v798_v60  ;;  %p4145_p13 = scmp.lt.s32.totalorder %s5610_s15, 15  ;;  %v563_v10 = vld [vmem:[%s562_s16] sm:$0xf]  ;;  %v564_v11 = vld [vmem:[%s562_s16 + $0x4] sm:$0xf]  ;;  %p5650_p0 = pnand %p831_p10, %p830_p9 }
  0x39   : > { %s552_s14 = sshrl.u32 %s549_s23, 16  ;;  %p551_p11 = scmp.ne.f32.partialorder %s549_s23, %s549_s23 }
  0x3a   : > { %781 = vrot.lane.b32.xlu1 %v5616_v61, %s7544_s21  ;;  %v770_v63 = vshrl.u32 %v5616_v61, 16  ;;  %s553_s24 = sand.u32 1, %s552_s14  ;;  %v773_v5 = vshll.u32 %v5616_v61, 16  ;;  %v808_v30 = vshll.u32 %v5618_v62, 16  ;;  %s6102_s9 = sadd.s32 9, %s5468_s12 }
  0x3b   : > { %s554_s1 = sadd.s32 32767, %s553_s24 }
  0x3c   : > { %v772_v4 = vrot.slane %v770_v63, 7  ;;  %s555_s13 = sadd.s32 %s554_s1, %s549_s23 }
  0x3d   : > { %s556_s18 = sand.u32 4294901760, %s555_s13  ;;  %s5659_s13 = sadd.s32 4, %s5468_s12 }
  0x3e   : > { %v775_v9 = vor.u32 %v773_v5, %v772_v4  ;;  %s7674_s18 = smov (%p551_p11, %s556_s18), 2143289344  ;;  %p1024_p1 = scmp.ge.s32.totalorder %s5659_s13, 0 }
  0x3f   : > { %s835_s28 = scalar_select %p834_p12, %s5610_s15, 0 }
  0x40   : > { %v779_v12 = vsel %vm5593_vm8, %v775_v9, %v778_v6  ;;  %s559_s14 = sshrl.u32 %s7674_s18, 16  ;;  %p1025_p2 = scmp.lt.s32.totalorder %s5659_s13, 16  ;;  %v688_v6 = vrot.slane %v676_v47, 1  ;;  %v785_v47 = vrot.slane %v773_v5, 1 }
  0x41   : > { %780 = vst [vmem:[#allocation2 + $0x18] sm:$0xff] %v779_v12  ;;  %s565_s23 = sshll.u32 %s559_s14, 16  ;;  %s7676_s28 = smov (!%p4145_p13, %s835_s28), 15 }
  0x42   : > { %s566_s1 = sor.u32 %s565_s23, %s559_s14  ;;  %s7536_s14 = sshll.u32 %s7676_s28, 3  ;;  %v689_v12 = vor.u32 %v688_v6, %v673_v45  ;;  %v786_v45 = vor.u32 %v785_v47, %v770_v63  ;;  %v1166_v6 = vld [vmem:[#allocation2 + $0x38] sm:$0xff] }
  0x43   : > { %v5661_v17 = vstv %s566_s1  ;;  %s4150_s16 = scalar_select %p5650_p0, 0, 1 }
  0x44   : > { %v569_v18 = vmul.bf16 %v5661_v17, %v563_v10  ;;  %v570_v19 = vmul.bf16 %v5661_v17, %v564_v11  ;;  %p1028_p4 = scmp.gt.s32.totalorder %s5659_s13, 0  ;;  %p4167_p5 = scmp.lt.s32.totalorder %s5659_s13, 15  ;;  %v1069_v11 = vld [vmem:[#allocation2 + $0x30] sm:$0xff] }
  0x45   : > { %s839_s18 = scvt.s32.f32 %s4150_s16  ;;  %s852_s16 = scalar_lea.vmem %s5540_s27, %s7536_s14 }
  0x46   : > { %v5671_v20 = vcombine.low %v569_v18, %v570_v19  ;;  %v853_v26 = vld [vmem:[%s852_s16] sm:$0xf]  ;;  %v854_v27 = vld [vmem:[%s852_s16 + $0x4] sm:$0xf]  ;;  %p5696_p6 = pnand %p1025_p2, %p1024_p1  ;;  %s5701_s14 = sadd.s32 3, %s5468_s12 }
  0x47   : > { %s842_s15 = sshrl.u32 %s839_s18, 16  ;;  %p841_p3 = scmp.ne.f32.partialorder %s839_s18, %s839_s18 }
  0x48   : > { %588 = vrot.lane.b32.xlu0 %v5671_v20, %s7544_s21  ;;  %v577_v21 = vshrl.u32 %v5671_v20, 16  ;;  %s843_s23 = sand.u32 1, %s842_s15  ;;  %v580_v22 = vshll.u32 %v5671_v20, 16  ;;  %p927_p7 = scmp.ge.s32.totalorder %s5701_s14, 0 }
  0x49   : > { %s844_s24 = sadd.s32 32767, %s843_s23  ;;  %p928_p8 = scmp.lt.s32.totalorder %s5701_s14, 16 }
  0x4a   : > { %v579_v23 = vrot.slane %v577_v21, 7  ;;  %s845_s1 = sadd.s32 %s844_s24, %s839_s18  ;;  %p931_p9 = scmp.gt.s32.totalorder %s5701_s14, 0 }
  0x4b   : > { %s846_s19 = sand.u32 4294901760, %s845_s1  ;;  %p4156_p11 = scmp.lt.s32.totalorder %s5701_s14, 15 }
  0x4c   : > { %v582_v25 = vor.u32 %v580_v22, %v579_v23  ;;  %s7678_s19 = smov (%p841_p3, %s846_s19), 2143289344  ;;  %p5743_p12 = pnand %p928_p8, %p927_p7  ;;  %v805_v23 = vshrl.u32 %v5618_v62, 16 }
  0x4d   : > { %s1029_s15 = scalar_select %p1028_p4, %s5659_s13, 0 }
  0x4e   : > { %v586_v28 = vsel %vm5593_vm8, %v582_v25, %v585_v24  ;;  %s849_s23 = sshrl.u32 %s7678_s19, 16  ;;  %v807_v29 = vrot.slane %v805_v23, 7 }
  0x4f   : > { %587 = vst [vmem:[#allocation2 + $0x8] sm:$0xff] %v586_v28  ;;  %s855_s24 = sshll.u32 %s849_s23, 16  ;;  %s7680_s15 = smov (!%p4167_p5, %s1029_s15), 15 }
  0x50   : > { %s856_s1 = sor.u32 %s855_s24, %s849_s23  ;;  %s4494_s23 = sshll.u32 %s7680_s15, 3 }
  0x51   : > { %v5707_v33 = vstv %s856_s1  ;;  %s4172_s19 = scalar_select %p5696_p6, 0, 1 }
  0x52   : > { %v859_v34 = vmul.bf16 %v5707_v33, %v853_v26  ;;  %v860_v35 = vmul.bf16 %v5707_v33, %v854_v27  ;;  %s601_s24 = scalar_lea.vmem %s5514_s20, %s4474_s22  ;;  %s1046_s0 = scalar_lea.vmem %s5540_s27, %s4494_s23  ;;  %v972_v27 = vld [vmem:[#allocation2 + $0x28] sm:$0xff] }
  0x53   : > { %s1033_s16 = scvt.s32.f32 %s4172_s19  ;;  %s1085_s19 = scalar_lea.vmem %s5514_s20, %s4494_s23  ;;  %v602_v42 = vld [vmem:[%s601_s24] sm:$0xf]  ;;  %v603_v46 = vld [vmem:[%s601_s24 + $0x4] sm:$0xf] }
  0x54   : > { %v5717_v36 = vcombine.low %v859_v34, %v860_v35  ;;  %v1047_v49 = vld [vmem:[%s1046_s0] sm:$0xf]  ;;  %v1048_v50 = vld [vmem:[%s1046_s0 + $0x4] sm:$0xf]  ;;  %s932_s22 = scalar_select %p931_p9, %s5701_s14, 0  ;;  %v604_v55 = vmul.bf16 %v602_v42, %v5661_v17  ;;  %v605_v56 = vmul.bf16 %v603_v46, %v5661_v17 }
  0x55   : > { %s1036_s13 = sshrl.u32 %s1033_s16, 16  ;;  %p1035_p10 = scmp.ne.f32.partialorder %s1033_s16, %s1033_s16  ;;  %v1086_v51 = vld [vmem:[%s1085_s19] sm:$0xf]  ;;  %v1087_v52 = vld [vmem:[%s1085_s19 + $0x4] sm:$0xf] }
  0x56   : > { %878 = vrot.lane.b32.xlu1 %v5717_v36, %s7544_s21  ;;  %v867_v37 = vshrl.u32 %v5717_v36, 16  ;;  %s1037_s18 = sand.u32 1, %s1036_s13  ;;  %v870_v39 = vshll.u32 %v5717_v36, 16  ;;  %s7684_s22 = smov (!%p4156_p11, %s932_s22), 15  ;;  %v5768_v4 = vcombine.low %v604_v55, %v605_v56 }
  0x57   : > { %s1038_s1 = sadd.s32 32767, %s1037_s18  ;;  %s5748_s18 = sadd.s32 5, %s5468_s12 }
  0x58   : > { %v869_v38 = vrot.slane %v867_v37, 7  ;;  %s1039_s15 = sadd.s32 %s1038_s1, %s1033_s16  ;;  %p1121_p13 = scmp.ge.s32.totalorder %s5748_s18, 0  ;;  %v612_v10 = vshrl.u32 %v5768_v4, 16  ;;  %v615_v44 = vshll.u32 %v5768_v4, 16  ;;  %v882_v47 = vrot.slane %v870_v39, 1 }
  0x59   : > { %s1040_s26 = sand.u32 4294901760, %s1039_s15  ;;  %p1122_p0 = scmp.lt.s32.totalorder %s5748_s18, 16 }
  0x5a   : > { %v872_v41 = vor.u32 %v870_v39, %v869_v38  ;;  %s7682_s26 = smov (%p1035_p10, %s1040_s26), 2143289344  ;;  %p1125_p1 = scmp.gt.s32.totalorder %s5748_s18, 0  ;;  %v614_v16 = vrot.slane %v612_v10, 7  ;;  %v708_v38 = vshrl.u32 %v5575_v43, 16  ;;  %v883_v39 = vor.u32 %v882_v47, %v867_v37 }
  0x5b   : > { %s1043_s16 = sshrl.u32 %s7682_s26, 16  ;;  %s7537_s15 = sshll.u32 %s7684_s22, 3 }
  0x5c   : > { %v876_v53 = vsel %vm5593_vm8, %v872_v41, %v875_v40  ;;  %s1049_s13 = sshll.u32 %s1043_s16, 16  ;;  %p4178_p3 = scmp.lt.s32.totalorder %s5748_s18, 15  ;;  %v617_v61 = vor.u32 %v615_v44, %v614_v16  ;;  %v810_v41 = vor.u32 %v808_v30, %v807_v29  ;;  %v628_v16 = vrot.slane %v615_v44, 1  ;;  %v5208_v29 = vld [vmem:[%s7527_s2 + $0x14] ss:$0 sps:$4 sm:$0xff]  }
  0x5d   : > { %877 = vst [vmem:[#allocation2 + $0x20] sm:$0xff] %v876_v53  ;;  %s1050_s24 = sor.u32 %s1049_s13, %s1043_s16  ;;  %s949_s23 = scalar_lea.vmem %s5540_s27, %s7537_s15 }
  0x5e   : > { %v1051_v54 = vstv %s1050_s24  ;;  %s4161_s0 = scalar_select %p5743_p12, 0, 1  ;;  %v950_v14 = vld [vmem:[%s949_s23] sm:$0xf]  ;;  %v951_v15 = vld [vmem:[%s949_s23 + $0x4] sm:$0xf] }
  0x5f   : > { %v1053_v57 = vmul.bf16 %v1051_v54, %v1047_v49  ;;  %v1054_v58 = vmul.bf16 %v1051_v54, %v1048_v50  ;;  %v1088_v59 = vmul.bf16 %v1086_v51, %v1051_v54  ;;  %v1089_v60 = vmul.bf16 %v1087_v52, %v1051_v54  ;;  %s7582_s24 = smov 12   ;;  %p5799_p4 = pnand %p1122_p0, %p1121_p13 }
  0x60   : > { %s936_s1 = scvt.s32.f32 %s4161_s0  ;;  %s5810_s23 = sadd.s32 6, %s5468_s12  ;;  %v711_v49 = vshll.u32 %v5575_v43, 16  ;;  %v710_v51 = vrot.slane %v708_v38, 7 }
  0x61   : > { %v5759_v1 = vcombine.low %v1053_v57, %v1054_v58  ;;  %v5761_v2 = vcombine.low %v1088_v59, %v1089_v60  ;;  %s1126_s0 = scalar_select %p1125_p1, %s5748_s18, 0  ;;  %v592_v58 = vrot.slane %v580_v22, 1 }
  0x62   : > { %s939_s14 = sshrl.u32 %s936_s1, 16  ;;  %p938_p2 = scmp.ne.f32.partialorder %s936_s1, %s936_s1  ;;  %v713_v57 = vor.u32 %v711_v49, %v710_v51  ;;  %v428_v51 = vld [vmem:[#allocation2 + $0x58] sm:$0x80] }
  0x63   : > { %1072 = vrot.lane.b32.xlu0 %v5759_v1, %s7544_s21  ;;  %v1061_v7 = vshrl.u32 %v5759_v1, 16  ;;  %s940_s19 = sand.u32 1, %s939_s14  ;;  %v1064_v9 = vshll.u32 %v5759_v1, 16  ;;  %s7688_s0 = smov (!%p4178_p3, %s1126_s0), 15  ;;  %v5207_v1 = vld [vmem:[%s7527_s2 + $0xc] sm:$0xff]  }
  0x64   : > { %s941_s26 = sadd.s32 32767, %s940_s19  ;;  %p1218_p5 = scmp.ge.s32.totalorder %s5810_s23, 0  ;;  %4855 = vmatprep.subr.bf16.mxu0 %v5207_v1 }
  0x65   : > { %v1063_v8 = vrot.slane %v1061_v7, 7  ;;  %s942_s16 = sadd.s32 %s941_s26, %s936_s1  ;;  %s7538_s26 = smov 16   ;;  %4856 = vmatpush3.bf16.msra.mxu0 %v5207_v1 }
  0x66   : > { %s943_s13 = sand.u32 4294901760, %s942_s16  ;;  %p1219_p6 = scmp.lt.s32.totalorder %s5810_s23, 16  ;;  %5159 = vmatprep.subr.msk.bf16.mxu0 %vm1672_vm9, %v5208_v29 }
  0x67   : > { %624 = vrot.lane.b32.xlu0 %v5768_v4, %s7582_s24  ;;  %v1066_v13 = vor.u32 %v1064_v9, %v1063_v8  ;;  %s7686_s13 = smov (%p938_p2, %s943_s13), 2143289344  ;;  %p1222_p8 = scmp.gt.s32.totalorder %s5810_s23, 0  ;;  %v593_v8 = vor.u32 %v592_v58, %v577_v21 }
  0x68   : > { %s946_s14 = sshrl.u32 %s7686_s13, 16  ;;  %p4189_p9 = scmp.lt.s32.totalorder %s5810_s23, 15 }
  0x69   : > { %v1070_v5 = vsel %vm5593_vm8, %v1066_v13, %v1069_v11  ;;  %s952_s1 = sshll.u32 %s946_s14, 16  ;;  %p5858_p10 = pnand %p1219_p6, %p1218_p5 }
  0x6a   : > { %1071 = vst [vmem:[#allocation2 + $0x30] sm:$0xff] %v1070_v5  ;;  %s953_s16 = sor.u32 %s952_s1, %s946_s14  ;;  %s7584_s14 = sshll.u32 %s7676_s28, 3 }
  0x6b   : > { %690 = vrot.lane.b32.xlu0 %v689_v12, %s7538_s26  ;;  %v5812_v17 = vstv %s953_s16  ;;  %s4183_s13 = scalar_select %p5799_p4, 0, 1 }
  0x6c   : > { %v956_v18 = vmul.bf16 %v5812_v17, %v950_v14  ;;  %v957_v19 = vmul.bf16 %v5812_v17, %v951_v15  ;;  %s5828_s1 = scalar_lea.vmem %s5514_s20, %s7584_s14  ;;  %s7540_s16 = sshll.u32 %s7688_s0, 3  ;;  %v1076_v14 = vrot.slane %v1064_v9, 1 }
  0x6d   : > { %s1130_s18 = scvt.s32.f32 %s4183_s13  ;;  %s7541_s28 = smov 4   ;;  %v892_v42 = vld [vmem:[%s5828_s1] sm:$0xf]  ;;  %v893_v46 = vld [vmem:[%s5828_s1 + $0x4] sm:$0xf] }
  0x6e   : > { %v4164_v63 = vcombine.low %v956_v18, %v957_v19  ;;  %s4194_s1 = scalar_select %p5858_p10, 0, 1  ;;  %v894_v55 = vmul.bf16 %v892_v42, %v5707_v33  ;;  %v895_v56 = vmul.bf16 %v893_v46, %v5707_v33  ;;  %v1077_v19 = vor.u32 %v1076_v14, %v1061_v7 }
  0x6f   : > { %787 = vrot.lane.b32.xlu0 %v786_v45, %s7538_s26  ;;  %s1133_s19 = sshrl.u32 %s1130_s18, 16  ;;  %p1132_p7 = scmp.ne.f32.partialorder %s1130_s18, %s1130_s18  ;;  %v629_v7 = vor.u32 %v628_v16, %v612_v10 }
  0x70   : > { %975 = vrot.lane.b32.xlu1 %v4164_v63, %s7544_s21  ;;  %v964_v24 = vshrl.u32 %v4164_v63, 16  ;;  %s1134_s15 = sand.u32 1, %s1133_s19  ;;  %v967_v25 = vshll.u32 %v4164_v63, 16  ;;  %s1143_s26 = scalar_lea.vmem %s5540_s27, %s7540_s16  ;;  %v5904_v22 = vcombine.low %v894_v55, %v895_v56 }
  0x71   : > { %s1135_s14 = sadd.s32 32767, %s1134_s15  ;;  %v1144_v34 = vld [vmem:[%s1143_s26] sm:$0xf]  ;;  %v1145_v35 = vld [vmem:[%s1143_s26 + $0x4] sm:$0xf] }
  0x72   : > { %v966_v26 = vrot.slane %v964_v24, 7  ;;  %s1136_s13 = sadd.s32 %s1135_s14, %s1130_s18  ;;  %v979_v28 = vrot.slane %v967_v25, 1  ;;  %v902_v21 = vshrl.u32 %v5904_v22, 16 }
  0x73   : > { %618 = vrot.lane.b32.xlu0 %v617_v61, %s7541_s28  ;;  %s1137_s19 = sand.u32 4294901760, %s1136_s13  ;;  %s7585_s13 = smov 16   ;;  %v905_v61 = vshll.u32 %v5904_v22, 16 }
  0x74   : > { %v969_v31 = vor.u32 %v967_v25, %v966_v26  ;;  %s7690_s19 = smov (%p1132_p7, %s1137_s19), 2143289344  ;;  %v980_v32 = vor.u32 %v979_v28, %v964_v24  ;;  %v904_v44 = vrot.slane %v902_v21, 7  ;;  %v1263_v28 = vld [vmem:[#allocation2 + $0x40] sm:$0xff] }
  0x75   : > { %s1223_s15 = scalar_select %p1222_p8, %s5810_s23, 0 }
  0x76   : > { %v973_v40 = vsel %vm5593_vm8, %v969_v31, %v972_v27  ;;  %s1140_s14 = sshrl.u32 %s7690_s19, 16  ;;  %s5866_s19 = sadd.s32 7, %s5468_s12  ;;  %v907_v26 = vor.u32 %v905_v61, %v904_v44  ;;  %v821_v44 = vrot.slane %v808_v30, 1 }
  0x77   : > { %981 = vrot.lane.b32.xlu0 %v980_v32, %s7585_s13  ;;  %974 = vst [vmem:[#allocation2 + $0x28] sm:$0xff] %v973_v40  ;;  %s1146_s18 = sshll.u32 %s1140_s14, 16  ;;  %s7692_s15 = smov (!%p4189_p9, %s1223_s15), 15 }
  0x78   : > { %s1147_s16 = sor.u32 %s1146_s18, %s1140_s14  ;;  %s7587_s14 = sshll.u32 %s7684_s22, 3 }
  0x79   : > { %v5868_v50 = vstv %s1147_s16  ;;  %s5884_s18 = scalar_lea.vmem %s5514_s20, %s7587_s14  ;;  %s1227_s16 = scvt.s32.f32 %s4194_s1 }
  0x7a   : > { %v1150_v52 = vmul.bf16 %v5868_v50, %v1144_v34  ;;  %v1151_v53 = vmul.bf16 %v5868_v50, %v1145_v35  ;;  %p1315_p11 = scmp.ge.s32.totalorder %s5866_s19, 0  ;;  %p1316_p12 = scmp.lt.s32.totalorder %s5866_s19, 16  ;;  %v989_v13 = vld [vmem:[%s5884_s18] sm:$0xf]  ;;  %v990_v20 = vld [vmem:[%s5884_s18 + $0x4] sm:$0xf] }
  0x7b   : > { %811 = vrot.lane.b32.xlu0 %v810_v41, %s7541_s28  ;;  %s1230_s22 = sshrl.u32 %s1227_s16, 16  ;;  %s7543_s23 = sshll.u32 %s7692_s15, 3  ;;  %v991_v36 = vmul.bf16 %v989_v13, %v5812_v17  ;;  %v992_v37 = vmul.bf16 %v990_v20, %v5812_v17  ;;  %v724_v17 = vrot.slane %v711_v49, 1  ;;  %v1674_v34 = vsel %vm1672_vm9, %v5208_v29, 0  ;;  %v389_v49 = vld [vmem:[#allocation2 + $0x58] sm:$0x1] }
  0x7c   : > { %v5886_v54 = vcombine.low %v1150_v52, %v1151_v53  ;;  %p1229_p13 = scmp.ne.f32.partialorder %s1227_s16, %s1227_s16  ;;  %s1231_s26 = sand.u32 1, %s1230_s22  ;;  %4858 = vmatpush3.bf16.msra.mxu0 %v1674_v34  ;;  %v390_v53 = vsel %vm5472_vm3, 0, %v389_v49  ;;  %v1457_v29 = vld [vmem:[#allocation2 + $0x50] sm:$0xff]  ;;  %vm6332_vm3 = vmand %vm534_vm2, %vm493_vm12 }
  0x7d   : > { %s1232_s1 = sadd.s32 32767, %s1231_s26  ;;  %p1319_p0 = scmp.gt.s32.totalorder %s5866_s19, 0  ;;  %v5977_v24 = vcombine.low %v991_v36, %v992_v37  ;;  %v725_v27 = vor.u32 %v724_v17, %v708_v38  ;;  %391 = vst [vmem:[#allocation2 + $0x58] sm:$0x1] %v390_v53 }
  0x7e   : > { %1169 = vrot.lane.b32.xlu1 %v5886_v54, %s7544_s21  ;;  %v1158_v59 = vshrl.u32 %v5886_v54, 16  ;;  %v1161_v60 = vshll.u32 %v5886_v54, 16  ;;  %s1233_s14 = sadd.s32 %s1232_s1, %s1227_s16  ;;  %p4200_p1 = scmp.lt.s32.totalorder %s5866_s19, 15  ;;  %v429_v54 = vsel %vm5481_vm5, 0, %v428_v51  ;;  %vm1641_vm5 = vcmask 195584  }
  0x7f   : > { %s1234_s22 = sand.u32 4294901760, %s1233_s14  ;;  %s1240_s26 = scalar_lea.vmem %s5540_s27, %s7543_s23  ;;  %v999_v43 = vshrl.u32 %v5977_v24, 16  ;;  %v1002_v41 = vshll.u32 %v5977_v24, 16  ;;  %430 = vst [vmem:[#allocation2 + $0x58] sm:$0x80] %v429_v54 }
  0x80   : > { %v1160_v33 = vrot.slane %v1158_v59, 7  ;;  %s7694_s22 = smov (%p1229_p13, %s1234_s22), 2143289344  ;;  %p5928_p2 = pnand %p1316_p12, %p1315_p11  ;;  %v1241_v15 = vld [vmem:[%s1240_s26] sm:$0xf]  ;;  %v1242_v5 = vld [vmem:[%s1240_s26 + $0x4] sm:$0xf] }
  0x81   : > { %s1320_s1 = scalar_select %p1319_p0, %s5866_s19, 0  ;;  %v1173_v31 = vrot.slane %v1161_v60, 1  ;;  %v1001_v46 = vrot.slane %v999_v43, 7  ;;  %v1015_v49 = vrot.slane %v1002_v41, 1 }
  0x82   : > { %714 = vrot.lane.b32.xlu1 %v713_v57, %s7541_s28  ;;  %v1163_v11 = vor.u32 %v1161_v60, %v1160_v33  ;;  %s1237_s28 = sshrl.u32 %s7694_s22, 16  ;;  %s5938_s22 = sadd.s32 8, %s5468_s12  ;;  %v1099_v60 = vshll.u32 %v5761_v2, 16 }
  0x83   : > { %s1243_s18 = sshll.u32 %s1237_s28, 16  ;;  %s7696_s1 = smov (!%p4200_p1, %s1320_s1), 15  ;;  %v1174_v42 = vor.u32 %v1173_v31, %v1158_v59  ;;  %v1004_v3 = vor.u32 %v1002_v41, %v1001_v46  ;;  %v1096_v59 = vshrl.u32 %v5761_v2, 16 }
  0x84   : > { %v1167_v12 = vsel %vm5593_vm8, %v1163_v11, %v1166_v6  ;;  %s1244_s16 = sor.u32 %s1243_s18, %s1237_s28  ;;  %p1412_p3 = scmp.ge.s32.totalorder %s5938_s22, 0  ;;  %v1112_v53 = vrot.slane %v1099_v60, 1 }
  0x85   : > { %1168 = vst [vmem:[#allocation2 + $0x38] sm:$0xff] %v1167_v12  ;;  %v5940_v45 = vstv %s1244_s16  ;;  %s4205_s28 = scalar_select %p5928_p2, 0, 1  ;;  %v1360_v12 = vld [vmem:[#allocation2 + $0x48] sm:$0xff] }
  0x86   : > { %594 = vrot.lane.b32.xlu1 %v593_v8, %s7585_s13  ;;  %v1247_v9 = vmul.bf16 %v5940_v45, %v1241_v15  ;;  %v1248_v18 = vmul.bf16 %v5940_v45, %v1242_v5  ;;  %p1413_p4 = scmp.lt.s32.totalorder %s5938_s22, 16  ;;  %s7546_s16 = sshll.u32 %s7696_s1, 3  ;;  %v1098_v8 = vrot.slane %v1096_v59, 7 }
  0x87   : > { %s5962_s19 = scvt.s32.f32 %s4205_s28  ;;  %p1416_p6 = scmp.gt.s32.totalorder %s5938_s22, 0 }
  0x88   : > { %v5960_v63 = vcombine.low %v1247_v9, %v1248_v18  ;;  %p4211_p7 = scmp.lt.s32.totalorder %s5938_s22, 15  ;;  %s1337_s11 = scalar_lea.vmem %s5540_s27, %s7546_s16 }
  0x89   : > { %s1327_s18 = sshrl.u32 %s5962_s19, 16  ;;  %p1326_p5 = scmp.ne.f32.partialorder %s5962_s19, %s5962_s19  ;;  %v1338_v38 = vld [vmem:[%s1337_s11] sm:$0xf]  ;;  %v1339_v40 = vld [vmem:[%s1337_s11 + $0x4] sm:$0xf] }
  0x8a   : > { %884 = vrot.lane.b32.xlu1 %v883_v39, %s7585_s13  ;;  %1266 = vrot.lane.b32.xlu0 %v5960_v63, %s7544_s21  ;;  %v1255_v25 = vshrl.u32 %v5960_v63, 16  ;;  %s1328_s28 = sand.u32 1, %s1327_s18  ;;  %v1258_v10 = vshll.u32 %v5960_v63, 16  ;;  %p6019_p8 = pnand %p1413_p4, %p1412_p3  ;;  %v1101_v39 = vor.u32 %v1099_v60, %v1098_v8 }
  0x8b   : > { %s1329_s26 = sadd.s32 32767, %s1328_s28  ;;  %s7547_s28 = smov 20  }
  0x8c   : > { %v1257_v4 = vrot.slane %v1255_v25, 7  ;;  %s1330_s14 = sadd.s32 %s1329_s26, %s5962_s19  ;;  %s7589_s26 = smov 4   ;;  %v1270_v58 = vrot.slane %v1258_v10, 1 }
  0x8d   : > { %s1331_s21 = sand.u32 4294901760, %s1330_s14  ;;  %p1509_p1 = scmp.ge.s32.totalorder %s6102_s9, 0 }
  0x8e   : > { %1078 = vrot.lane.b32.xlu1 %v1077_v19, %s7585_s13  ;;  %630 = vrot.lane.b32.xlu0 %v629_v7, %s7547_s28  ;;  %v1260_v32 = vor.u32 %v1258_v10, %v1257_v4  ;;  %s7698_s21 = smov (%p1326_p5, %s1331_s21), 2143289344  ;;  %v1271_v6 = vor.u32 %v1270_v58, %v1255_v25  ;;  %p1510_p2 = scmp.lt.s32.totalorder %s6102_s9, 16 }
  0x8f   : > { %s1417_s23 = scalar_select %p1416_p6, %s5938_s22, 0 }
  0x90   : > { %v1264_v35 = vsel %vm5593_vm8, %v1260_v32, %v1263_v28  ;;  %s1334_s14 = sshrl.u32 %s7698_s21, 16  ;;  %s6031_s21 = sadd.s32 4294967294, %s5468_s12 }
  0x91   : > { %1265 = vst [vmem:[#allocation2 + $0x40] sm:$0xff] %v1264_v35  ;;  %s1340_s18 = sshll.u32 %s1334_s14, 16  ;;  %s7700_s23 = smov (!%p4211_p7, %s1417_s23), 15 }
  0x92   : > { %908 = vrot.lane.b32.xlu1 %v907_v26, %s7589_s26  ;;  %726 = vrot.lane.b32.xlu0 %v725_v27, %s7547_s28  ;;  %s1341_s11 = sor.u32 %s1340_s18, %s1334_s14  ;;  %s7591_s22 = sshll.u32 %s7688_s0, 3  ;;  %v918_v26 = vrot.slane %v905_v61, 1 }
  0x93   : > { %v6037_v55 = vstv %s1341_s11  ;;  %s4216_s14 = scalar_select %p6019_p8, 0, 1 }
  0x94   : > { %v1344_v56 = vmul.bf16 %v6037_v55, %v1338_v38  ;;  %v1345_v0 = vmul.bf16 %v6037_v55, %v1339_v40  ;;  %s6054_s18 = scalar_lea.vmem %s5514_s20, %s7591_s22  ;;  %p432_p9 = scmp.ge.s32.totalorder %s6031_s21, 0  ;;  %v919_v34 = vor.u32 %v918_v26, %v902_v21 }
  0x95   : > { %s1421_s11 = scvt.s32.f32 %s4216_s14  ;;  %p433_p10 = scmp.lt.s32.totalorder %s6031_s21, 16  ;;  %v1183_v36 = vld [vmem:[%s6054_s18] sm:$0xf]  ;;  %v1184_v37 = vld [vmem:[%s6054_s18 + $0x4] sm:$0xf] }
  0x96   : > { %817 = vrot.lane.b32.xlu1 %v5618_v62, %s7582_s24  ;;  %1175 = vrot.lane.b32.xlu0 %v1174_v42, %s7585_s13  ;;  %v6058_v57 = vcombine.low %v1344_v56, %v1345_v0  ;;  %s7549_s16 = sshll.u32 %s7700_s23, 3  ;;  %s7592_s22 = smov 8   ;;  %v1185_v63 = vmul.bf16 %v1183_v36, %v5868_v50  ;;  %v1186_v17 = vmul.bf16 %v1184_v37, %v5868_v50  ;;  %v479_v36 = vld [vmem:[#allocation2] sm:$0xff] }
  0x97   : > { %s1424_s19 = sshrl.u32 %s1421_s11, 16  ;;  %p1423_p11 = scmp.ne.f32.partialorder %s1421_s11, %s1421_s11  ;;  %v822_v50 = vor.u32 %v821_v44, %v805_v23 }
  0x98   : > { %v1352_v33 = vshrl.u32 %v6058_v57, 16  ;;  %s1425_s0 = sand.u32 1, %s1424_s19  ;;  %v1355_v11 = vshll.u32 %v6058_v57, 16  ;;  %p436_p12 = scmp.gt.s32.totalorder %s6031_s21, 0  ;;  %v6142_v23 = vcombine.low %v1185_v63, %v1186_v17 }
  0x99   : > { %s1426_s14 = sadd.s32 32767, %s1425_s0  ;;  %p4101_p13 = scmp.lt.s32.totalorder %s6031_s21, 15 }
  0x9a   : > { %914 = vrot.lane.b32.xlu1 %v5904_v22, %s7582_s24  ;;  %1005 = vrot.lane.b32.xlu0 %v1004_v3, %s7589_s26  ;;  %v1354_v47 = vrot.slane %v1352_v33, 7  ;;  %s1427_s19 = sadd.s32 %s1426_s14, %s1421_s11  ;;  %s1434_s28 = scalar_lea.vmem %s5540_s27, %s7549_s16  ;;  %v1367_v30 = vrot.slane %v1355_v11, 1  ;;  %v1193_v40 = vshrl.u32 %v6142_v23, 16  ;;  %v1196_v0 = vshll.u32 %v6142_v23, 16 }
  0x9b   : > { %s1428_s0 = sand.u32 4294901760, %s1427_s19  ;;  %p6094_p0 = pnand %p433_p10, %p432_p9  ;;  %v1435_v15 = vld [vmem:[%s1434_s28] sm:$0xf]  ;;  %v1436_v5 = vld [vmem:[%s1434_s28 + $0x4] sm:$0xf] }
  0x9c   : > { %v1357_v20 = vor.u32 %v1355_v11, %v1354_v47  ;;  %s7702_s0 = smov (%p1423_p11, %s1428_s0), 2143289344  ;;  %s7594_s11 = sshll.u32 %s7692_s15, 3  ;;  %v1368_v61 = vor.u32 %v1367_v30, %v1352_v33  ;;  %v1195_v56 = vrot.slane %v1193_v40, 7  ;;  %v1113_v11 = vor.u32 %v1112_v53, %v1096_v59 }
  0x9d   : > { %v685_v52 = vpop.permute.xlu0 %684  ;;  %v6078_v13 = vpop.permute.xlu1 %720  ;;  %s437_s14 = scalar_select %p436_p12, %s6031_s21, 0 }
  0x9e   : > { %687 = vst.msk [vmem:[#allocation2 + $0x10] sm:$0xff] %vm485_vm10, %v685_v52  ;;  %1363 = vrot.lane.b32.xlu1 %v6058_v57, %s7592_s22  ;;  %v1361_v14 = vsel %vm5593_vm8, %v1357_v20, %v1360_v12  ;;  %s1431_s10 = sshrl.u32 %s7702_s0, 16  ;;  %s1279_s16 = scalar_lea.vmem %s5514_s20, %s7594_s11 }
  0x9f   : > { %1362 = vst [vmem:[#allocation2 + $0x48] sm:$0xff] %v1361_v14  ;;  %s1437_s30 = sshll.u32 %s1431_s10, 16  ;;  %s7704_s14 = smov (!%p4101_p13, %s437_s14), 15  ;;  %v1280_v7 = vld [vmem:[%s1279_s16] sm:$0xf] }
  0xa0   : > { %s1438_s29 = sor.u32 %s1437_s30, %s1431_s10  ;;  %v1281_v25 = vld [vmem:[%s1279_s16 + $0x4] sm:$0xf]  ;;  %s7595_s10 = sshll.u32 %s7700_s23, 3  ;;  %v1282_v27 = vmul.bf16 %v1280_v7, %v5940_v45 }
  0xa1   : > { %v6106_v9 = vstv %s1438_s29  ;;  %s4106_s30 = scalar_select %p6094_p0, 0, 1  ;;  %v1283_v28 = vmul.bf16 %v1281_v25, %v5940_v45 }
  0xa2   : > { %1272 = vrot.lane.b32.xlu1 %v1271_v6, %s7585_s13  ;;  %v1441_v18 = vmul.bf16 %v6106_v9, %v1435_v15  ;;  %v1442_v19 = vmul.bf16 %v6106_v9, %v1436_v5  ;;  %s1473_s12 = scalar_lea.vmem %s5514_s20, %s7595_s10  ;;  %s4470_s28 = sshll.u32 %s7704_s14, 3  ;;  %v1016_v6 = vor.u32 %v1015_v49, %v999_v43 }
  0xa3   : > { %s6122_s29 = scvt.s32.f32 %s4106_s30  ;;  %p1513_p4 = scmp.gt.s32.totalorder %s6102_s9, 0  ;;  %v1474_v31 = vld [vmem:[%s1473_s12] sm:$0xf]  ;;  %v1475_v32 = vld [vmem:[%s1473_s12 + $0x4] sm:$0xf]  ;;  %v6163_v42 = vcombine.low %v1282_v27, %v1283_v28 }
  0xa4   : > { %v4219_v1 = vcombine.low %v1441_v18, %v1442_v19  ;;  %p4222_p5 = scmp.lt.s32.totalorder %s6102_s9, 15  ;;  %s7596_s18 = smov 20   ;;  %v1476_v22 = vmul.bf16 %v1474_v31, %v6106_v9  ;;  %v1477_v21 = vmul.bf16 %v1475_v32, %v6106_v9 }
  0xa5   : > { %s444_s15 = sshrl.u32 %s6122_s29, 16  ;;  %p443_p3 = scmp.ne.f32.partialorder %s6122_s29, %s6122_s29  ;;  %v1290_v3 = vshrl.u32 %v6163_v42, 16  ;;  %v1293_v43 = vshll.u32 %v6163_v42, 16 }
  0xa6   : > { %1102 = vrot.lane.b32.xlu1 %v1101_v39, %s7589_s26  ;;  %1460 = vrot.lane.b32.xlu0 %v4219_v1, %s7592_s22  ;;  %v1449_v4 = vshrl.u32 %v4219_v1, 16  ;;  %s445_s16 = sand.u32 1, %s444_s15  ;;  %v1452_v10 = vshll.u32 %v4219_v1, 16  ;;  %s454_s19 = scalar_lea.vmem %s5540_s27, %s4470_s28  ;;  %v6203_v8 = vcombine.low %v1476_v22, %v1477_v21  ;;  %v6219_v39 = vld [vmem:[%s7527_s2] sm:$0xff]  }
  0xa7   : > { %s446_s23 = sadd.s32 32767, %s445_s16  ;;  %p6177_p6 = pnand %p1510_p2, %p1509_p1  ;;  %v455_v51 = vld [vmem:[%s454_s19] sm:$0xf]  ;;  %v456_v52 = vld [vmem:[%s454_s19 + $0x4] sm:$0xf]  ;;  %4879 = vmatprep.subr.bf16.mxu0 %v6219_v39  ;;  %v1306_v53 = vrot.slane %v1293_v43, 1 }
  0xa8   : > { %v1451_v62 = vrot.slane %v1449_v4, 7  ;;  %s447_s21 = sadd.s32 %s446_s23, %s6122_s29  ;;  %v1464_v45 = vrot.slane %v1452_v10, 1  ;;  %s7598_s10 = sshll.u32 %s7696_s1, 3  ;;  %v1484_v14 = vshrl.u32 %v6203_v8, 16  ;;  %v1487_v44 = vshll.u32 %v6203_v8, 16 }
  0xa9   : > { %s448_s0 = sand.u32 4294901760, %s447_s21  ;;  %s1376_s12 = scalar_lea.vmem %s5514_s20, %s7598_s10 }
  0xaa   : > { %1011 = vrot.lane.b32.xlu1 %v5977_v24, %s7582_s24  ;;  %823 = vrot.lane.b32.xlu0 %v822_v50, %s7596_s18  ;;  %v1454_v35 = vor.u32 %v1452_v10, %v1451_v62  ;;  %s7706_s0 = smov (%p443_p3, %s448_s0), 2143289344  ;;  %v1465_v46 = vor.u32 %v1464_v45, %v1449_v4  ;;  %v1377_v57 = vld [vmem:[%s1376_s12] sm:$0xf]  ;;  %v1378_v58 = vld [vmem:[%s1376_s12 + $0x4] sm:$0xf]  ;;  %v1292_v24 = vrot.slane %v1290_v3, 7 }
  0xab   : > { %s1514_s11 = scalar_select %p1513_p4, %s6102_s9, 0  ;;  %v1379_v12 = vmul.bf16 %v1377_v57, %v6037_v55  ;;  %v1380_v20 = vmul.bf16 %v1378_v58, %v6037_v55  ;;  %v1486_v19 = vrot.slane %v1484_v14, 7 }
  0xac   : > { %v782_v16 = vpop.permute.xlu1 %781  ;;  %v1458_v38 = vsel %vm5593_vm8, %v1454_v35, %v1457_v29  ;;  %s451_s30 = sshrl.u32 %s7706_s0, 16 }
  0xad   : > { %784 = vst.msk [vmem:[#allocation2 + $0x18] sm:$0xff] %vm485_vm10, %v782_v16  ;;  %1459 = vst [vmem:[#allocation2 + $0x50] sm:$0xff] %v1458_v38  ;;  %s457_s15 = sshll.u32 %s451_s30, 16  ;;  %s7708_s11 = smov (!%p4222_p5, %s1514_s11), 15  ;;  %v1295_v16 = vor.u32 %v1293_v43, %v1292_v24  ;;  %v6233_v37 = vcombine.low %v1379_v12, %v1380_v20  ;;  %v1489_v1 = vor.u32 %v1487_v44, %v1486_v19  ;;  %v1209_v38 = vrot.slane %v1196_v0, 1 }
  0xae   : > { %1108 = vrot.lane.b32.xlu1 %v5761_v2, %s7582_s24  ;;  %920 = vrot.lane.b32.xlu0 %v919_v34, %s7596_s18  ;;  %s458_s16 = sor.u32 %s457_s15, %s451_s30  ;;  %v1198_v2 = vor.u32 %v1196_v0, %v1195_v56  ;;  %s4514_s19 = sshll.u32 %s7708_s11, 3  ;;  %v1500_v0 = vrot.slane %v1487_v44, 1 }
  0xaf   : > { %v6187_v41 = vstv %s458_s16  ;;  %s4227_s1 = scalar_select %p6177_p6, 0, 1  ;;  %v1387_v17 = vshrl.u32 %v6233_v37, 16  ;;  %v1390_v27 = vshll.u32 %v6233_v37, 16 }
  0xb0   : > { %v461_v33 = vmul.bf16 %v6187_v41, %v455_v51  ;;  %v462_v60 = vmul.bf16 %v6187_v41, %v456_v52  ;;  %s1531_s15 = scalar_lea.vmem %s5540_s27, %s4514_s19  ;;  %s499_s16 = scalar_lea.vmem %s5514_s20, %s4470_s28  ;;  %v1554_v52 = vld [vmem:[#allocation2 + $0x58] sm:$0xff] }
  0xb1   : > { %s6209_s9 = scvt.s32.f32 %s4227_s1  ;;  %v1532_v7 = vld [vmem:[%s1531_s15] sm:$0xf]  ;;  %v1533_v25 = vld [vmem:[%s1531_s15 + $0x4] sm:$0xf]  ;;  %s1570_s28 = scalar_lea.vmem %s5514_s20, %s4514_s19  ;;  %v1389_v10 = vrot.slane %v1387_v17, 7 }
  0xb2   : > { %1369 = vrot.lane.b32.xlu1 %v1368_v61, %s7585_s13  ;;  %v4109_v47 = vcombine.low %v461_v33, %v462_v60  ;;  %v500_v30 = vld [vmem:[%s499_s16] sm:$0xf]  ;;  %v501_v50 = vld [vmem:[%s499_s16 + $0x4] sm:$0xf]  ;;  %v1307_v33 = vor.u32 %v1306_v53, %v1290_v3 }
  0xb3   : > { %s1521_s0 = sshrl.u32 %s6209_s9, 16  ;;  %p1520_p7 = scmp.ne.f32.partialorder %s6209_s9, %s6209_s9  ;;  %v502_v61 = vmul.bf16 %v500_v30, %v6187_v41  ;;  %v503_v29 = vmul.bf16 %v501_v50, %v6187_v41  ;;  %v1571_v31 = vld [vmem:[%s1570_s28] sm:$0xf]  ;;  %v1572_v32 = vld [vmem:[%s1570_s28 + $0x4] sm:$0xf]  ;;  %v1392_v34 = vor.u32 %v1390_v27, %v1389_v10  ;;  %v1210_v41 = vor.u32 %v1209_v38, %v1193_v40 }
  0xb4   : > { %482 = vrot.lane.b32.xlu0 %v4109_v47, %s7592_s22  ;;  %v469_v59 = vshrl.u32 %v4109_v47, 16  ;;  %v472_v55 = vshll.u32 %v4109_v47, 16  ;;  %s1522_s30 = sand.u32 1, %s1521_s0  ;;  %s4099_s28 = sshll.u32 %s5496_s17, 2 }
  0xb5   : > { %s1523_s29 = sadd.s32 32767, %s1522_s30  ;;  %v4111_v22 = vcombine.low %v502_v61, %v503_v29 }
  0xb6   : > { %1466 = vrot.lane.b32.xlu1 %v1465_v46, %s7585_s13  ;;  %v487_v15 = vrot.slane %v472_v55, 1  ;;  %v471_v5 = vrot.slane %v469_v59, 7  ;;  %s1524_s10 = sadd.s32 %s1523_s29, %s6209_s9 }
  0xb7   : > { %s1525_s12 = sand.u32 4294901760, %s1524_s10  ;;  %v510_v56 = vshrl.u32 %v4111_v22, 16 }
  0xb8   : > { %1199 = vrot.lane.b32.xlu0 %v1198_v2, %s7589_s26  ;;  %v488_v9 = vor.u32 %v487_v15, %v469_v59  ;;  %v474_v18 = vor.u32 %v472_v55, %v471_v5  ;;  %s7710_s12 = smov (%p1520_p7, %s1525_s12), 2143289344 }
  0xb9   : > { %s1528_s1 = sshrl.u32 %s7710_s12, 16  ;;  %v512_v60 = vrot.slane %v510_v56, 7 }
  0xba   : > { %v589_v54 = vpop.permute.xlu0 %588  ;;  %1017 = vrot.lane.b32.xlu1 %v1016_v6, %s7596_s18  ;;  %v480_v63 = vsel %vm5593_vm8, %v474_v18, %v479_v36  ;;  %s1534_s27 = sshll.u32 %s1528_s1, 16  ;;  %v513_v6 = vshll.u32 %v4111_v22, 16  ;;  %v790_v18 = vld [vmem:[#allocation2 + $0x18] sm:$0xff] }
  0xbb   : > { %591 = vst.msk [vmem:[#allocation2 + $0x8] sm:$0xff] %vm485_vm10, %v589_v54  ;;  %481 = vst [vmem:[#allocation2] sm:$0xff] %v480_v63  ;;  %s1535_s14 = sor.u32 %s1534_s27, %s1528_s1 }
  0xbc   : > { %1296 = vrot.lane.b32.xlu0 %v1295_v16, %s7589_s26  ;;  %v1536_v4 = vstv %s1535_s14  ;;  %v515_v48 = vor.u32 %v513_v6, %v512_v60 }
  0xbd   : > { %v1538_v28 = vmul.bf16 %v1536_v4, %v1532_v7  ;;  %v1539_v62 = vmul.bf16 %v1536_v4, %v1533_v25  ;;  %v1573_v21 = vmul.bf16 %v1571_v31, %v1536_v4  ;;  %v1574_v46 = vmul.bf16 %v1572_v32, %v1536_v4  ;;  %v693_v7 = vld [vmem:[#allocation2 + $0x10] sm:$0xff] }
  0xbe   : > { %1114 = vrot.lane.b32.xlu1 %v1113_v11, %s7596_s18  ;;  %v1403_v11 = vrot.slane %v1390_v27, 1 }
  0xbf   : > { %v4230_v45 = vcombine.low %v1538_v28, %v1539_v62  ;;  %v4232_v57 = vcombine.low %v1573_v21, %v1574_v46  ;;  %v5210_v46 = vld [vmem:[%s7527_s2 + $0x8] ss:$0 sps:$4 sm:$0xff]  }
  0xc0   : > { %1205 = vrot.lane.b32.xlu0 %v6142_v23, %s7582_s24  ;;  %v1501_v23 = vor.u32 %v1500_v0, %v1484_v14  ;;  %v1404_v20 = vor.u32 %v1403_v11, %v1387_v17  ;;  %v1829_v53 = vsel %vm1672_vm9, %v5210_v46, 0 }
  0xc1   : > { %v1546_v35 = vshrl.u32 %v4230_v45, 16  ;;  %v1549_v51 = vshll.u32 %v4230_v45, 16  ;;  %v1581_v47 = vshrl.u32 %v4232_v57, 16  ;;  %v1584_v12 = vshll.u32 %v4232_v57, 16 }
  0xc2   : > { %489 = vrot.lane.b32.xlu1 %v488_v9, %s7585_s13  ;;  %v597_v4 = vld [vmem:[#allocation2 + $0x8] sm:$0xff] }
  0xc3   : > { %v1548_v49 = vrot.slane %v1546_v35, 7  ;;  %v1583_v3 = vrot.slane %v1581_v47, 7  ;;  %v1597_v2 = vrot.slane %v1584_v12, 1  ;;  %v1561_v14 = vrot.slane %v1549_v51, 1 }
  0xc4   : > { %1302 = vrot.lane.b32.xlu0 %v6163_v42, %s7582_s24 }
  0xc5   : > { %v1551_v54 = vor.u32 %v1549_v51, %v1548_v49  ;;  %v1586_v43 = vor.u32 %v1584_v12, %v1583_v3  ;;  %v1598_v15 = vor.u32 %v1597_v2, %v1581_v47  ;;  %v1562_v36 = vor.u32 %v1561_v14, %v1546_v35 }
  0xc6   : > { %1490 = vrot.lane.b32.xlu1 %v1489_v1, %s7589_s26 }
  0xc7   : > { %v1555_v58 = vsel %vm5593_vm8, %v1551_v54, %v1554_v52  ;;  %v6364_v54 = vld [vmem:[%s7527_s2 + $0x18] sm:$0xff]   ;;  %vm2452_vm8 = vcmask 1047559  }
  0xc8   : > { %v879_v26 = vpop.permute.xlu1 %878  ;;  %1393 = vrot.lane.b32.xlu0 %v1392_v34, %s7589_s26  ;;  %1556 = vst [vmem:[#allocation2 + $0x58] sm:$0xff] %v1555_v58 }
  0xc9   : > { %881 = vst.msk [vmem:[#allocation2 + $0x20] sm:$0xff] %vm485_vm10, %v879_v26 }
  0xca   : > { %1399 = vrot.lane.b32.xlu1 %v6233_v37, %s7582_s24 }
  0xcc   : > { %1211 = vrot.lane.b32.xlu0 %v1210_v41, %s7596_s18 }
  0xce   : > { %1496 = vrot.lane.b32.xlu1 %v6203_v8, %s7582_s24  ;;  %v529_v8 = vrot.slane %v513_v6, 1 }
  0xd0   : > { %1308 = vrot.lane.b32.xlu0 %v1307_v33, %s7596_s18  ;;  %v530_v59 = vor.u32 %v529_v8, %v510_v56  ;;  %v887_v29 = vld [vmem:[#allocation2 + $0x20] sm:$0xff] }
  0xd2   : > { %524 = vrot.lane.b32.xlu1 %v4111_v22, %s7582_s24 }
  0xd4   : > { %516 = vrot.lane.b32.xlu0 %v515_v48, %s7589_s26 }
  0xd5   : > { %v1073_v40 = vpop.permute.xlu0 %1072 }
  0xd6   : > { %1075 = vst.msk [vmem:[#allocation2 + $0x30] sm:$0xff] %vm485_vm10, %v1073_v40  ;;  %1502 = vrot.lane.b32.xlu1 %v1501_v23, %s7596_s18 }
  0xd8   : > { %1405 = vrot.lane.b32.xlu0 %v1404_v20, %s7596_s18  ;;  %v6391_v20 = vld [vmem:[%s7530_s5 + $0x100] sm:$0xff]  }
  0xd9   : > { %v625_v42 = vpop.permute.xlu0 %624  ;;  %5023 = vmatprep.subr.bf16.mxu1 %v6391_v20 }
  0xda   : > { %1557 = vrot.lane.b32.xlu1 %v4230_v45, %s7592_s22 }
  0xdc   : > { %531 = vrot.lane.b32.xlu0 %v530_v59, %s7596_s18  ;;  %v6401_v59 = vld [vmem:[%s7530_s5 + $0x108] sm:$0xff]  }
  0xdd   : > { %v691_v24 = vpop.permute.xlu0 %690  ;;  %v1081_v60 = vld [vmem:[#allocation2 + $0x30] sm:$0xff] }
  0xde   : > { %1587 = vrot.lane.b32.xlu1 %v1586_v43, %s7589_s26  ;;  %v694_v25 = vsel %vm6305_vm14, %v691_v24, %v693_v7  ;;  %v6396_v24 = vld [vmem:[%s7530_s5 + $0xc0] sm:$0xff]  }
  0xdf   : > { %5031 = vmatpush3.bf16.msra.mxu1 %v6396_v24 }
  0xe0   : > { %1563 = vrot.lane.b32.xlu0 %v1562_v36, %s7585_s13  ;;  %5024 = vmatprep.subr.bf16.mxu1 %v6401_v59 }
  0xe1   : > { %v788_v55 = vpop.permute.xlu0 %787 }
  0xe2   : > { %v976_v5 = vpop.permute.xlu1 %975  ;;  %1599 = vrot.lane.b32.xlu1 %v1598_v15, %s7596_s18  ;;  %v791_v44 = vsel %vm6305_vm14, %v788_v55, %v790_v18 }
  0xe3   : > { %978 = vst.msk [vmem:[#allocation2 + $0x28] sm:$0xff] %vm485_vm10, %v976_v5 }
  0xe4   : > { %1593 = vrot.lane.b32.xlu0 %v4232_v57, %s7582_s24 }
  0xe5   : > { %v619_v16 = vpop.permute.xlu0 %618 }
  0xe9   : > { %v6301_v37 = vpop.permute.xlu0 %981 }
  0xea   : > { %v984_v56 = vld [vmem:[#allocation2 + $0x28] sm:$0xff] }
  0xeb   : > { %v985_v0 = vsel %vm6305_vm14, %v6301_v37, %v984_v56 }
  0xed   : > { %v812_v63 = vpop.permute.xlu0 %811 }
  0xee   : > { %v815_v17 = vsel %vm6310_vm15, %v812_v63, %v791_v44 }
  0xef   : > { %816 = vst [vmem:[#allocation2 + $0x18] sm:$0xff] %v815_v17 }
  0xf0   : > { %v1170_v1 = vpop.permute.xlu1 %1169 }
  0xf1   : > { %1172 = vst.msk [vmem:[#allocation2 + $0x38] sm:$0xff] %vm485_vm10, %v1170_v1 }
  0xf4   : > { %v715_v30 = vpop.permute.xlu1 %714 }
  0xf5   : > { %v718_v50 = vsel %vm6310_vm15, %v715_v30, %v694_v25 }
  0xf6   : > { %719 = vst [vmem:[#allocation2 + $0x10] sm:$0xff] %v718_v50 }
  0xf7   : > { %723 = vst.msk [vmem:[#allocation2 + $0x10] sm:$0xff] %vm527_vm0, %v6078_v13  ;;  %v5216_v13 = vld [vmem:[%s7530_s5 + $0xc8] sm:$0xff]  }
  0xf8   : > { %v595_v26 = vpop.permute.xlu1 %594  ;;  %v1178_v37 = vld [vmem:[#allocation2 + $0x38] sm:$0xff]  ;;  %5032 = vmatpush3.bf16.msra.mxu1 %v5216_v13 }
  0xf9   : > { %v598_v10 = vsel %vm6305_vm14, %v595_v26, %v597_v4 }
  0xfa   : > { %v622_v27 = vsel %vm6310_vm15, %v619_v16, %v598_v10 }
  0xfb   : > { %623 = vst [vmem:[#allocation2 + $0x8] sm:$0xff] %v622_v27 }
  0xfc   : > { %v885_v28 = vpop.permute.xlu1 %884  ;;  %627 = vst.msk [vmem:[#allocation2 + $0x8] sm:$0xff] %vm527_vm0, %v625_v42  ;;  %v1267_v62 = vpop.permute.xlu0 %1266 }
  0xfd   : > { %1269 = vst.msk [vmem:[#allocation2 + $0x40] sm:$0xff] %vm485_vm10, %v1267_v62  ;;  %v888_v32 = vsel %vm6305_vm14, %v885_v28, %v887_v29 }
  0xfe   : > { %v729_v22 = vld [vmem:[#allocation2 + $0x10] sm:$0xff] }
 0x100   : > { %v1079_v61 = vpop.permute.xlu1 %1078  ;;  %v631_v45 = vpop.permute.xlu0 %630 }
 0x101   : > { %v1082_v6 = vsel %vm6305_vm14, %v1079_v61, %v1081_v60 }
 0x103   : > { %v633_v31 = vld [vmem:[#allocation2 + $0x8] sm:$0xff] }
 0x104   : > { %v909_v34 = vpop.permute.xlu1 %908  ;;  %v6340_v35 = vsel %vm6332_vm3, %v631_v45, %v633_v31  ;;  %v727_v21 = vpop.permute.xlu0 %726  ;;  %v1275_v25 = vld [vmem:[#allocation2 + $0x40] sm:$0xff] }
 0x105   : > { %v912_v38 = vsel %vm6310_vm15, %v909_v34, %v888_v32  ;;  %635 = vst [vmem:[#allocation2 + $0x8] sm:$0xff] %v6340_v35  ;;  %4859 = vmatprep.mubr.msk.bf16.mxu0 %vm1641_vm5, %v6340_v35  ;;  %v6352_v51 = vsel %vm6332_vm3, %v727_v21, %v729_v22 }
 0x106   : > { %913 = vst [vmem:[#allocation2 + $0x20] sm:$0xff] %v912_v38  ;;  %731 = vst [vmem:[#allocation2 + $0x10] sm:$0xff] %v6352_v51  ;;  %4860 = vmatmul.mubr.msk.bf16.vlgmr.msra.gmra.mrb[0].mxu0 %vm1641_vm5, %v6352_v51 }
 0x107   : > { %4880 = vmatpush3.bf16.msra.mxu0 %v6219_v39 }
 0x108   : > { %v818_v49 = vpop.permute.xlu1 %817  ;;  %v1176_v52 = vpop.permute.xlu0 %1175  ;;  %5160 = vmatprep.subr.msk.bf16.mxu0 %vm1672_vm9, %v5210_v46 }
 0x109   : > { %820 = vst.msk [vmem:[#allocation2 + $0x18] sm:$0xff] %vm527_vm0, %v818_v49  ;;  %v1179_v18 = vsel %vm6305_vm14, %v1176_v52, %v1178_v37 }
 0x10b   : > { %4882 = vmatpush3.bf16.msra.mxu0 %v1829_v53 }
 0x10c   : > { %v915_v41 = vpop.permute.xlu1 %914  ;;  %v1006_v39 = vpop.permute.xlu0 %1005  ;;  %4903 = vmatprep.subr.bf16.mxu0 %v6364_v54 }
 0x10d   : > { %917 = vst.msk [vmem:[#allocation2 + $0x20] sm:$0xff] %vm527_vm0, %v915_v41  ;;  %v1009_v58 = vsel %vm6310_vm15, %v1006_v39, %v985_v0 }
 0x10e   : > { %1010 = vst [vmem:[#allocation2 + $0x28] sm:$0xff] %v1009_v58 }
 0x110   : > { %v1364_v57 = vpop.permute.xlu1 %1363  ;;  %v826_v3 = vld [vmem:[#allocation2 + $0x18] sm:$0xff] }
 0x111   : > { %1366 = vst.msk [vmem:[#allocation2 + $0x48] sm:$0xff] %vm485_vm10, %v1364_v57 }
 0x114   : > { %v1273_v33 = vpop.permute.xlu1 %1272  ;;  %v923_v2 = vld [vmem:[#allocation2 + $0x20] sm:$0xff] }
 0x115   : > { %v1276_v30 = vsel %vm6305_vm14, %v1273_v33, %v1275_v25  ;;  %v2454_v25 = vld [vmem:[#allocation3 + $0x10] sm:$0x80] }
 0x118   : > { %v1103_v23 = vpop.permute.xlu1 %1102  ;;  %v1461_v48 = vpop.permute.xlu0 %1460  ;;  %v1372_v31 = vld [vmem:[#allocation2 + $0x48] sm:$0xff] }
 0x119   : > { %v1106_v40 = vsel %vm6310_vm15, %v1103_v23, %v1082_v6  ;;  %1463 = vst.msk [vmem:[#allocation2 + $0x50] sm:$0xff] %vm485_vm10, %v1461_v48 }
 0x11a   : > { %1107 = vst [vmem:[#allocation2 + $0x30] sm:$0xff] %v1106_v40 }
 0x11c   : > { %v1012_v47 = vpop.permute.xlu1 %1011  ;;  %v824_v42 = vpop.permute.xlu0 %823 }
 0x11d   : > { %1014 = vst.msk [vmem:[#allocation2 + $0x28] sm:$0xff] %vm527_vm0, %v1012_v47  ;;  %v6383_v12 = vsel %vm6332_vm3, %v824_v42, %v826_v3 }
 0x11e   : > { %828 = vst [vmem:[#allocation2 + $0x18] sm:$0xff] %v6383_v12  ;;  %4863 = vmatprep.mubr.msk.bf16.mxu0 %vm1641_vm5, %v6383_v12 }
 0x120   : > { %v1109_v11 = vpop.permute.xlu1 %1108  ;;  %v921_v43 = vpop.permute.xlu0 %920  ;;  %v1469_v10 = vld [vmem:[#allocation2 + $0x50] sm:$0xff] }
 0x121   : > { %1111 = vst.msk [vmem:[#allocation2 + $0x30] sm:$0xff] %vm527_vm0, %v1109_v11  ;;  %v6406_v55 = vsel %vm6332_vm3, %v921_v43, %v923_v2 }
 0x122   : > { %925 = vst [vmem:[#allocation2 + $0x20] sm:$0xff] %v6406_v55  ;;  %4864 = vmatmul.mubr.msk.bf16.gmra.mrb[4].mxu0 %vm1641_vm5, %v6406_v55 }
 0x124   : > { %v1370_v8 = vpop.permute.xlu1 %1369  ;;  %v1020_v5 = vld [vmem:[#allocation2 + $0x28] sm:$0xff] }
 0x125   : > { %v1373_v32 = vsel %vm6305_vm14, %v1370_v8, %v1372_v31  ;;  %v2306_v31 = vld [vmem:[#allocation3 + $0x30] sm:$0x1] }
 0x126   : > { %v483_v15 = vpop.permute.xlu0 %482 }
 0x127   : > { %486 = vst.msk [vmem:[#allocation2] sm:$0xff] %vm485_vm10, %v483_v15 }
 0x128   : > { %v1467_v14 = vpop.permute.xlu1 %1466  ;;  %v1117_v63 = vld [vmem:[#allocation2 + $0x30] sm:$0xff] }
 0x129   : > { %v1470_v27 = vsel %vm6305_vm14, %v1467_v14, %v1469_v10  ;;  %v5212_v14 = vld [vmem:[%s7527_s2 + $0x20] ss:$0 sps:$4 sm:$0xff]   ;;  %v5226_v10 = vld [vmem:[%s7530_s5 + $0xf0] sm:$0xff]  }
 0x12a   : > { %v1200_v44 = vpop.permute.xlu0 %1199  ;;  %v1998_v37 = vsel %vm1672_vm9, %v5212_v14, 0 }
 0x12b   : > { %v1203_v1 = vsel %vm6310_vm15, %v1200_v44, %v1179_v18  ;;  %v2303_v44 = vld [vmem:[#allocation3 + $0x18] sm:$0x1] }
 0x12c   : > { %v1018_v16 = vpop.permute.xlu1 %1017  ;;  %1204 = vst [vmem:[#allocation2 + $0x38] sm:$0xff] %v1203_v1 }
 0x12d   : > { %v6416_v36 = vsel %vm6332_vm3, %v1018_v16, %v1020_v5 }
 0x12e   : > { %1022 = vst [vmem:[#allocation2 + $0x28] sm:$0xff] %v6416_v36  ;;  %4867 = vmatprep.mubr.msk.bf16.mxu0 %vm1641_vm5, %v6416_v36  ;;  %v1297_v50 = vpop.permute.xlu0 %1296  ;;  %v495_v58 = vld [vmem:[#allocation2] sm:$0xff] }
 0x12f   : > { %v1300_v4 = vsel %vm6310_vm15, %v1297_v50, %v1276_v30 }
 0x130   : > { %v1115_v17 = vpop.permute.xlu1 %1114  ;;  %1301 = vst [vmem:[#allocation2 + $0x40] sm:$0xff] %v1300_v4  ;;  %v5225_v4 = vld [vmem:[%s7530_s5 + $0x130] sm:$0xff]  }
 0x131   : > { %v6427_v7 = vsel %vm6332_vm3, %v1115_v17, %v1117_v63  ;;  %v2457_v63 = vld [vmem:[#allocation3 + $0x28] sm:$0x80] }
 0x132   : > { %1119 = vst [vmem:[#allocation2 + $0x30] sm:$0xff] %v6427_v7  ;;  %4868 = vmatmul.mubr.msk.bf16.gmra.mrb[8].mxu0 %vm1641_vm5, %v6427_v7  ;;  %v1206_v28 = vpop.permute.xlu0 %1205 }
 0x133   : > { %1208 = vst.msk [vmem:[#allocation2 + $0x38] sm:$0xff] %vm527_vm0, %v1206_v28  ;;  %v2309_v28 = vld [vmem:[#allocation3 + $0x48] sm:$0x1] }
 0x134   : > { %v490_v26 = vpop.permute.xlu1 %489 }
 0x135   : > { %v496_v33 = vsel %vm6305_vm14, %v490_v26, %v495_v58 }
 0x136   : > { %v1303_v29 = vpop.permute.xlu0 %1302 }
 0x137   : > { %1305 = vst.msk [vmem:[#allocation2 + $0x40] sm:$0xff] %vm527_vm0, %v1303_v29 }
 0x138   : > { %v1491_v62 = vpop.permute.xlu1 %1490 }
 0x139   : > { %v1494_v61 = vsel %vm6310_vm15, %v1491_v62, %v1470_v27  ;;  %v5227_v27 = vld [vmem:[%s7530_s5 + $0x138] sm:$0xff]  }
 0x13a   : > { %1495 = vst [vmem:[#allocation2 + $0x50] sm:$0xff] %v1494_v61  ;;  %v1394_v34 = vpop.permute.xlu0 %1393  ;;  %v1214_v21 = vld [vmem:[#allocation2 + $0x38] sm:$0xff] }
 0x13b   : > { %v1397_v22 = vsel %vm6310_vm15, %v1394_v34, %v1373_v32  ;;  %v2463_v62 = vld [vmem:[#allocation3 + $0x58] sm:$0x80]  ;;  %v2460_v34 = vld [vmem:[#allocation3 + $0x40] sm:$0x80] }
 0x13c   : > { %v1400_v45 = vpop.permute.xlu1 %1399  ;;  %1398 = vst [vmem:[#allocation2 + $0x48] sm:$0xff] %v1397_v22  ;;  %v5228_v61 = vld [vmem:[%s7530_s5 + $0xf8] sm:$0xff]   ;;  %v5229_v22 = vld [vmem:[%s7530_s5 + $0x40] sm:$0xff]  }
 0x13d   : > { %1402 = vst.msk [vmem:[#allocation2 + $0x48] sm:$0xff] %vm527_vm0, %v1400_v45 }
 0x13e   : > { %v1212_v46 = vpop.permute.xlu0 %1211  ;;  %v1311_v53 = vld [vmem:[#allocation2 + $0x40] sm:$0xff] }
 0x13f   : > { %v6450_v52 = vsel %vm6332_vm3, %v1212_v46, %v1214_v21  ;;  %v2315_v21 = vld [vmem:[#allocation3 + $0x78] sm:$0x1]  ;;  %v2469_v46 = vld [vmem:[#allocation3 + $0x88] sm:$0x80] }
 0x140   : > { %v1497_v38 = vpop.permute.xlu1 %1496  ;;  %1216 = vst [vmem:[#allocation2 + $0x38] sm:$0xff] %v6450_v52  ;;  %4871 = vmatprep.mubr.msk.bf16.mxu0 %vm1641_vm5, %v6450_v52 }
 0x141   : > { %1499 = vst.msk [vmem:[#allocation2 + $0x50] sm:$0xff] %vm527_vm0, %v1497_v38 }
 0x142   : > { %v1309_v41 = vpop.permute.xlu0 %1308 }
 0x143   : > { %v1312_v39 = vsel %vm6332_vm3, %v1309_v41, %v1311_v53  ;;  %v2312_v53 = vld [vmem:[#allocation3 + $0x60] sm:$0x1]  ;;  %v2466_v41 = vld [vmem:[#allocation3 + $0x70] sm:$0x80] }
 0x144   : > { %v525_v49 = vpop.permute.xlu1 %524  ;;  %1313 = vst [vmem:[#allocation2 + $0x40] sm:$0xff] %v1312_v39  ;;  %4872 = vmatmul.mubr.msk.bf16.gmra.mrb[12].mxu0 %vm1641_vm5, %v1312_v39  ;;  %v1408_v47 = vld [vmem:[#allocation2 + $0x48] sm:$0xff] }
 0x146   : > { %v517_v60 = vpop.permute.xlu0 %516 }
 0x147   : > { %v522_v23 = vsel %vm6310_vm15, %v517_v60, %v496_v33  ;;  %v2318_v60 = vld [vmem:[#allocation3 + $0x90] sm:$0x1] }
 0x148   : > { %v1505_v56 = vld [vmem:[#allocation2 + $0x50] sm:$0xff]  ;;  %v1503_v0 = vpop.permute.xlu1 %1502  ;;  %523 = vst [vmem:[#allocation2] sm:$0xff] %v522_v23  ;;  %v2472_v23 = vld [vmem:[#allocation3 + $0xa0] sm:$0x80] }
 0x149   : > { %v1506_v57 = vsel %vm6332_vm3, %v1503_v0, %v1505_v56  ;;  %528 = vst.msk [vmem:[#allocation2] sm:$0xff] %vm527_vm0, %v525_v49 }
 0x14a   : > { %1507 = vst [vmem:[#allocation2 + $0x50] sm:$0xff] %v1506_v57  ;;  %v1406_v40 = vpop.permute.xlu0 %1405 }
 0x14b   : > { %v1409_v48 = vsel %vm6332_vm3, %v1406_v40, %v1408_v47  ;;  %v6608_v47 = vld [vmem:[%s7530_s5 + $0x140] sm:$0xff]  }
 0x14c   : > { %v1558_v6 = vpop.permute.xlu1 %1557  ;;  %1410 = vst [vmem:[#allocation2 + $0x48] sm:$0xff] %v1409_v48  ;;  %4875 = vmatprep.mubr.msk.bf16.mxu0 %vm1641_vm5, %v1409_v48 }
 0x14d   : > { %1560 = vst.msk [vmem:[#allocation2 + $0x58] sm:$0xff] %vm485_vm10, %v1558_v6  ;;  %4876 = vmatmul.mubr.msk.bf16.gmra.mrb[16].mxu0 %vm1641_vm5, %v1506_v57  ;;  %vm6556_vm10 = vmand %vm2452_vm8, %vm393_vm4 }
 0x14e   : > { %v532_v11 = vpop.permute.xlu0 %531  ;;  %v2458_v30 = vsel %vm6556_vm10, 0, %v2457_v63  ;;  %v2455_v26 = vsel %vm6556_vm10, 0, %v2454_v25  ;;  %v2464_v45 = vsel %vm6556_vm10, 0, %v2463_v62  ;;  %v2461_v38 = vsel %vm6556_vm10, 0, %v2460_v34 }
 0x14f   : > { %2459 = vst [vmem:[#allocation3 + $0x28] sm:$0x80] %v2458_v30  ;;  %2456 = vst [vmem:[#allocation3 + $0x10] sm:$0x80] %v2455_v26  ;;  %v2467_v0 = vsel %vm6556_vm10, 0, %v2466_v41  ;;  %v2473_v40 = vsel %vm6556_vm10, 0, %v2472_v23 }
 0x150   : > { %v536_v42 = vld [vmem:[#allocation2] sm:$0xff]  ;;  %v1588_v43 = vpop.permute.xlu1 %1587  ;;  %2465 = vst [vmem:[#allocation3 + $0x58] sm:$0x80] %v2464_v45  ;;  %2462 = vst [vmem:[#allocation3 + $0x40] sm:$0x80] %v2461_v38  ;;  %v5255_v23 = vld [vmem:[%s7530_s5 + $0x90] sm:$0xff]  }
 0x151   : > { %v537_v8 = vsel %vm6332_vm3, %v532_v11, %v536_v42  ;;  %2468 = vst [vmem:[#allocation3 + $0x70] sm:$0x80] %v2467_v0  ;;  %2474 = vst [vmem:[#allocation3 + $0xa0] sm:$0x80] %v2473_v40  ;;  %v2481_v42 = vld [vmem:[#allocation3 + $0xe8] sm:$0x80] }
 0x152   : > { %538 = vst [vmem:[#allocation2] sm:$0xff] %v537_v8  ;;  %4883 = vmatprep.mubr.msk.bf16.mxu0 %vm1641_vm5, %v537_v8  ;;  %v1564_v2 = vpop.permute.xlu0 %1563  ;;  %v2482_v8 = vsel %vm6556_vm10, 0, %v2481_v42  ;;  %v5257_v0 = vld [vmem:[%s7530_s5 + $0xa0] sm:$0xff]  }
 0x153   : > { %2483 = vst [vmem:[#allocation3 + $0xe8] sm:$0x80] %v2482_v8 }
 0x154   : > { %v1566_v3 = vld [vmem:[#allocation2 + $0x58] sm:$0xff]  ;;  %v1600_v9 = vpop.permute.xlu1 %1599 }
 0x155   : > { %v1567_v15 = vsel %vm6305_vm14, %v1564_v2, %v1566_v3  ;;  %4884 = vmatmul.mubr.msk.bf16.vlgmr.msra.gmra.mrb[0].mxu0 %vm1641_vm5, %v6340_v35  ;;  %v2324_v3 = vld [vmem:[#allocation3 + $0xc0] sm:$0x1]  ;;  %v2478_v2 = vld [vmem:[#allocation3 + $0xd0] sm:$0x80] }
 0x156   : > { %v1591_v5 = vsel %vm6310_vm15, %v1588_v43, %v1567_v15  ;;  %4904 = vmatpush3.bf16.msra.mxu0 %v6364_v54  ;;  %4887 = vmatprep.mubr.msk.bf16.mxu0 %vm1641_vm5, %v6352_v51  ;;  %v1594_v16 = vpop.permute.xlu0 %1593  ;;  %v5218_v54 = vld [vmem:[%s7530_s5 + $0xd0] sm:$0xff]   ;;  %v2208_v15 = vstv %s5562_s25  ;;  %s7465_s25 = scalar_lea.vmem %s7533_s8, %s4099_s28 }
 0x157   : > { %1592 = vst [vmem:[#allocation2 + $0x58] sm:$0xff] %v1591_v5  ;;  %5161 = vmatprep.subr.msk.bf16.mxu0 %vm1672_vm9, %v5212_v14  ;;  %vm6549_vm9 = vmand %vm2298_vm6, %vm354_vm1  ;;  %v2479_v14 = vsel %vm6556_vm10, 0, %v2478_v2  ;;  %v2209_v5 = vadd.s32 1, %v2208_v15  ;;  %vm2218_vm11 = vcmp.ge.s32.totalorder %v2208_v15, 0  ;;  %vm2228_vm13 = vcmp.lt.s32.totalorder %v2208_v15, 16  ;;  %v5251_v2 = vld [vmem:[%s7530_s5 + $0x170] sm:$0xff]  }
 0x158   : > { %1596 = vst.msk [vmem:[#allocation2 + $0x58] sm:$0xff] %vm527_vm0, %v1594_v16  ;;  %v2304_v17 = vsel %vm6549_vm9, 0, %v2303_v44  ;;  %v2310_v29 = vsel %vm6549_vm9, 0, %v2309_v28  ;;  %v2307_v32 = vsel %vm6549_vm9, 0, %v2306_v31  ;;  %v2316_v49 = vsel %vm6549_vm9, 0, %v2315_v21  ;;  %vm6642_vm15 = vmand %vm2218_vm11, %vm2228_vm13 }
 0x159   : > { %2305 = vst [vmem:[#allocation3 + $0x18] sm:$0x1] %v2304_v17  ;;  %2311 = vst [vmem:[#allocation3 + $0x48] sm:$0x1] %v2310_v29  ;;  %v2313_v56 = vsel %vm6549_vm9, 0, %v2312_v53  ;;  %v2319_v6 = vsel %vm6549_vm9, 0, %v2318_v60 }
 0x15a   : > { %4906 = vmatpush3.bf16.msra.mxu0 %v1998_v37  ;;  %2308 = vst [vmem:[#allocation3 + $0x30] sm:$0x1] %v2307_v32  ;;  %2317 = vst [vmem:[#allocation3 + $0x78] sm:$0x1] %v2316_v49  ;;  %v2325_v43 = vsel %vm6549_vm9, 0, %v2324_v3  ;;  %vm2219_vm1 = vcmp.ge.s32.totalorder %v2209_v5, 0 }
 0x15b   : > { %4615 = vmatprep.subr.bf16.mxu0 %v6391_v20  ;;  %v5220_v20 = vld [vmem:[%s7530_s5 + $0xd8] sm:$0xff]   ;;  %2314 = vst [vmem:[#allocation3 + $0x60] sm:$0x1] %v2313_v56  ;;  %2320 = vst [vmem:[#allocation3 + $0x90] sm:$0x1] %v2319_v6  ;;  %vm2229_vm4 = vcmp.lt.s32.totalorder %v2209_v5, 16 }
 0x15c   : > { %2326 = vst [vmem:[#allocation3 + $0xc0] sm:$0x1] %v2325_v43  ;;  %2480 = vst [vmem:[#allocation3 + $0xd0] sm:$0x80] %v2479_v14  ;;  %v6623_v16 = vld [vmem:[%s7528_s3] ss:$0 sm:$0xff] }
 0x15d   : > { %4888 = vmatmul.mubr.msk.bf16.gmra.mrb[4].mxu0 %vm1641_vm5, %v6383_v12  ;;  %vm6634_vm14 = vmand %vm2219_vm1, %vm2229_vm4  ;;  %v6647_v1 = vadd.s32 5, %v2208_v15  ;;  %vm2410_vm6 = vcmask 1047552   ;;  %v6667_v29 = vadd.s32 7, %v2208_v15  ;;  %v6669_v45 = vadd.s32 6, %v2208_v15  ;;  %v2518_v14 = vld [vmem:[#allocation3 + $0x28] sm:$0xff] }
 0x15e   : > { %4891 = vmatprep.mubr.msk.bf16.mxu0 %vm1641_vm5, %v6406_v55  ;;  %v6682_v53 = vadd.s32 8, %v2208_v15  ;;  %vm7554_vm11 = vmpackc.low %vm6634_vm14, %vm6634_vm14 }
 0x15f   : > { %v1602_v19 = vld [vmem:[#allocation2 + $0x58] sm:$0xff]  ;;  %vm2223_vm8 = vcmp.ge.s32.totalorder %v6647_v1, 0 }
 0x160   : > { %v1603_v35 = vsel %vm6332_vm3, %v1600_v9, %v1602_v19  ;;  %v6628_v9 = vld [vmem:[%s7529_s4] ss:$0 sm:$0xff]  ;;  %v2415_v43 = vld [vmem:[#allocation3 + $0x18] sm:$0xff] }
 0x161   : > { %1604 = vst [vmem:[#allocation2 + $0x58] sm:$0xff] %v1603_v35 }
 0x165   : > { %4892 = vmatmul.mubr.msk.bf16.gmra.mrb[8].mxu0 %vm1641_vm5, %v6416_v36 }
 0x166   : > { %4895 = vmatprep.mubr.msk.bf16.mxu0 %vm1641_vm5, %v6427_v7 }
 0x16d   : > { %4896 = vmatmul.mubr.msk.bf16.gmra.mrb[12].mxu0 %vm1641_vm5, %v6450_v52 }
 0x16e   : > { %4899 = vmatprep.mubr.msk.bf16.mxu0 %vm1641_vm5, %v1312_v39 }
 0x175   : > { %4900 = vmatmul.mubr.msk.bf16.gmra.mrb[16].mxu0 %vm1641_vm5, %v1409_v48 }
 0x176   : > { %4907 = vmatprep.mubr.msk.bf16.mxu0 %vm1641_vm5, %v6352_v51  ;;  %v5217_v51 = vld [vmem:[%s7530_s5 + $0x110] sm:$0xff]  }
 0x177   : > { %5025 = vmatprep.subr.bf16.mxu1 %v5217_v51 }
 0x178   : > { %5033 = vmatpush3.bf16.msra.mxu1 %v5218_v54 }
 0x17d   : > { %4908 = vmatmul.mubr.msk.bf16.vlgmr.msra.gmra.mrb[0].mxu0 %vm1641_vm5, %v6383_v12  ;;  %v5219_v12 = vld [vmem:[%s7530_s5 + $0x118] sm:$0xff]  }
 0x17e   : > { %4911 = vmatprep.mubr.msk.bf16.mxu0 %vm1641_vm5, %v6406_v55  ;;  %4616 = vmatpush3.bf16.msra.mxu0 %v6396_v24  ;;  %v5221_v24 = vld [vmem:[%s7530_s5 + $0x120] sm:$0xff]   ;;  %v5223_v55 = vld [vmem:[%s7530_s5 + $0x128] sm:$0xff]  }
 0x17f   : > { %4617 = vmatprep.subr.bf16.mxu0 %v6401_v59  ;;  %5026 = vmatprep.subr.bf16.mxu1 %v5219_v12  ;;  %v5222_v59 = vld [vmem:[%s7530_s5 + $0xe0] sm:$0xff]  }
 0x180   : > { %5034 = vmatpush3.bf16.msra.mxu1 %v5220_v20 }
 0x181   : > { %5027 = vmatprep.subr.bf16.mxu1 %v5221_v24 }
 0x182   : > { %4618 = vmatpush3.bf16.msra.mxu0 %v5216_v13 }
 0x183   : > { %4619 = vmatprep.subr.bf16.mxu0 %v5217_v51 }
 0x184   : > { %5035 = vmatpush3.bf16.msra.mxu1 %v5222_v59 }
 0x185   : > { %4912 = vmatmul.mubr.msk.bf16.gmra.mrb[4].mxu0 %vm1641_vm5, %v6416_v36  ;;  %v5224_v36 = vld [vmem:[%s7530_s5 + $0xe8] sm:$0xff]   ;;  %5028 = vmatprep.subr.bf16.mxu1 %v5223_v55 }
 0x186   : > { %4915 = vmatprep.mubr.msk.bf16.mxu0 %vm1641_vm5, %v6427_v7  ;;  %4620 = vmatpush3.bf16.msra.mxu0 %v5218_v54  ;;  %v2300_v7 = vld [vmem:[#allocation3] sm:$0x1]  ;;  %v2211_v54 = vadd.s32 3, %v2208_v15 }
 0x187   : > { %4621 = vmatprep.subr.bf16.mxu0 %v5219_v12  ;;  %v2301_v50 = vsel %vm6549_vm9, 0, %v2300_v7 }
 0x188   : > { %5036 = vmatpush3.bf16.msra.mxu1 %v5224_v36  ;;  %2302 = vst [vmem:[#allocation3] sm:$0x1] %v2301_v50  ;;  %vm2221_vm0 = vcmp.ge.s32.totalorder %v2211_v54, 0  ;;  %vm2231_vm2 = vcmp.lt.s32.totalorder %v2211_v54, 16  ;;  %v2515_v54 = vld [vmem:[#allocation3 + $0x10] sm:$0xff] }
 0x189   : > { %5029 = vmatprep.subr.bf16.mxu1 %v5225_v4 }
 0x18a   : > { %4622 = vmatpush3.bf16.msra.mxu0 %v5220_v20 }
 0x18b   : > { %4623 = vmatprep.subr.bf16.mxu0 %v5221_v24 }
 0x18c   : > { %5037 = vmatpush3.bf16.msra.mxu1 %v5226_v10 }
 0x18d   : > { %4916 = vmatmul.mubr.msk.bf16.gmra.mrb[8].mxu0 %vm1641_vm5, %v6450_v52  ;;  %5030 = vmatprep.subr.bf16.mxu1 %v5227_v27  ;;  %v2470_v52 = vsel %vm6556_vm10, 0, %v2469_v46 }
 0x18e   : > { %4919 = vmatprep.mubr.msk.bf16.mxu0 %vm1641_vm5, %v1312_v39  ;;  %4624 = vmatpush3.bf16.msra.mxu0 %v5222_v59  ;;  %2471 = vst [vmem:[#allocation3 + $0x88] sm:$0x80] %v2470_v52  ;;  %v2321_v39 = vld [vmem:[#allocation3 + $0xa8] sm:$0x1]  ;;  %v2210_v59 = vadd.s32 2, %v2208_v15 }
 0x18f   : > { %4625 = vmatprep.subr.bf16.mxu0 %v5223_v55  ;;  %v2322_v58 = vsel %vm6549_vm9, 0, %v2321_v39  ;;  %v5253_v55 = vld [vmem:[%s7530_s5 + $0x80] sm:$0xff]  }
 0x190   : > { %5038 = vmatpush3.bf16.msra.mxu1 %v5228_v61  ;;  %2323 = vst [vmem:[#allocation3 + $0xa8] sm:$0x1] %v2322_v58  ;;  %vm2220_vm3 = vcmp.ge.s32.totalorder %v2210_v59, 0 }
 0x191   : > { %4927 = vmatprep.subr.bf16.mxu1 %v6608_v47 }
 0x192   : > { %4626 = vmatpush3.bf16.msra.mxu0 %v5224_v36 }
 0x193   : > { %4627 = vmatprep.subr.bf16.mxu0 %v5225_v4 }
 0x195   : > { %4920 = vmatmul.mubr.msk.bf16.gmra.mrb[12].mxu0 %vm1641_vm5, %v1409_v48  ;;  %v2327_v48 = vld [vmem:[#allocation3 + $0xd8] sm:$0x1] }
 0x196   : > { %4923 = vmatprep.mubr.msk.bf16.mxu0 %vm1641_vm5, %v1506_v57  ;;  %4628 = vmatpush3.bf16.msra.mxu0 %v5226_v10  ;;  %v2475_v57 = vld [vmem:[#allocation3 + $0xb8] sm:$0x80]  ;;  %v2328_v11 = vsel %vm6549_vm9, 0, %v2327_v48  ;;  %vm2233_vm9 = vcmp.lt.s32.totalorder %v6647_v1, 16 }
 0x197   : > { %4629 = vmatprep.subr.bf16.mxu0 %v5227_v27  ;;  %v2476_v33 = vsel %vm6556_vm10, 0, %v2475_v57  ;;  %2329 = vst [vmem:[#allocation3 + $0xd8] sm:$0x1] %v2328_v11  ;;  %v6660_v27 = vadd.s32 4, %v2208_v15  ;;  %vm6686_vm10 = vmand %vm2221_vm0, %vm2231_vm2 }
 0x198   : > { %2477 = vst [vmem:[#allocation3 + $0xb8] sm:$0x80] %v2476_v33  ;;  %vm6719_vm0 = vmand %vm2410_vm6, %vm477_vm7  ;;  %vm2225_vm7 = vcmp.ge.s32.totalorder %v6667_v29, 0 }
 0x199   : > { %vm2222_vm1 = vcmp.ge.s32.totalorder %v6660_v27, 0  ;;  %vm2232_vm4 = vcmp.lt.s32.totalorder %v6660_v27, 16  ;;  %vm6727_vm2 = vmand %vm2410_vm6, %vm493_vm12  ;;  %vm2235_vm12 = vcmp.lt.s32.totalorder %v6667_v29, 16  ;;  %vm2234_vm6 = vcmp.lt.s32.totalorder %v6669_v45, 16 }
 0x19a   : > { %4630 = vmatpush3.bf16.msra.mxu0 %v5228_v61 }
 0x19b   : > { %4695 = vmatprep.subr.bf16.mxu0 %v5229_v22  ;;  %v6676_v22 = vadd.s32 9, %v2208_v15 }
 0x19d   : > { %4924 = vmatmul.mubr.msk.bf16.gmra.mrb[16].mxu0 %vm1641_vm5, %v1603_v35  ;;  %vm2230_vm5 = vcmp.lt.s32.totalorder %v2210_v59, 16  ;;  %v5230_v59 = vld [vmem:[%s7530_s5] sm:$0xff]  }
 0x19e   : > { %vm6710_vm13 = vmand %vm2220_vm3, %vm2230_vm5  ;;  %vm2224_vm5 = vcmp.ge.s32.totalorder %v6669_v45, 0  ;;  %v2439_v63 = vld [vmem:[#allocation3 + $0xd8] sm:$0xff] }
 0x19f   : > { %vm6778_vm3 = vmand %vm2223_vm8, %vm2233_vm9 }
 0x1a0   : > { %vm7553_vm8 = vmpackc.low %vm6710_vm13, %vm6710_vm13 }
 0x1a1   : > { %vm6817_vm9 = vmand %vm2222_vm1, %vm2232_vm4  ;;  %vm2236_vm1 = vcmp.lt.s32.totalorder %v6682_v53, 16 }
 0x1a2   : > { %vm7557_vm4 = vmpackc.low %vm6778_vm3, %vm6778_vm3 }
 0x250   : > { %v4909_v37 = vpop.f32.mrb[0].mxu0 }
 0x251   : > { %v2142_v19 = vmul.f32 %v4909_v37, %v6623_v16  ;;  %v2034_v35 = vpop.f32.mrb[1].mxu0 }
 0x252   : > { %v2140_v13 = vmul.f32 %v6623_v16, %v2034_v35  ;;  %v4910_v51 = vpop.f32.mrb[2].mxu0 }
 0x253   : > { %v2169_v12 = vadd.f32 %v6628_v9, %v2142_v19  ;;  %v2143_v20 = vmul.f32 %v4910_v51, %v6623_v16  ;;  %v2037_v24 = vpop.f32.mrb[3].mxu0  ;;  %v2412_v51 = vld [vmem:[#allocation3] sm:$0xff] }
 0x254   : > { %v6639_v36 = vadd.f32 %v6628_v9, %v2140_v13  ;;  %v2141_v18 = vmul.f32 %v6623_v16, %v2037_v24 }
 0x255   : > { %v2189_v44 = vmax.f32 %v2169_v12, 0.0  ;;  %v2170_v17 = vadd.f32 %v6628_v9, %v2143_v20 }
 0x256   : > { %v7556_v7 = vmax.f32 %v6639_v36, 0.0  ;;  %v6651_v25 = vadd.f32 %v6628_v9, %v2141_v18 }
 0x257   : > { %v2270_v30 = vsel %vm6634_vm14, %v2189_v44, 0.0  ;;  %v2190_v50 = vmax.f32 %v2170_v17, 0.0 }
 0x258   : > { %v2268_v26 = vsel %vm6642_vm15, %v7556_v7, 0.0  ;;  %v7555_v4 = vmax.f32 %v6651_v25, 0.0  ;;  %v4913_v10 = vpop.f32.mrb[4].mxu0 }
 0x259   : > { %v2271_v28 = vsel %vm6634_vm14, %v2190_v50, 0.0  ;;  %v2146_v62 = vmul.f32 %v4913_v10, %v6623_v16  ;;  %v2050_v61 = vpop.f32.mrb[5].mxu0  ;;  %v6699_v58 = vpack.c.bf16 %v2190_v50, %v2189_v44 }
 0x25a   : > { %v2289_v31 = vpack.c.bf16 %v2271_v28, %v2270_v30  ;;  %v2269_v32 = vsel %vm6642_vm15, %v7555_v4, 0.0  ;;  %v2144_v34 = vmul.f32 %v6623_v16, %v2050_v61  ;;  %v4914_v38 = vpop.f32.mrb[6].mxu0 }
 0x25b   : > { %v2288_v21 = vpack.c.bf16 %v2269_v32, %v2268_v26  ;;  %v6679_v46 = vadd.f32 %v6628_v9, %v2146_v62  ;;  %v2147_v49 = vmul.f32 %v4914_v38, %v6623_v16  ;;  %v2053_v52 = vpop.f32.mrb[7].mxu0  ;;  %5287 = vmatprep.mubr.msk.bf16.mxu0 %vm7554_vm11, %v6699_v58  ;;  %v5231_v26 = vld [vmem:[%s7530_s5 + $0x48] sm:$0xff]   ;;  %vm2226_vm11 = vcmp.ge.s32.totalorder %v6682_v53, 0 }
 0x25c   : > { %v2338_v41 = vshrl.u32 %v2289_v31, 16  ;;  %v2341_v56 = vshll.u32 %v2289_v31, 16  ;;  %v6691_v39 = vadd.f32 %v6628_v9, %v2144_v34  ;;  %v2145_v57 = vmul.f32 %v6623_v16, %v2053_v52 }
 0x25d   : > { %v2331_v33 = vshrl.u32 %v2288_v21, 16  ;;  %v2334_v60 = vshll.u32 %v2288_v21, 16  ;;  %v2193_v6 = vmax.f32 %v6679_v46, 0.0  ;;  %v6715_v40 = vadd.f32 %v6628_v9, %v2147_v49  ;;  %v5236_v46 = vld [vmem:[%s7530_s5 + $0x18] sm:$0xff]  }
 0x25e   : > { %v2340_v48 = vrot.slane %v2338_v41, 7  ;;  %v2486_v42 = vrot.slane %v2341_v56, 1  ;;  %v2191_v3 = vmax.f32 %v6691_v39, 0.0  ;;  %v2172_v8 = vadd.f32 %v6628_v9, %v2145_v57 }
 0x25f   : > { %v2333_v15 = vrot.slane %v2331_v33, 7  ;;  %v2484_v5 = vrot.slane %v2334_v60, 1  ;;  %v2274_v37 = vsel %vm6686_vm10, %v2193_v6, 0.0  ;;  %v2194_v19 = vmax.f32 %v6715_v40, 0.0  ;;  %v2427_v40 = vld [vmem:[#allocation3 + $0x78] sm:$0xff] }
 0x260   : > { %v2343_v35 = vor.u32 %v2341_v56, %v2340_v48  ;;  %v2487_v13 = vor.u32 %v2486_v42, %v2338_v41  ;;  %v2272_v12 = vsel %vm6710_vm13, %v2191_v3, 0.0  ;;  %v2192_v20 = vmax.f32 %v2172_v8, 0.0  ;;  %v4917_v24 = vpop.f32.mrb[8].mxu0  ;;  %v5261_v56 = vld [vmem:[%s7530_s5 + $0x1c0] sm:$0xff]  }
 0x261   : > { %v2336_v18 = vor.u32 %v2334_v60, %v2333_v15  ;;  %v2485_v44 = vor.u32 %v2484_v5, %v2331_v33  ;;  %v2275_v17 = vsel %vm6686_vm10, %v2194_v19, 0.0  ;;  %v2150_v30 = vmul.f32 %v4917_v24, %v6623_v16  ;;  %v2066_v50 = vpop.f32.mrb[9].mxu0  ;;  %v5232_v33 = vld [vmem:[%s7530_s5 + $0x8] sm:$0xff]  }
 0x262   : > { %v6751_v10 = vsel %vm6719_vm0, %v2343_v35, %v2415_v43  ;;  %v6755_v28 = vsel %vm6727_vm2, %v2487_v13, %v2518_v14  ;;  %v2291_v62 = vpack.c.bf16 %v2275_v17, %v2274_v37  ;;  %v2273_v61 = vsel %vm6710_vm13, %v2192_v20, 0.0  ;;  %v4918_v31 = vpop.f32.mrb[10].mxu0  ;;  %v5233_v43 = vld [vmem:[%s7530_s5 + $0x50] sm:$0xff]   ;;  %v2421_v37 = vld [vmem:[#allocation3 + $0x48] sm:$0xff]  ;;  %v2524_v35 = vld [vmem:[#allocation3 + $0x58] sm:$0xff] }
 0x263   : > { %2417 = vst [vmem:[#allocation3 + $0x18] sm:$0xff] %v6751_v10  ;;  %2520 = vst [vmem:[#allocation3 + $0x28] sm:$0xff] %v6755_v28  ;;  %v6765_v32 = vsel %vm6719_vm0, %v2336_v18, %v2412_v51  ;;  %v2516_v34 = vsel %vm6727_vm2, %v2485_v44, %v2515_v54  ;;  %v2290_v38 = vpack.c.bf16 %v2273_v61, %v2272_v12  ;;  %v2069_v49 = vpop.f32.mrb[11].mxu0  ;;  %2868 = vmatmul.mubr.bf16.vlgmr.msra.gmra.mrb[20].mxu0 %v6751_v10  ;;  %v2418_v18 = vld [vmem:[#allocation3 + $0x30] sm:$0xff]  ;;  %v2521_v44 = vld [vmem:[#allocation3 + $0x40] sm:$0xff] }
 0x264   : > { %v6770_v21 = vadd.f32 %v6628_v9, %v2150_v30  ;;  %2414 = vst [vmem:[#allocation3] sm:$0xff] %v6765_v32  ;;  %2517 = vst [vmem:[#allocation3 + $0x10] sm:$0xff] %v2516_v34  ;;  %v2352_v52 = vshrl.u32 %v2291_v62, 16  ;;  %v2355_v41 = vshll.u32 %v2291_v62, 16  ;;  %v2148_v39 = vmul.f32 %v6623_v16, %v2066_v50  ;;  %4696 = vmatpush3.bf16.msra.mxu0 %v5230_v59 }
 0x265   : > { %2445 = vst [vmem:[#allocation3 + $0x50] sm:$0xff] %v2291_v62  ;;  %v2151_v57 = vmul.f32 %v4918_v31, %v6623_v16  ;;  %v2345_v60 = vshrl.u32 %v2290_v38, 16  ;;  %v2348_v48 = vshll.u32 %v2290_v38, 16  ;;  %2444 = vst [vmem:[#allocation3 + $0x38] sm:$0xff] %v2290_v38  ;;  %v2149_v42 = vmul.f32 %v6623_v16, %v2069_v49  ;;  %4697 = vmatprep.subr.bf16.mxu0 %v5231_v26 }
 0x266   : > { %v2197_v1 = vmax.f32 %v6770_v21, 0.0  ;;  %v6794_v8 = vpack.c.bf16 %v2192_v20, %v2191_v3  ;;  %v2354_v14 = vrot.slane %v2352_v52, 7  ;;  %v2490_v15 = vrot.slane %v2355_v41, 1 }
 0x267   : > { %v6806_v5 = vadd.f32 %v6628_v9, %v2148_v39  ;;  %v2178_v3 = vadd.f32 %v6628_v9, %v2151_v57  ;;  %v2347_v13 = vrot.slane %v2345_v60, 7  ;;  %v2488_v51 = vrot.slane %v2348_v48, 1  ;;  %v5234_v39 = vld [vmem:[%s7530_s5 + $0x10] sm:$0xff]  }
 0x268   : > { %5290 = vmatprep.mubr.msk.bf16.mxu0 %vm7553_vm8, %v6794_v8  ;;  %v2278_v54 = vsel %vm6778_vm3, %v2197_v1, 0.0  ;;  %v6822_v20 = vadd.f32 %v6628_v9, %v2149_v42  ;;  %v2357_v24 = vor.u32 %v2355_v41, %v2354_v14  ;;  %v2491_v59 = vor.u32 %v2490_v15, %v2352_v52  ;;  %v4921_v50 = vpop.f32.mrb[12].mxu0  ;;  %4698 = vmatpush3.bf16.msra.mxu0 %v5232_v33  ;;  %vm6875_vm8 = vmand %vm2225_vm7, %vm2235_vm12 }
 0x269   : > { %v2195_v17 = vmax.f32 %v6806_v5, 0.0  ;;  %v2198_v30 = vmax.f32 %v2178_v3, 0.0  ;;  %v2350_v26 = vor.u32 %v2348_v48, %v2347_v13  ;;  %v2489_v62 = vor.u32 %v2488_v51, %v2345_v60  ;;  %v2082_v31 = vpop.f32.mrb[13].mxu0  ;;  %4699 = vmatprep.subr.bf16.mxu0 %v5233_v43  ;;  %v5235_v43 = vld [vmem:[%s7530_s5 + $0x58] sm:$0xff]   ;;  %vm7558_vm7 = vmpackc.low %vm6686_vm10, %vm6686_vm10 }
 0x26a   : > { %v2196_v27 = vmax.f32 %v6822_v20, 0.0  ;;  %v2154_v61 = vmul.f32 %v4921_v50, %v6623_v16  ;;  %v6829_v34 = vsel %vm6719_vm0, %v2357_v24, %v2421_v37  ;;  %v6833_v38 = vsel %vm6727_vm2, %v2491_v59, %v2524_v35  ;;  %v4922_v41 = vpop.f32.mrb[14].mxu0  ;;  %vm6921_vm12 = vmand %vm2224_vm5, %vm2234_vm6 }
 0x26b   : > { %v2276_v49 = vsel %vm6817_vm9, %v2195_v17, 0.0  ;;  %v2279_v52 = vsel %vm6778_vm3, %v2198_v30, 0.0  ;;  %2423 = vst [vmem:[#allocation3 + $0x48] sm:$0xff] %v6829_v34  ;;  %2526 = vst [vmem:[#allocation3 + $0x58] sm:$0xff] %v6833_v38  ;;  %v6848_v57 = vsel %vm6719_vm0, %v2350_v26, %v2418_v18  ;;  %v6852_v33 = vsel %vm6727_vm2, %v2489_v62, %v2521_v44  ;;  %v2085_v42 = vpop.f32.mrb[15].mxu0  ;;  %v5238_v26 = vld [vmem:[%s7530_s5 + $0x60] sm:$0xff]  }
 0x26c   : > { %v2293_v60 = vpack.c.bf16 %v2279_v52, %v2278_v54  ;;  %v2277_v48 = vsel %vm6817_vm9, %v2196_v27, 0.0  ;;  %2420 = vst [vmem:[#allocation3 + $0x30] sm:$0xff] %v6848_v57  ;;  %2523 = vst [vmem:[#allocation3 + $0x40] sm:$0xff] %v6852_v33  ;;  %v6866_v15 = vadd.f32 %v6628_v9, %v2154_v61  ;;  %v2152_v3 = vmul.f32 %v6623_v16, %v2082_v31  ;;  %v2530_v62 = vld [vmem:[#allocation3 + $0x88] sm:$0xff] }
 0x26d   : > { %v2292_v14 = vpack.c.bf16 %v2277_v48, %v2276_v49  ;;  %v2155_v37 = vmul.f32 %v4922_v41, %v6623_v16  ;;  %2876 = vmatmul.mubr.bf16.gmra.mrb[24].mxu0 %v6848_v57  ;;  %v2153_v54 = vmul.f32 %v6623_v16, %v2085_v42  ;;  %v6887_v24 = vpack.c.bf16 %v2198_v30, %v2197_v1  ;;  %v2527_v48 = vld [vmem:[#allocation3 + $0x70] sm:$0xff] }
 0x26e   : > { %v2366_v35 = vshrl.u32 %v2293_v60, 16  ;;  %v2369_v13 = vshll.u32 %v2293_v60, 16  ;;  %2447 = vst [vmem:[#allocation3 + $0x80] sm:$0xff] %v2293_v60  ;;  %v6902_v29 = vpack.c.bf16 %v2194_v19, %v2193_v6  ;;  %v7561_v59 = vmax.f32 %v6866_v15, 0.0  ;;  %4700 = vmatpush3.bf16.msra.mxu0 %v5234_v39  ;;  %v2424_v60 = vld [vmem:[#allocation3 + $0x60] sm:$0xff] }
 0x26f   : > { %5293 = vmatprep.mubr.msk.bf16.mxu1 %vm7557_vm4, %v6887_v24  ;;  %v2359_v21 = vshrl.u32 %v2292_v14, 16  ;;  %v2362_v1 = vshll.u32 %v2292_v14, 16  ;;  %v6912_v18 = vadd.f32 %v6628_v9, %v2152_v3  ;;  %v6926_v30 = vadd.f32 %v6628_v9, %v2155_v37  ;;  %4701 = vmatprep.subr.bf16.mxu0 %v5235_v43 }
 0x270   : > { %5296 = vmatprep.mubr.msk.bf16.mxu0 %vm7558_vm7, %v6902_v29  ;;  %v2368_v6 = vrot.slane %v2366_v35, 7  ;;  %v2494_v19 = vrot.slane %v2369_v13, 1  ;;  %v2180_v50 = vadd.f32 %v6628_v9, %v2153_v54  ;;  %v2282_v45 = vsel %vm6875_vm8, %v7561_v59, 0.0  ;;  %v4925_v52 = vpop.f32.mrb[16].mxu0  ;;  %vm6996_vm7 = vmpackc.low %vm6817_vm9, %vm6817_vm9 }
 0x271   : > { %v2361_v61 = vrot.slane %v2359_v21, 7  ;;  %v2492_v31 = vrot.slane %v2362_v1, 1  ;;  %v2199_v49 = vmax.f32 %v6912_v18, 0.0  ;;  %v7559_v42 = vmax.f32 %v6926_v30, 0.0  ;;  %v2098_v14 = vpop.f32.mrb[17].mxu0  ;;  %vm7022_vm9 = vmpackc.low %vm6921_vm12, %vm6921_vm12 }
 0x272   : > { %v2371_v41 = vor.u32 %v2369_v13, %v2368_v6  ;;  %v2495_v39 = vor.u32 %v2494_v19, %v2366_v35  ;;  %v2200_v43 = vmax.f32 %v2180_v50, 0.0  ;;  %v2158_v4 = vmul.f32 %v4925_v52, %v6623_v16  ;;  %v4926_v7 = vpop.f32.mrb[18].mxu0  ;;  %4702 = vmatpush3.bf16.msra.mxu0 %v5236_v46  ;;  %v5239_v46 = vld [vmem:[%s7530_s5 + $0x20] sm:$0xff]  }
 0x273   : > { %v2364_v3 = vor.u32 %v2362_v1, %v2361_v61  ;;  %v2493_v37 = vor.u32 %v2492_v31, %v2359_v21  ;;  %v2280_v54 = vsel %vm6921_vm12, %v2199_v49, 0.0  ;;  %v2283_v13 = vsel %vm6875_vm8, %v7559_v42, 0.0  ;;  %v2101_v1 = vpop.f32.mrb[19].mxu0  ;;  %4703 = vmatprep.subr.bf16.mxu0 %v5238_v26  ;;  %v5240_v26 = vld [vmem:[%s7530_s5 + $0x148] sm:$0xff]  }
 0x274   : > { %v6943_v18 = vsel %vm6719_vm0, %v2371_v41, %v2427_v40  ;;  %v6947_v35 = vsel %vm6727_vm2, %v2495_v39, %v2530_v62  ;;  %v2281_v21 = vsel %vm6921_vm12, %v2200_v43, 0.0  ;;  %v2295_v19 = vpack.c.bf16 %v2283_v13, %v2282_v45  ;;  %v5241_v62 = vld [vmem:[%s7530_s5 + $0x68] sm:$0xff]   ;;  %vm7041_vm12 = vmand %vm2226_vm11, %vm2236_vm1 }
 0x275   : > { %2429 = vst [vmem:[#allocation3 + $0x78] sm:$0xff] %v6943_v18  ;;  %2532 = vst [vmem:[#allocation3 + $0x88] sm:$0xff] %v6947_v35  ;;  %v6962_v6 = vsel %vm6719_vm0, %v2364_v3, %v2424_v60  ;;  %v6966_v40 = vsel %vm6727_vm2, %v2493_v37, %v2527_v48  ;;  %v2294_v50 = vpack.c.bf16 %v2281_v21, %v2280_v54  ;;  %2900 = vmatmul.mubr.bf16.vlgmr.msra.gmra.mrb[0].mxu1 %v6943_v18  ;;  %v2536_v37 = vld [vmem:[#allocation3 + $0xb8] sm:$0xff]  ;;  %v2430_v21 = vld [vmem:[#allocation3 + $0x90] sm:$0xff] }
 0x276   : > { %2426 = vst [vmem:[#allocation3 + $0x60] sm:$0xff] %v6962_v6  ;;  %2529 = vst [vmem:[#allocation3 + $0x70] sm:$0xff] %v6966_v40  ;;  %v6978_v61 = vadd.f32 %v6628_v9, %v2158_v4  ;;  %v2156_v31 = vmul.f32 %v6623_v16, %v2098_v14  ;;  %v2159_v45 = vmul.f32 %v4926_v7, %v6623_v16  ;;  %2884 = vmatmul.mubr.bf16.gmra.mrb[28].mxu0 %v6829_v34  ;;  %v2433_v4 = vld [vmem:[#allocation3 + $0xa8] sm:$0xff] }
 0x277   : > { %v2157_v52 = vmul.f32 %v6623_v16, %v2101_v1  ;;  %v2380_v41 = vshrl.u32 %v2295_v19, 16  ;;  %v2383_v39 = vshll.u32 %v2295_v19, 16  ;;  %v2373_v60 = vshrl.u32 %v2294_v50, 16  ;;  %4928 = vmatpush3.bf16.msra.mxu1 %v6608_v47  ;;  %4704 = vmatpush3.bf16.msra.mxu0 %v5239_v46  ;;  %v2533_v1 = vld [vmem:[#allocation3 + $0xa0] sm:$0xff]  ;;  %vm7101_vm11 = vmpackc.low %vm6875_vm8, %vm6875_vm8  ;;  %v5283_v16 = vld [vmem:[%s7530_s5 + $0x230] sm:$0xff]  }
 0x278   : > { %v2376_v48 = vshll.u32 %v2294_v50, 16  ;;  %vm7629_vm5 = vcmp.lt.s32.totalorder %v6676_v22, 16  ;;  %vm7630_vm6 = vcmp.ge.s32.totalorder %v6676_v22, 0  ;;  %v7004_v7 = vpack.c.bf16 %v2196_v27, %v2195_v17  ;;  %v5242_v17 = vld [vmem:[%s7530_s5 + $0x28] sm:$0xff]   ;;  %4929 = vmatprep.subr.bf16.mxu1 %v5240_v26  ;;  %4705 = vmatprep.subr.bf16.mxu0 %v5241_v62  ;;  %vm5306_vm8 = vmpackc.low %vm6642_vm15, %vm6642_vm15 }
 0x279   : > { %vm6988_vm4 = vmand %vm7630_vm6, %vm7629_vm5  ;;  %v7560_v47 = vmax.f32 %v6978_v61, 0.0  ;;  %v7011_v22 = vadd.f32 %v6628_v9, %v2156_v31  ;;  %v7014_v12 = vadd.f32 %v6628_v9, %v2159_v45  ;;  %v7017_v14 = vadd.f32 %v6628_v9, %v2157_v52  ;;  %v5243_v9 = vld [vmem:[%s7530_s5 + $0x150] sm:$0xff]  }
 0x27a   : > { %5299 = vmatprep.mubr.msk.bf16.mxu0 %vm6996_vm7, %v7004_v7  ;;  %v7026_v20 = vpack.c.bf16 %v2200_v43, %v2199_v49  ;;  %v2382_v27 = vrot.slane %v2380_v41, 7  ;;  %v2498_v44 = vrot.slane %v2383_v39, 1  ;;  %v2375_v54 = vrot.slane %v2373_v60, 7  ;;  %v5244_v43 = vld [vmem:[%s7530_s5 + $0x70] sm:$0xff]   ;;  %vm5309_vm15 = vmpackc.low %vm7041_vm12, %vm7041_vm12 }
 0x27b   : > { %v2496_v13 = vrot.slane %v2376_v48, 1  ;;  %v2286_v46 = vsel %vm6988_vm4, %v7560_v47, 0.0  ;;  %v2203_v19 = vmax.f32 %v7011_v22, 0.0  ;;  %v2206_v53 = vmax.f32 %v7014_v12, 0.0  ;;  %4930 = vmatpush3.bf16.msra.mxu1 %v5240_v26  ;;  %4706 = vmatpush3.bf16.msra.mxu0 %v5242_v17  ;;  %v5245_v26 = vld [vmem:[%s7530_s5 + $0x30] sm:$0xff]   ;;  %v5246_v17 = vld [vmem:[%s7530_s5 + $0x158] sm:$0xff]  }
 0x27c   : > { %5302 = vmatprep.mubr.msk.bf16.mxu1 %vm7022_vm9, %v7026_v20  ;;  %v2204_v50 = vmax.f32 %v7017_v14, 0.0  ;;  %v2385_v31 = vor.u32 %v2383_v39, %v2382_v27  ;;  %v2499_v45 = vor.u32 %v2498_v44, %v2380_v41  ;;  %v2378_v62 = vor.u32 %v2376_v48, %v2375_v54  ;;  %4931 = vmatprep.subr.bf16.mxu1 %v5243_v9  ;;  %v5265_v22 = vld [vmem:[%s7530_s5 + $0x1d0] sm:$0xff]  }
 0x27d   : > { %v2497_v52 = vor.u32 %v2496_v13, %v2373_v60  ;;  %v2284_v42 = vsel %vm7041_vm12, %v2203_v19, 0.0  ;;  %v2287_v47 = vsel %vm6988_vm4, %v2206_v53, 0.0  ;;  %4707 = vmatprep.subr.bf16.mxu0 %v5244_v43  ;;  %v7641_v54 = vmax.f32 %v6866_v15, 0.0  ;;  %v5266_v14 = vld [vmem:[%s7530_s5 + $0x190] sm:$0xff]  }
 0x27e   : > { %v2285_v59 = vsel %vm7041_vm12, %v2204_v50, 0.0  ;;  %v7072_v41 = vsel %vm6719_vm0, %v2385_v31, %v2433_v4  ;;  %v7076_v39 = vsel %vm6727_vm2, %v2499_v45, %v2536_v37  ;;  %v7080_v60 = vsel %vm6719_vm0, %v2378_v62, %v2430_v21  ;;  %v5247_v4 = vld [vmem:[%s7530_s5 + $0x78] sm:$0xff]   ;;  %2892 = vmatmul.mubr.bf16.gmra.mrb[32].mxu0 %v6962_v6  ;;  %v3376_v49 = vld [vmem:[#allocation3 + $0x70] sm:$0xff] }
 0x27f   : > { %v7084_v48 = vsel %vm6727_vm2, %v2497_v52, %v2533_v1  ;;  %2435 = vst [vmem:[#allocation3 + $0xa8] sm:$0xff] %v7072_v41  ;;  %2538 = vst [vmem:[#allocation3 + $0xb8] sm:$0xff] %v7076_v39  ;;  %v2297_v27 = vpack.c.bf16 %v2287_v47, %v2286_v46  ;;  %v2296_v44 = vpack.c.bf16 %v2285_v59, %v2284_v42  ;;  %2908 = vmatmul.mubr.bf16.gmra.mrb[4].mxu1 %v7080_v60  ;;  %v5248_v21 = vld [vmem:[%s7530_s5 + $0x38] sm:$0xff]   ;;  %v5249_v1 = vld [vmem:[%s7530_s5 + $0x160] sm:$0xff]  }
 0x280   : > { %2432 = vst [vmem:[#allocation3 + $0x90] sm:$0xff] %v7080_v60  ;;  %2535 = vst [vmem:[#allocation3 + $0xa0] sm:$0xff] %v7084_v48  ;;  %4932 = vmatpush3.bf16.msra.mxu1 %v5243_v9  ;;  %v7642_v13 = vmax.f32 %v6926_v30, 0.0  ;;  %4708 = vmatpush3.bf16.msra.mxu0 %v5245_v26  ;;  %v7643_v51 = vmax.f32 %v6639_v36, 0.0  ;;  %v7644_v15 = vmax.f32 %v6651_v25, 0.0  ;;  %v2542_v36 = vld [vmem:[#allocation3 + $0xe8] sm:$0xff]  ;;  %v7159_v11 = vpack.c.bf16 %v2204_v50, %v2203_v19 }
 0x281   : > { %v2394_v59 = vshrl.u32 %v2297_v27, 16  ;;  %v2397_v42 = vshll.u32 %v2297_v27, 16  ;;  %v2387_v47 = vshrl.u32 %v2296_v44, 16  ;;  %v2390_v9 = vshll.u32 %v2296_v44, 16  ;;  %4933 = vmatprep.subr.bf16.mxu1 %v5246_v17  ;;  %4709 = vmatprep.subr.bf16.mxu0 %v5247_v4  ;;  %v2436_v52 = vld [vmem:[#allocation3 + $0xc0] sm:$0xff]  ;;  %v2539_v25 = vld [vmem:[#allocation3 + $0xd0] sm:$0xff] }
 0x282   : > { %v7109_v43 = vpack.c.bf16 %v7642_v13, %v7641_v54  ;;  %v5307_v30 = vpack.c.bf16 %v7644_v15, %v7643_v51  ;;  %v5250_v4 = vld [vmem:[%s7530_s5 + $0x168] sm:$0xff]   ;;  %v5267_v19 = vld [vmem:[%s7530_s5 + $0x1d8] sm:$0xff]   ;;  %v5273_v15 = vld [vmem:[%s7530_s5 + $0x1f0] sm:$0xff]  }
 0x283   : > { %v2396_v46 = vrot.slane %v2394_v59, 7  ;;  %v2502_v31 = vrot.slane %v2397_v42, 1  ;;  %v2389_v45 = vrot.slane %v2387_v47, 7  ;;  %v2500_v62 = vrot.slane %v2390_v9, 1  ;;  %v7267_v50 = vld [vmem:[#allocation3 + $0x58] sm:$0xff] }
 0x284   : > { %5305 = vmatprep.mubr.msk.bf16.mxu1 %vm7101_vm11, %v7109_v43  ;;  %5308 = vmatprep.mubr.msk.bf16.mxu0 %vm5306_vm8, %v5307_v30  ;;  %v5274_v30 = vld [vmem:[%s7530_s5 + $0x1b0] sm:$0xff]  }
 0x285   : > { %4934 = vmatpush3.bf16.msra.mxu1 %v5246_v17  ;;  %v2399_v26 = vor.u32 %v2397_v42, %v2396_v46  ;;  %v2503_v27 = vor.u32 %v2502_v31, %v2394_v59  ;;  %v2392_v44 = vor.u32 %v2390_v9, %v2389_v45  ;;  %v2501_v54 = vor.u32 %v2500_v62, %v2387_v47  ;;  %v5269_v42 = vld [vmem:[%s7530_s5 + $0x1e0] sm:$0xff]   ;;  %v5271_v9 = vld [vmem:[%s7530_s5 + $0x1e8] sm:$0xff]   ;;  %v3368_v31 = vld [vmem:[#allocation3 + $0x30] sm:$0xff] }
 0x286   : > { %4710 = vmatpush3.bf16.msra.mxu0 %v5248_v21  ;;  %4935 = vmatprep.subr.bf16.mxu1 %v5249_v1  ;;  %v5270_v47 = vld [vmem:[%s7530_s5 + $0x1a0] sm:$0xff]   ;;  %v3369_v21 = vld [vmem:[#allocation3 + $0x38] sm:$0xff]  ;;  %v3372_v45 = vld [vmem:[#allocation3 + $0x50] sm:$0xff] }
 0x287   : > { %v7132_v13 = vsel %vm6719_vm0, %v2399_v26, %v2439_v63  ;;  %v7136_v51 = vsel %vm6727_vm2, %v2503_v27, %v2542_v36  ;;  %v7140_v17 = vsel %vm6719_vm0, %v2392_v44, %v2436_v52  ;;  %v7144_v59 = vsel %vm6727_vm2, %v2501_v54, %v2539_v25  ;;  %2916 = vmatmul.mubr.bf16.gmra.mrb[8].mxu1 %v7072_v41  ;;  %vm7645_vm0 = vmpackc.low %vm6634_vm14, %vm6634_vm14  ;;  %v5277_v46 = vld [vmem:[%s7530_s5 + $0x200] sm:$0xff]   ;;  %v5278_v63 = vld [vmem:[%s7530_s5 + $0x208] sm:$0xff]  }
 0x288   : > { %2441 = vst [vmem:[#allocation3 + $0xd8] sm:$0xff] %v7132_v13  ;;  %2544 = vst [vmem:[#allocation3 + $0xe8] sm:$0xff] %v7136_v51  ;;  %5311 = vmatprep.mubr.msk.bf16.mxu1 %vm5309_vm15, %v7159_v11  ;;  %v5279_v62 = vld [vmem:[%s7530_s5 + $0x210] sm:$0xff]   ;;  %v5280_v36 = vld [vmem:[%s7530_s5 + $0x218] sm:$0xff]  }
 0x289   : > { %2438 = vst [vmem:[#allocation3 + $0xc0] sm:$0xff] %v7140_v17  ;;  %2541 = vst [vmem:[#allocation3 + $0xd0] sm:$0xff] %v7144_v59  ;;  %4936 = vmatpush3.bf16.msra.mxu1 %v5249_v1  ;;  %3206 = vmatmul.mubr.bf16.vlgmr.msra.gmra.mrb[36].mxu0 %v6765_v32  ;;  %v5252_v32 = vld [vmem:[%s7530_s5 + $0x178] sm:$0xff]   ;;  %v3371_v52 = vld [vmem:[#allocation3 + $0x48] sm:$0xff] }
 0x28a   : > { %5314 = vmatprep.mubr.msk.bf16.mxu0 %vm7645_vm0, %v6699_v58  ;;  %4937 = vmatprep.subr.bf16.mxu1 %v5250_v4  ;;  %vm7646_vm14 = vmpackc.low %vm6710_vm13, %vm6710_vm13  ;;  %v5254_v58 = vld [vmem:[%s7530_s5 + $0x88] sm:$0xff]   ;;  %v5276_v1 = vld [vmem:[%s7530_s5 + $0x1b8] sm:$0xff]  }
 0x28b   : > { %vm7647_vm13 = vmpackc.low %vm6686_vm10, %vm6686_vm10  ;;  %v5281_v25 = vld [vmem:[%s7530_s5 + $0x220] sm:$0xff]   ;;  %v5282_v26 = vld [vmem:[%s7530_s5 + $0x228] sm:$0xff]  }
 0x28c   : > { %vm7648_vm10 = vmpackc.low %vm6778_vm3, %vm6778_vm3  ;;  %v3378_v27 = vld [vmem:[#allocation3 + $0x80] sm:$0xff]  ;;  %v3377_v44 = vld [vmem:[#allocation3 + $0x78] sm:$0xff] }
 0x28d   : > { %4938 = vmatpush3.bf16.msra.mxu1 %v5250_v4  ;;  %vm5345_vm2 = vmpackc.low %vm6988_vm4, %vm6988_vm4 }
 0x28e   : > { %4939 = vmatprep.subr.bf16.mxu1 %v5251_v2 }
 0x28f   : > { %2924 = vmatmul.mubr.bf16.gmra.mrb[12].mxu1 %v7140_v17 }
 0x290   : > { %4943 = vmatprep.mubr.bf16.mxu1 %v6755_v28  ;;  %v5258_v28 = vld [vmem:[%s7530_s5 + $0xa8] sm:$0xff]  }
 0x291   : > { %4940 = vmatpush3.bf16.msra.mxu1 %v5251_v2  ;;  %3214 = vmatmul.mubr.bf16.gmra.mrb[40].mxu0 %v6751_v10  ;;  %v5256_v10 = vld [vmem:[%s7530_s5 + $0x98] sm:$0xff]  }
 0x292   : > { %5317 = vmatprep.mubr.msk.bf16.mxu0 %vm7646_vm14, %v6794_v8  ;;  %4941 = vmatprep.subr.bf16.mxu1 %v5252_v32  ;;  %v5259_v8 = vld [vmem:[%s7530_s5 + $0xb0] sm:$0xff]  }
 0x295   : > { %4942 = vmatpush3.bf16.msra.mxu1 %v5252_v32 }
 0x296   : > { %4959 = vmatprep.subr.bf16.mxu1 %v5253_v55 }
 0x298   : > { %4944 = vmatmul.mubr.bf16.vlgmr.msra.gmra.mrb[16].mxu1 %v6852_v33 }
 0x299   : > { %3222 = vmatmul.mubr.bf16.gmra.mrb[44].mxu0 %v6848_v57  ;;  %4960 = vmatpush3.bf16.msra.mxu1 %v5253_v55  ;;  %v5262_v57 = vld [vmem:[%s7530_s5 + $0x180] sm:$0xff]  }
 0x29a   : > { %4947 = vmatprep.mubr.bf16.mxu1 %v6833_v38  ;;  %5320 = vmatprep.mubr.msk.bf16.mxu0 %vm7647_vm13, %v6902_v29  ;;  %v2547_v38 = vld [vmem:[#allocation3 + $0x10] sm:$0xff]  ;;  %v5263_v29 = vld [vmem:[%s7530_s5 + $0x1c8] sm:$0xff]  }
 0x29b   : > { %4961 = vmatprep.subr.bf16.mxu1 %v5254_v58 }
 0x29d   : > { %4962 = vmatpush3.bf16.msra.mxu1 %v5254_v58 }
 0x29e   : > { %4963 = vmatprep.subr.bf16.mxu1 %v5255_v23 }
 0x2a0   : > { %4948 = vmatmul.mubr.bf16.gmra.mrb[20].mxu1 %v6966_v40 }
 0x2a1   : > { %3230 = vmatmul.mubr.bf16.gmra.mrb[48].mxu0 %v6829_v34  ;;  %4964 = vmatpush3.bf16.msra.mxu1 %v5255_v23  ;;  %v5260_v34 = vld [vmem:[%s7530_s5 + $0xb8] sm:$0xff]  }
 0x2a2   : > { %4951 = vmatprep.mubr.bf16.mxu1 %v6947_v35  ;;  %5323 = vmatprep.mubr.msk.bf16.mxu0 %vm6996_vm7, %v7004_v7 }
 0x2a3   : > { %4965 = vmatprep.subr.bf16.mxu1 %v5256_v10 }
 0x2a5   : > { %4966 = vmatpush3.bf16.msra.mxu1 %v5256_v10 }
 0x2a6   : > { %4967 = vmatprep.subr.bf16.mxu1 %v5257_v0 }
 0x2a8   : > { %4952 = vmatmul.mubr.bf16.gmra.mrb[24].mxu1 %v7084_v48 }
 0x2a9   : > { %3238 = vmatmul.mubr.bf16.gmra.mrb[52].mxu0 %v6962_v6  ;;  %4968 = vmatpush3.bf16.msra.mxu1 %v5257_v0 }
 0x2aa   : > { %4955 = vmatprep.mubr.bf16.mxu1 %v7076_v39  ;;  %5326 = vmatprep.mubr.msk.bf16.mxu0 %vm7648_vm10, %v6887_v24  ;;  %v2550_v24 = vld [vmem:[#allocation3 + $0x28] sm:$0xff] }
 0x2ab   : > { %4969 = vmatprep.subr.bf16.mxu1 %v5258_v28 }
 0x2ad   : > { %4970 = vmatpush3.bf16.msra.mxu1 %v5258_v28 }
 0x2ae   : > { %4971 = vmatprep.subr.bf16.mxu1 %v5259_v8 }
 0x2b0   : > { %4956 = vmatmul.mubr.bf16.gmra.mrb[28].mxu1 %v7144_v59 }
 0x2b1   : > { %3246 = vmatmul.mubr.bf16.gmra.mrb[56].mxu0 %v6943_v18  ;;  %4972 = vmatpush3.bf16.msra.mxu1 %v5259_v8  ;;  %v5264_v18 = vld [vmem:[%s7530_s5 + $0x188] sm:$0xff]  }
 0x2b2   : > { %5329 = vmatprep.mubr.msk.bf16.mxu0 %vm7022_vm9, %v7026_v20  ;;  %4975 = vmatprep.mubr.bf16.mxu1 %v2547_v38 }
 0x2b3   : > { %4973 = vmatprep.subr.bf16.mxu1 %v5260_v34 }
 0x2b5   : > { %4974 = vmatpush3.bf16.msra.mxu1 %v5260_v34 }
 0x2b6   : > { %4775 = vmatprep.subr.bf16.mxu1 %v5261_v56 }
 0x2b8   : > { %4976 = vmatmul.mubr.bf16.vlgmr.msra.gmra.mrb[16].mxu1 %v2550_v24 }
 0x2b9   : > { %3254 = vmatmul.mubr.bf16.gmra.mrb[60].mxu0 %v7080_v60  ;;  %4776 = vmatpush3.bf16.msra.mxu1 %v5262_v57 }
 0x2ba   : > { %5332 = vmatprep.mubr.msk.bf16.mxu0 %vm7101_vm11, %v7109_v43  ;;  %4979 = vmatprep.mubr.bf16.mxu1 %v6852_v33  ;;  %v5268_v33 = vld [vmem:[%s7530_s5 + $0x198] sm:$0xff]  }
 0x2bb   : > { %4777 = vmatprep.subr.bf16.mxu1 %v5263_v29 }
 0x2bd   : > { %4778 = vmatpush3.bf16.msra.mxu1 %v5264_v18 }
 0x2be   : > { %4779 = vmatprep.subr.bf16.mxu1 %v5265_v22 }
 0x2c0   : > { %4980 = vmatmul.mubr.bf16.gmra.mrb[20].mxu1 %v7267_v50 }
 0x2c1   : > { %3262 = vmatmul.mubr.bf16.gmra.mrb[64].mxu0 %v7072_v41  ;;  %4780 = vmatpush3.bf16.msra.mxu1 %v5266_v14 }
 0x2c2   : > { %4983 = vmatprep.mubr.bf16.mxu1 %v6966_v40  ;;  %4781 = vmatprep.subr.bf16.mxu1 %v5267_v19  ;;  %v5272_v40 = vld [vmem:[%s7530_s5 + $0x1a8] sm:$0xff]  }
 0x2c5   : > { %4782 = vmatpush3.bf16.msra.mxu1 %v5268_v33 }
 0x2c6   : > { %4783 = vmatprep.subr.bf16.mxu1 %v5269_v42 }
 0x2c8   : > { %4984 = vmatmul.mubr.bf16.gmra.mrb[24].mxu1 %v6947_v35  ;;  %v5275_v35 = vld [vmem:[%s7530_s5 + $0x1f8] sm:$0xff]  }
 0x2c9   : > { %4784 = vmatpush3.bf16.msra.mxu1 %v5270_v47  ;;  %4987 = vmatprep.mubr.bf16.mxu1 %v7084_v48 }
 0x2ca   : > { %4785 = vmatprep.subr.bf16.mxu1 %v5271_v9 }
 0x2cd   : > { %4786 = vmatpush3.bf16.msra.mxu1 %v5272_v40 }
 0x2ce   : > { %4787 = vmatprep.subr.bf16.mxu1 %v5273_v15 }
 0x2d0   : > { %4988 = vmatmul.mubr.bf16.gmra.mrb[28].mxu1 %v7076_v39 }
 0x2d1   : > { %4788 = vmatpush3.bf16.msra.mxu1 %v5274_v30  ;;  %3617 = vmatprep.mubr.bf16.mxu1 %v3369_v21 }
 0x2d2   : > { %4789 = vmatprep.subr.bf16.mxu1 %v5275_v35 }
 0x2d5   : > { %4790 = vmatpush3.bf16.msra.mxu1 %v5276_v1 }
 0x2d6   : > { %4991 = vmatprep.subr.bf16.mxu1 %v5277_v46 }
 0x2d8   : > { %3618 = vmatmul.mubr.bf16.vlgmr.msra.gmra.mrb[32].mxu1 %v3368_v31 }
 0x2d9   : > { %4992 = vmatpush3.bf16.msra.mxu1 %v5277_v46  ;;  %3625 = vmatprep.mubr.bf16.mxu1 %v3372_v45 }
 0x2da   : > { %4993 = vmatprep.subr.bf16.mxu1 %v5278_v63 }
 0x2dd   : > { %4994 = vmatpush3.bf16.msra.mxu1 %v5278_v63 }
 0x2de   : > { %4995 = vmatprep.subr.bf16.mxu1 %v5279_v62 }
 0x2e0   : > { %3626 = vmatmul.mubr.bf16.gmra.mrb[36].mxu1 %v3371_v52 }
 0x2e1   : > { %5335 = vmatprep.mubr.msk.bf16.mxu1 %vm6996_vm7, %v7004_v7  ;;  %4996 = vmatpush3.bf16.msra.mxu1 %v5279_v62  ;;  %v5284_v7 = vld [vmem:[%s7530_s5 + $0x238] sm:$0xff]  }
 0x2e2   : > { %4997 = vmatprep.subr.bf16.mxu1 %v5280_v36 }
 0x2e5   : > { %4998 = vmatpush3.bf16.msra.mxu1 %v5280_v36 }
 0x2e6   : > { %4999 = vmatprep.subr.bf16.mxu1 %v5281_v25 }
 0x2e8   : > { %3634 = vmatmul.mubr.bf16.gmra.mrb[40].mxu1 %v6962_v6  ;;  %v7649_v6 = vmax.f32 %v6978_v61, 0.0 }
 0x2e9   : > { %3641 = vmatprep.mubr.bf16.mxu1 %v3378_v27  ;;  %5000 = vmatpush3.bf16.msra.mxu1 %v5281_v25 }
 0x2ea   : > { %5001 = vmatprep.subr.bf16.mxu1 %v5282_v26  ;;  %v5346_v5 = vpack.c.bf16 %v2206_v53, %v7649_v6 }
 0x2ed   : > { %5002 = vmatpush3.bf16.msra.mxu1 %v5282_v26 }
 0x2ee   : > { %5003 = vmatprep.subr.bf16.mxu1 %v5283_v16 }
 0x2f0   : > { %3642 = vmatmul.mubr.bf16.gmra.mrb[44].mxu1 %v3377_v44 }
 0x2f1   : > { %5338 = vmatprep.mubr.msk.bf16.mxu1 %vm7022_vm9, %v7026_v20  ;;  %5004 = vmatpush3.bf16.msra.mxu1 %v5283_v16  ;;  %v3370_v20 = vld [vmem:[#allocation3 + $0x40] sm:$0xff] }
 0x2f2   : > { %5005 = vmatprep.subr.bf16.mxu1 %v5284_v7 }
 0x2f5   : > { %5006 = vmatpush3.bf16.msra.mxu1 %v5284_v7 }
 0x2f8   : > { %3650 = vmatmul.mubr.bf16.gmra.mrb[48].mxu1 %v7080_v60 }
 0x2f9   : > { %5341 = vmatprep.mubr.msk.bf16.mxu1 %vm7101_vm11, %v7109_v43 }
 0x300   : > { %3658 = vmatmul.mubr.bf16.gmra.mrb[52].mxu1 %v7072_v41  ;;  %v3379_v41 = vld [vmem:[#allocation3 + $0x88] sm:$0xff] }
 0x301   : > { %5344 = vmatprep.mubr.msk.bf16.mxu1 %vm5309_vm15, %v7159_v11 }
 0x308   : > { %3666 = vmatmul.mubr.bf16.gmra.mrb[56].mxu1 %v7140_v17 }
 0x309   : > { %5347 = vmatprep.mubr.msk.bf16.mxu1 %vm5345_vm2, %v5346_v5 }
 0x310   : > { %3674 = vmatmul.mubr.bf16.gmra.mrb[60].mxu1 %v7132_v13 }
 0x311   : > { %5007 = vmatprep.mubr.bf16.mxu1 %v3370_v20 }
 0x318   : > { %5008 = vmatmul.mubr.bf16.vlgmr.msra.gmra.mrb[16].mxu1 %v7267_v50 }
 0x319   : > { %5011 = vmatprep.mubr.bf16.mxu1 %v3376_v49 }
 0x320   : > { %5012 = vmatmul.mubr.bf16.gmra.mrb[20].mxu1 %v3379_v41 }
 0x321   : > { %5015 = vmatprep.mubr.bf16.mxu1 %v7084_v48 }
 0x328   : > { %5016 = vmatmul.mubr.bf16.gmra.mrb[24].mxu1 %v7076_v39 }
 0x329   : > { %5019 = vmatprep.mubr.bf16.mxu1 %v7144_v59 }
 0x330   : > { %5020 = vmatmul.mubr.bf16.gmra.mrb[28].mxu1 %v7136_v51 }
 0x336   : > { %v4631_v61 = vpop.f32.mrb[20].mxu0 }
 0x337   : > { %v4632_v3 = vpop.f32.mrb[21].mxu0 }
 0x338   : > { %v4633_v12 = vadd.f32 %v4632_v3, %v4631_v61  ;;  %v4634_v53 = vpop.f32.mrb[22].mxu0 }
 0x339   : > { %v4635_v60 = vpop.f32.mrb[23].mxu0 }
 0x33a   : > { %v4636_v37 = vadd.f32 %v4635_v60, %v4634_v53 }
 0x340   : > { %v4637_v43 = vpop.f32.mrb[24].mxu0 }
 0x341   : > { %v4638_v54 = vpop.f32.mrb[25].mxu0 }
 0x342   : > { %v4639_v4 = vadd.f32 %v4638_v54, %v4637_v43  ;;  %v4640_v13 = vpop.f32.mrb[26].mxu0 }
 0x343   : > { %v4641_v17 = vpop.f32.mrb[27].mxu0 }
 0x344   : > { %v4642_v11 = vadd.f32 %v4641_v17, %v4640_v13 }
 0x348   : > { %v4655_v2 = vpop.f32.mrb[0].mxu1 }
 0x349   : > { %v4643_v48 = vpop.f32.mrb[28].mxu0  ;;  %v4656_v32 = vpop.f32.mrb[1].mxu1 }
 0x34a   : > { %v7358_v39 = vadd.f32 %v4656_v32, %v4655_v2  ;;  %v4644_v59 = vpop.f32.mrb[29].mxu0  ;;  %v4658_v55 = vpop.f32.mrb[2].mxu1 }
 0x34b   : > { %v4645_v51 = vadd.f32 %v4644_v59, %v4643_v48  ;;  %v4646_v58 = vpop.f32.mrb[30].mxu0  ;;  %v4659_v23 = vpop.f32.mrb[3].mxu1 }
 0x34c   : > { %v7360_v10 = vadd.f32 %v4659_v23, %v4658_v55  ;;  %v4647_v0 = vpop.f32.mrb[31].mxu0 }
 0x34d   : > { %v4648_v28 = vadd.f32 %v4647_v0, %v4646_v58 }
 0x351   : > { %v4649_v8 = vpop.f32.mrb[32].mxu0 }
 0x352   : > { %v4661_v34 = vpop.f32.mrb[4].mxu1  ;;  %v4650_v38 = vpop.f32.mrb[33].mxu0 }
 0x353   : > { %v4662_v56 = vpop.f32.mrb[5].mxu1  ;;  %v4651_v57 = vadd.f32 %v4650_v38, %v4649_v8  ;;  %v4652_v29 = vpop.f32.mrb[34].mxu0 }
 0x354   : > { %v7362_v24 = vadd.f32 %v4662_v56, %v4661_v34  ;;  %v4664_v18 = vpop.f32.mrb[6].mxu1  ;;  %v4653_v22 = vpop.f32.mrb[35].mxu0 }
 0x355   : > { %v4665_v14 = vpop.f32.mrb[7].mxu1  ;;  %v4654_v19 = vadd.f32 %v4653_v22, %v4652_v29 }
 0x356   : > { %v4666_v50 = vadd.f32 %v4665_v14, %v4664_v18 }
 0x35a   : > { %v4667_v33 = vpop.f32.mrb[8].mxu1 }
 0x35b   : > { %v4668_v47 = vpop.f32.mrb[9].mxu1 }
 0x35c   : > { %v4711_v42 = vpop.f32.mrb[36].mxu0  ;;  %v4669_v9 = vadd.f32 %v4668_v47, %v4667_v33  ;;  %v4670_v15 = vpop.f32.mrb[10].mxu1 }
 0x35d   : > { %v4712_v40 = vpop.f32.mrb[37].mxu0  ;;  %v4671_v21 = vpop.f32.mrb[11].mxu1 }
 0x35e   : > { %v4713_v30 = vadd.f32 %v4712_v40, %v4711_v42  ;;  %v4714_v35 = vpop.f32.mrb[38].mxu0  ;;  %v4672_v1 = vadd.f32 %v4671_v21, %v4670_v15 }
 0x35f   : > { %v4715_v46 = vpop.f32.mrb[39].mxu0 }
 0x360   : > { %v7364_v63 = vadd.f32 %v4713_v30, %v4633_v12  ;;  %v4716_v31 = vadd.f32 %v4715_v46, %v4714_v35 }
 0x362   : > { %v7366_v45 = vadd.f32 %v4716_v31, %v4636_v37  ;;  %v4673_v62 = vpop.f32.mrb[12].mxu1 }
 0x363   : > { %v4674_v52 = vpop.f32.mrb[13].mxu1 }
 0x364   : > { %v4717_v36 = vpop.f32.mrb[40].mxu0  ;;  %v4675_v25 = vadd.f32 %v4674_v52, %v4673_v62  ;;  %v4676_v27 = vpop.f32.mrb[14].mxu1 }
 0x365   : > { %v4718_v26 = vpop.f32.mrb[41].mxu0  ;;  %v4677_v44 = vpop.f32.mrb[15].mxu1 }
 0x366   : > { %v4719_v16 = vadd.f32 %v4718_v26, %v4717_v36  ;;  %v4720_v7 = vpop.f32.mrb[42].mxu0  ;;  %v4678_v6 = vadd.f32 %v4677_v44, %v4676_v27 }
 0x367   : > { %v4721_v5 = vpop.f32.mrb[43].mxu0 }
 0x368   : > { %v7368_v20 = vadd.f32 %v4719_v16, %v4639_v4  ;;  %v4722_v49 = vadd.f32 %v4721_v5, %v4720_v7 }
 0x36a   : > { %v7370_v41 = vadd.f32 %v4722_v49, %v4642_v11 }
 0x36c   : > { %v4723_v61 = vpop.f32.mrb[44].mxu0 }
 0x36d   : > { %v4724_v3 = vpop.f32.mrb[45].mxu0 }
 0x36e   : > { %v4725_v12 = vadd.f32 %v4724_v3, %v4723_v61  ;;  %v4726_v53 = vpop.f32.mrb[46].mxu0 }
 0x36f   : > { %v4727_v60 = vpop.f32.mrb[47].mxu0 }
 0x370   : > { %v7372_v37 = vadd.f32 %v4725_v12, %v4645_v51  ;;  %v4728_v43 = vadd.f32 %v4727_v60, %v4726_v53 }
 0x372   : > { %v7374_v54 = vadd.f32 %v4728_v43, %v4648_v28 }
 0x374   : > { %v4729_v13 = vpop.f32.mrb[48].mxu0 }
 0x375   : > { %v4730_v17 = vpop.f32.mrb[49].mxu0 }
 0x376   : > { %v4731_v2 = vadd.f32 %v4730_v17, %v4729_v13  ;;  %v4732_v48 = vpop.f32.mrb[50].mxu0 }
 0x377   : > { %v4733_v32 = vpop.f32.mrb[51].mxu0 }
 0x378   : > { %v7376_v4 = vadd.f32 %v4731_v2, %v4651_v57  ;;  %v4734_v59 = vadd.f32 %v4733_v32, %v4732_v48 }
 0x37a   : > { %v7378_v11 = vadd.f32 %v4734_v59, %v4654_v19 }
 0x37c   : > { %v4735_v55 = vpop.f32.mrb[52].mxu0 }
 0x37d   : > { %v4736_v58 = vpop.f32.mrb[53].mxu0 }
 0x37e   : > { %v4737_v23 = vadd.f32 %v4736_v58, %v4735_v55  ;;  %v4738_v0 = vpop.f32.mrb[54].mxu0 }
 0x37f   : > { %v4739_v8 = vpop.f32.mrb[55].mxu0 }
 0x380   : > { %v7381_v51 = vadd.f32 %v4737_v23, %v7358_v39  ;;  %v4740_v28 = vadd.f32 %v4739_v8, %v4738_v0 }
 0x382   : > { %v7384_v34 = vadd.f32 %v4740_v28, %v7360_v10 }
 0x384   : > { %v4741_v38 = vpop.f32.mrb[56].mxu0 }
 0x385   : > { %v4742_v56 = vpop.f32.mrb[57].mxu0 }
 0x386   : > { %v4743_v29 = vadd.f32 %v4742_v56, %v4741_v38  ;;  %v4744_v57 = vpop.f32.mrb[58].mxu0 }
 0x387   : > { %v4745_v18 = vpop.f32.mrb[59].mxu0 }
 0x388   : > { %v7387_v22 = vadd.f32 %v4743_v29, %v7362_v24  ;;  %v4746_v14 = vadd.f32 %v4745_v18, %v4744_v57 }
 0x38a   : > { %v7389_v19 = vadd.f32 %v4746_v14, %v4666_v50 }
 0x38c   : > { %v4747_v33 = vpop.f32.mrb[60].mxu0 }
 0x38d   : > { %v4748_v42 = vpop.f32.mrb[61].mxu0 }
 0x38e   : > { %v4749_v47 = vadd.f32 %v4748_v42, %v4747_v33  ;;  %v4750_v39 = vpop.f32.mrb[62].mxu0 }
 0x38f   : > { %v4751_v40 = vpop.f32.mrb[63].mxu0 }
 0x390   : > { %v7391_v15 = vadd.f32 %v4749_v47, %v4669_v9  ;;  %v4752_v10 = vadd.f32 %v4751_v40, %v4750_v39 }
 0x392   : > { %v7393_v30 = vadd.f32 %v4752_v10, %v4672_v1 }
 0x394   : > { %v4753_v35 = vpop.f32.mrb[64].mxu0 }
 0x395   : > { %v4754_v21 = vpop.f32.mrb[65].mxu0 }
 0x396   : > { %v4755_v46 = vadd.f32 %v4754_v21, %v4753_v35  ;;  %v4756_v31 = vpop.f32.mrb[66].mxu0 }
 0x397   : > { %v4757_v62 = vpop.f32.mrb[67].mxu0 }
 0x398   : > { %v7395_v24 = vadd.f32 %v4755_v46, %v4675_v25  ;;  %v4758_v36 = vadd.f32 %v4757_v62, %v4756_v31 }
 0x39a   : > { %v7397_v50 = vadd.f32 %v4758_v36, %v4678_v6 }
 0x3ab   : > { %v4791_v52 = vpop.f32.mrb[32].mxu1 }
 0x3ac   : > { %v4792_v26 = vpop.f32.mrb[33].mxu1 }
 0x3ad   : > { %v4793_v27 = vadd.f32 %v4792_v26, %v4791_v52  ;;  %v4794_v16 = vpop.f32.mrb[34].mxu1 }
 0x3ae   : > { %v4795_v7 = vpop.f32.mrb[35].mxu1 }
 0x3af   : > { %v4796_v9 = vadd.f32 %v4795_v7, %v4794_v16  ;;  %v7400_v44 = vadd.f32 %v7364_v63, %v4793_v27 }
 0x3b1   : > { %v7403_v1 = vadd.f32 %v7366_v45, %v4796_v9 }
 0x3b3   : > { %v4797_v5 = vpop.f32.mrb[36].mxu1 }
 0x3b4   : > { %v4798_v49 = vpop.f32.mrb[37].mxu1 }
 0x3b5   : > { %v4799_v61 = vadd.f32 %v4798_v49, %v4797_v5  ;;  %v4800_v25 = vpop.f32.mrb[38].mxu1  ;;  %v7449_v5 = vld [vmem:[%s7532_s7] ss:$0 sm:$0xff] }
 0x3b6   : > { %v4801_v3 = vpop.f32.mrb[39].mxu1 }
 0x3b7   : > { %v4802_v12 = vadd.f32 %v4801_v3, %v4800_v25  ;;  %v5040_v6 = vadd.f32 %v7368_v20, %v4799_v61 }
 0x3b9   : > { %v5046_v53 = vadd.f32 %v7370_v41, %v4802_v12 }
 0x3bb   : > { %v4803_v60 = vpop.f32.mrb[40].mxu1 }
 0x3bc   : > { %v4804_v43 = vpop.f32.mrb[41].mxu1 }
 0x3bd   : > { %v4805_v13 = vadd.f32 %v4804_v43, %v4803_v60  ;;  %v4806_v17 = vpop.f32.mrb[42].mxu1 }
 0x3be   : > { %v4807_v2 = vpop.f32.mrb[43].mxu1 }
 0x3bf   : > { %v4808_v63 = vadd.f32 %v4807_v2, %v4806_v17  ;;  %v7408_v48 = vadd.f32 %v7372_v37, %v4805_v13 }
 0x3c1   : > { %v7411_v45 = vadd.f32 %v7374_v54, %v4808_v63 }
 0x3c3   : > { %v4809_v32 = vpop.f32.mrb[44].mxu1 }
 0x3c4   : > { %v4810_v59 = vpop.f32.mrb[45].mxu1 }
 0x3c5   : > { %v4811_v55 = vadd.f32 %v4810_v59, %v4809_v32  ;;  %v4812_v58 = vpop.f32.mrb[46].mxu1 }
 0x3c6   : > { %v4813_v23 = vpop.f32.mrb[47].mxu1 }
 0x3c7   : > { %v4814_v20 = vadd.f32 %v4813_v23, %v4812_v58  ;;  %v5052_v41 = vadd.f32 %v7376_v4, %v4811_v55 }
 0x3c9   : > { %v7415_v0 = vadd.f32 %v7378_v11, %v4814_v20 }
 0x3cb   : > { %v4815_v8 = vpop.f32.mrb[48].mxu1 }
 0x3cc   : > { %v4816_v28 = vpop.f32.mrb[49].mxu1 }
 0x3cd   : > { %v4817_v38 = vadd.f32 %v4816_v28, %v4815_v8  ;;  %v4818_v56 = vpop.f32.mrb[50].mxu1 }
 0x3ce   : > { %v4819_v37 = vpop.f32.mrb[51].mxu1 }
 0x3cf   : > { %v4820_v29 = vadd.f32 %v4819_v37, %v4818_v56  ;;  %v7418_v54 = vadd.f32 %v7381_v51, %v4817_v38 }
 0x3d1   : > { %v7421_v57 = vadd.f32 %v7384_v34, %v4820_v29 }
 0x3d3   : > { %v4821_v18 = vpop.f32.mrb[52].mxu1 }
 0x3d4   : > { %v4822_v14 = vpop.f32.mrb[53].mxu1 }
 0x3d5   : > { %v4823_v33 = vadd.f32 %v4822_v14, %v4821_v18  ;;  %v4824_v42 = vpop.f32.mrb[54].mxu1 }
 0x3d6   : > { %v4825_v4 = vpop.f32.mrb[55].mxu1 }
 0x3d7   : > { %v4826_v47 = vadd.f32 %v4825_v4, %v4824_v42  ;;  %v7424_v11 = vadd.f32 %v7387_v22, %v4823_v33 }
 0x3d9   : > { %v7427_v39 = vadd.f32 %v7389_v19, %v4826_v47 }
 0x3db   : > { %v4827_v40 = vpop.f32.mrb[56].mxu1 }
 0x3dc   : > { %v4828_v10 = vpop.f32.mrb[57].mxu1 }
 0x3dd   : > { %v4829_v35 = vadd.f32 %v4828_v10, %v4827_v40  ;;  %v4830_v51 = vpop.f32.mrb[58].mxu1 }
 0x3de   : > { %v4831_v21 = vpop.f32.mrb[59].mxu1 }
 0x3df   : > { %v4832_v46 = vadd.f32 %v4831_v21, %v4830_v51  ;;  %v7430_v34 = vadd.f32 %v7391_v15, %v4829_v35  ;;  %v7444_v15 = vld [vmem:[%s7531_s6] ss:$0 sm:$0xff] }
 0x3e1   : > { %v7433_v31 = vadd.f32 %v7393_v30, %v4832_v46 }
 0x3e3   : > { %v4833_v62 = vpop.f32.mrb[60].mxu1 }
 0x3e4   : > { %v4834_v36 = vpop.f32.mrb[61].mxu1 }
 0x3e5   : > { %v4835_v52 = vadd.f32 %v4834_v36, %v4833_v62  ;;  %v4836_v22 = vpop.f32.mrb[62].mxu1 }
 0x3e6   : > { %v4837_v26 = vpop.f32.mrb[63].mxu1 }
 0x3e7   : > { %v4838_v27 = vadd.f32 %v4837_v26, %v4836_v22  ;;  %v7436_v19 = vadd.f32 %v7395_v24, %v4835_v52 }
 0x3e9   : > { %v7439_v16 = vadd.f32 %v7397_v50, %v4838_v27 }
 0x3eb   : > { %v5009_v7 = vpop.f32.mrb[16].mxu1 }
 0x3ec   : > { %v5041_v30 = vadd.f32 %v5040_v6, %v5009_v7  ;;  %v3716_v9 = vpop.f32.mrb[17].mxu1 }
 0x3ed   : > { %v5044_v24 = vadd.f32 %v7400_v44, %v3716_v9  ;;  %v5010_v49 = vpop.f32.mrb[18].mxu1 }
 0x3ee   : > { %v3804_v50 = vmul.f32 %v5041_v30, %v7444_v15  ;;  %v5047_v61 = vadd.f32 %v5046_v53, %v5010_v49  ;;  %v3719_v25 = vpop.f32.mrb[19].mxu1 }
 0x3ef   : > { %v3802_v3 = vmul.f32 %v5044_v24, %v7444_v15  ;;  %v5050_v12 = vadd.f32 %v7403_v1, %v3719_v25 }
 0x3f0   : > { %v3827_v60 = vadd.f32 %v7449_v5, %v3804_v50  ;;  %v3805_v6 = vmul.f32 %v5047_v61, %v7444_v15 }
 0x3f1   : > { %v3825_v43 = vadd.f32 %v7449_v5, %v3802_v3  ;;  %v3803_v13 = vmul.f32 %v5050_v12, %v7444_v15 }
 0x3f2   : > { %v3828_v44 = vadd.f32 %v7449_v5, %v3805_v6  ;;  %v3843_v53 = vmax.f32 %v3827_v60, 0.0 }
 0x3f3   : > { %v3826_v17 = vadd.f32 %v7449_v5, %v3803_v13  ;;  %v5013_v2 = vpop.f32.mrb[20].mxu1  ;;  %v3841_v1 = vmax.f32 %v3825_v43, 0.0 }
 0x3f4   : > { %v3844_v63 = vmax.f32 %v3828_v44, 0.0  ;;  %v5053_v32 = vadd.f32 %v5052_v41, %v5013_v2  ;;  %v3732_v59 = vpop.f32.mrb[21].mxu1 }
 0x3f5   : > { %v3842_v55 = vmax.f32 %v3826_v17, 0.0  ;;  %v5056_v58 = vadd.f32 %v7408_v48, %v3732_v59  ;;  %v5014_v23 = vpop.f32.mrb[22].mxu1 }
 0x3f6   : > { %v4540_v20 = vpack.c.bf16 %v3844_v63, %v3843_v53  ;;  %v3808_v8 = vmul.f32 %v5053_v32, %v7444_v15  ;;  %v5059_v28 = vadd.f32 %v7415_v0, %v5014_v23  ;;  %v3735_v38 = vpop.f32.mrb[23].mxu1 }
 0x3f7   : > { %v4535_v41 = vpack.c.bf16 %v3842_v55, %v3841_v1  ;;  %v3806_v56 = vmul.f32 %v5056_v58, %v7444_v15  ;;  %v5062_v37 = vadd.f32 %v7411_v45, %v3735_v38 }
 0x3f8   : > { %4572 = vst [vmem:[%s7465_s25 + $0x8] sm:$0xff] %v4540_v20   ;;  %v3831_v29 = vadd.f32 %v7449_v5, %v3808_v8  ;;  %v3809_v18 = vmul.f32 %v5059_v28, %v7444_v15 }
 0x3f9   : > { %4536 = vst [vmem:[%s7465_s25] sm:$0xff] %v4535_v41   ;;  %v3829_v48 = vadd.f32 %v7449_v5, %v3806_v56  ;;  %v3807_v14 = vmul.f32 %v5062_v37, %v7444_v15 }
 0x3fa   : > { %v3832_v33 = vadd.f32 %v7449_v5, %v3809_v18  ;;  %v3847_v4 = vmax.f32 %v3831_v29, 0.0 }
 0x3fb   : > { %v3830_v0 = vadd.f32 %v7449_v5, %v3807_v14  ;;  %v5017_v42 = vpop.f32.mrb[24].mxu1  ;;  %v3845_v10 = vmax.f32 %v3829_v48, 0.0 }
 0x3fc   : > { %v3848_v47 = vmax.f32 %v3832_v33, 0.0  ;;  %v5065_v45 = vadd.f32 %v7424_v11, %v5017_v42  ;;  %v3748_v40 = vpop.f32.mrb[25].mxu1 }
 0x3fd   : > { %v3846_v35 = vmax.f32 %v3830_v0, 0.0  ;;  %v5068_v51 = vadd.f32 %v7418_v54, %v3748_v40  ;;  %v5018_v21 = vpop.f32.mrb[26].mxu1 }
 0x3fe   : > { %v4550_v46 = vpack.c.bf16 %v3848_v47, %v3847_v4  ;;  %v3812_v62 = vmul.f32 %v5065_v45, %v7444_v15  ;;  %v5071_v36 = vadd.f32 %v7427_v39, %v5018_v21  ;;  %v3751_v52 = vpop.f32.mrb[27].mxu1 }
 0x3ff   : > { %v4545_v22 = vpack.c.bf16 %v3846_v35, %v3845_v10  ;;  %v3810_v26 = vmul.f32 %v5068_v51, %v7444_v15  ;;  %v5074_v27 = vadd.f32 %v7421_v57, %v3751_v52 }
 0x400   : > { %4574 = vst [vmem:[%s7465_s25 + $0x18] sm:$0xff] %v4550_v46   ;;  %v3835_v11 = vadd.f32 %v7449_v5, %v3812_v62  ;;  %v3813_v7 = vmul.f32 %v5071_v36, %v7444_v15 }
 0x401   : > { %4573 = vst [vmem:[%s7465_s25 + $0x10] sm:$0xff] %v4545_v22   ;;  %v3833_v54 = vadd.f32 %v7449_v5, %v3810_v26  ;;  %v3811_v30 = vmul.f32 %v5074_v27, %v7444_v15 }
 0x402   : > { %v3836_v9 = vadd.f32 %v7449_v5, %v3813_v7  ;;  %v3851_v49 = vmax.f32 %v3835_v11, 0.0 }
 0x403   : > { %v3834_v39 = vadd.f32 %v7449_v5, %v3811_v30  ;;  %v5021_v24 = vpop.f32.mrb[28].mxu1  ;;  %v3849_v25 = vmax.f32 %v3833_v54, 0.0 }
 0x404   : > { %v3852_v50 = vmax.f32 %v3836_v9, 0.0  ;;  %v5077_v57 = vadd.f32 %v7436_v19, %v5021_v24  ;;  %v3764_v61 = vpop.f32.mrb[29].mxu1 }
 0x405   : > { %v3850_v3 = vmax.f32 %v3834_v39, 0.0  ;;  %v5080_v12 = vadd.f32 %v7430_v34, %v3764_v61  ;;  %v5022_v60 = vpop.f32.mrb[30].mxu1 }
 0x406   : > { %v4560_v6 = vpack.c.bf16 %v3852_v50, %v3851_v49  ;;  %v3816_v43 = vmul.f32 %v5077_v57, %v7444_v15  ;;  %v5083_v13 = vadd.f32 %v7439_v16, %v5022_v60  ;;  %v3767_v44 = vpop.f32.mrb[31].mxu1 }
 0x407   : > { %v4555_v17 = vpack.c.bf16 %v3850_v3, %v3849_v25  ;;  %v3814_v2 = vmul.f32 %v5080_v12, %v7444_v15  ;;  %v5086_v53 = vadd.f32 %v7433_v31, %v3767_v44 }
 0x408   : > { %4576 = vst [vmem:[%s7465_s25 + $0x28] sm:$0xff] %v4560_v6   ;;  %v3839_v19 = vadd.f32 %v7449_v5, %v3816_v43  ;;  %v3817_v63 = vmul.f32 %v5083_v13, %v7444_v15 }
 0x409   : > { %4575 = vst [vmem:[%s7465_s25 + $0x20] sm:$0xff] %v4555_v17   ;;  %v3837_v34 = vadd.f32 %v7449_v5, %v3814_v2  ;;  %v3815_v32 = vmul.f32 %v5086_v53, %v7444_v15 }
 0x40a   : > { %v3840_v16 = vadd.f32 %v7449_v5, %v3817_v63  ;;  %v3855_v1 = vmax.f32 %v3839_v19, 0.0 }
 0x40b   : > { %v3838_v59 = vadd.f32 %v7449_v5, %v3815_v32  ;;  %v3853_v58 = vmax.f32 %v3837_v34, 0.0 }
 0x40c   : > { %v3856_v55 = vmax.f32 %v3840_v16, 0.0 }
 0x40d   : > { %v3854_v23 = vmax.f32 %v3838_v59, 0.0 }
 0x40e   : > { %v4570_v31 = vpack.c.bf16 %v3856_v55, %v3855_v1 }
 0x40f   : > { %v4565_v20 = vpack.c.bf16 %v3854_v23, %v3853_v58 }
 0x410   : > { %4578 = vst [vmem:[%s7465_s25 + $0x38] sm:$0xff] %v4570_v31  }
 0x411   : > { %4577 = vst [vmem:[%s7465_s25 + $0x30] sm:$0xff] %v4565_v20  }
 0x412 PF: > { %s7650_s17 = sld [smem:[#allocation6_spill]]  ;;  %s7651_s27 = sld [smem:[#allocation4_spill]] }
 0x413   : > { %s7652_s28 = sld [smem:[#allocation5_spill]]  ;;  %s7653_s29 = sld [smem:[#allocation7_spill]] }
 0x414   : > { %s7654_s30 = sld [smem:[#allocation8_spill]] }
 0x418   : > { %s18_s9 = sadd.s32 1, %s7650_s17  }
 0x419   : > { %p15_p8 = scmp.ge.s32.totalorder %s18_s9, 6  }
 0x41b   :  { %17 = sbr.rel (!%p15_p8) target bundleno = 4 (0x4), region = 126 }

</bundles_post_ra>
